<compile_context>
chip_gen: v6e
topology: v6e:2x2x1
jax: 0.10.0
libtpu: 0.0.40
codegen_flags: <defaults>
</compile_context>

<pallas_src>
import functools
import math

import jax
import jax.numpy as jnp
import numpy as np
from jax import lax
from jax.experimental import pallas as pl
from jax.experimental.pallas import tpu as pltpu


def _triplet_wrt_kernel(xb_ref, xt_ref, sqc_ref, sqr_ref, tc_ref, tr_ref,
                        fp_ref, cn_ref,
                        mp_ref, sp_ref, wp_ref, mn_ref, sn_ref, wn_ref,
                        *, n_valid):
    # xb_ref:  (tm, D)  gram_dtype  row block of the embeddings
    # xt_ref:  (D, tn)  gram_dtype  column block of x, pre-transposed in HBM
    # sqc_ref: (tm, 1)  f32         ||x_i||^2 for the block rows
    # sqr_ref: (1, tn)  f32         ||x_j||^2 for the block columns
    # tc_ref:  (tm, 1)  i32         labels of the block rows
    # tr_ref:  (1, tn)  i32         labels of the block columns
    # fp_ref / cn_ref: (tm, 1) f32  outputs (written on the last column step)
    # m*/s*/w*: (tm, 1) f32 VMEM scratch: online-softmax state (pos / neg)
    i = pl.program_id(0)
    j = pl.program_id(1)
    nj = pl.num_programs(1)

    @pl.when(j == 0)
    def _():
        z = jnp.zeros(mp_ref.shape, jnp.float32)
        mp_ref[...] = z   # values are >= 0 (masked entries contribute 0), so 0-init is exact
        sp_ref[...] = z
        wp_ref[...] = z
        mn_ref[...] = z   # neg-branch values are <= 0, masked entries give 0 -> 0-init exact
        sn_ref[...] = z
        wn_ref[...] = z

    tm = xb_ref.shape[0]
    tn = xt_ref.shape[1]

    # One Gram matmul per (row, col) tile on the MXU; canonical (m,k)x(k,n)
    # contraction (RHS already transposed in HBM), f32 accumulation.
    gram = lax.dot_general(xb_ref[...], xt_ref[...], (((1,), (0,)), ((), ())),
                           preferred_element_type=jnp.float32)       # (tm, tn)

    d2 = sqc_ref[...] + sqr_ref[...] - 2.0 * gram
    row_g = i * tm + lax.broadcasted_iota(jnp.int32, (tm, tn), 0)
    col_g = j * tn + lax.broadcasted_iota(jnp.int32, (tm, tn), 1)
    # Force the self-distance diagonal to 0 (robust for bf16 Gram operands).
    d2 = jnp.where(row_g == col_g, 0.0, d2)
    dist = jnp.sqrt(jnp.maximum(d2, 1e-12))                          # (tm, tn)

    # Masks rebuilt in-kernel from the labels (boolean, no float mask temps).
    same = tc_ref[...] == tr_ref[...]                                # (tm, tn)
    if n_valid is not None:                                          # exclude padded columns
        valid = col_g < n_valid
        is_pos = jnp.logical_and(same, valid)
        is_neg = jnp.logical_and(jnp.logical_not(same), valid)
    else:
        is_pos = same
        is_neg = jnp.logical_not(same)

    # ---- online (flash-style) weighted softmax over the column tiles ----
    # positives: softmax over dist_ap = dist * is_pos, weighted by dist_ap
    d_ap = jnp.where(is_pos, dist, 0.0)
    m_new = jnp.maximum(mp_ref[...], jnp.max(d_ap, axis=1, keepdims=True))
    e_p = jnp.where(is_pos, jnp.exp(d_ap - m_new), 0.0)
    scale_p = jnp.exp(mp_ref[...] - m_new)
    sp_ref[...] = sp_ref[...] * scale_p + jnp.sum(e_p, axis=1, keepdims=True)
    wp_ref[...] = wp_ref[...] * scale_p + jnp.sum(d_ap * e_p, axis=1, keepdims=True)
    mp_ref[...] = m_new

    # negatives: softmax over -dist_an = -(dist * is_neg), weighted by dist_an
    d_an = jnp.where(is_neg, -dist, 0.0)
    mn_new = jnp.maximum(mn_ref[...], jnp.max(d_an, axis=1, keepdims=True))
    e_n = jnp.where(is_neg, jnp.exp(d_an - mn_new), 0.0)
    scale_n = jnp.exp(mn_ref[...] - mn_new)
    sn_ref[...] = sn_ref[...] * scale_n + jnp.sum(e_n, axis=1, keepdims=True)
    wn_ref[...] = wn_ref[...] * scale_n + jnp.sum(dist * e_n, axis=1, keepdims=True)
    mn_ref[...] = mn_new

    @pl.when(j == nj - 1)
    def _():
        fp_ref[...] = wp_ref[...] / (sp_ref[...] + 1e-6)
        cn_ref[...] = wn_ref[...] / (sn_ref[...] + 1e-6)


def _round_up(x, m):
    return ((x + m - 1) // m) * m


def _default_block_rows():
    """256 for the 256x256 MXUs (v6e/v7x), 128 otherwise (v5e and older)."""
    try:
        kind = jax.devices()[0].device_kind.lower()
    except Exception:
        return 128
    if "v6" in kind or "v7" in kind:
        return 256
    return 128


def triplet_loss_wrt(inputs, targets, normalize_feature=False,
                     gram_dtype=jnp.bfloat16,
                     block_rows=None, block_cols=None,
                     vmem_limit_bytes=32 * 1024 * 1024):
    """Pallas implementation of TripletLoss_WRT.forward -> (loss, correct)."""
    inputs = inputs.astype(jnp.float32)
    targets = targets.astype(jnp.int32)

    if normalize_feature:
        # normalize(x, axis=-1): x / (||x||_2 + 1e-12)
        nrm = jnp.sqrt(jnp.sum(inputs * inputs, axis=-1, keepdims=True))
        inputs = inputs / (nrm + 1e-12)

    n, d = inputs.shape
    default_blk = _default_block_rows()
    tm = block_rows if block_rows is not None else default_blk
    tn = block_cols if block_cols is not None else tm

    # MXU / lane friendly blocks: multiples of 128, no larger than the padded N.
    n_pad_min = _round_up(n, 128)
    tm = min(max(128, _round_up(int(tm), 128)), n_pad_min)
    tn = min(max(128, _round_up(int(tn), 128)), n_pad_min)
    n_pad = _round_up(n, math.lcm(tm, tn))
    pad = n_pad - n

    x_pad = jnp.pad(inputs, ((0, pad), (0, 0))) if pad else inputs
    t_pad = jnp.pad(targets, ((0, pad),), constant_values=-1) if pad else targets

    sq = jnp.sum(x_pad * x_pad, axis=1)            # f32, from unrounded features
    sq_col = sq[:, None]                           # (N_pad, 1)
    sq_row = sq[None, :]                           # (1, N_pad)
    t_col = t_pad[:, None]                         # (N_pad, 1) i32
    t_row = t_pad[None, :]                         # (1, N_pad) i32

    x_rows = x_pad.astype(gram_dtype)              # (N_pad, D) MXU LHS (bf16 by default)
    x_cols = x_pad.T.astype(gram_dtype)            # (D, N_pad) pre-transposed MXU RHS

    grid = (n_pad // tm, n_pad // tn)
    kernel = functools.partial(_triplet_wrt_kernel,
                               n_valid=(n if pad else None))

    fp, cn = pl.pallas_call(
        kernel,
        grid=grid,
        in_specs=[
            pl.BlockSpec((tm, d), lambda i, j: (i, 0)),   # row block of x
            pl.BlockSpec((d, tn), lambda i, j: (0, j)),   # column block of x.T
            pl.BlockSpec((tm, 1), lambda i, j: (i, 0)),   # ||x_i||^2
            pl.BlockSpec((1, tn), lambda i, j: (0, j)),   # ||x_j||^2
            pl.BlockSpec((tm, 1), lambda i, j: (i, 0)),   # labels (rows)
            pl.BlockSpec((1, tn), lambda i, j: (0, j)),   # labels (cols)
        ],
        out_specs=(
            pl.BlockSpec((tm, 1), lambda i, j: (i, 0)),
            pl.BlockSpec((tm, 1), lambda i, j: (i, 0)),
        ),
        out_shape=(
            jax.ShapeDtypeStruct((n_pad, 1), jnp.float32),
            jax.ShapeDtypeStruct((n_pad, 1), jnp.float32),
        ),
        scratch_shapes=[pltpu.VMEM((tm, 1), jnp.float32) for _ in range(6)],
        compiler_params=pltpu.CompilerParams(
            dimension_semantics=("parallel", "arbitrary"),
            vmem_limit_bytes=vmem_limit_bytes,
        ),
    )(x_rows, x_cols, sq_col, sq_row, t_col, t_row)

    fp = fp[:n, 0]
    cn = cn[:n, 0]
    # SoftMarginLoss(cn - fp, y=1), mean reduction: mean(log(1 + exp(-(cn - fp)))).
    loss = jnp.mean(jax.nn.softplus(fp - cn))
    # TODO(synk): PyTorch returns `correct` via .item() (host sync); we return a device scalar.
    correct = jnp.sum((cn >= fp).astype(jnp.int32))
    return loss, correct


def triplet_loss_wrt_ref(inputs, targets, normalize_feature=False):
    """Pure-JAX reference mirroring the PyTorch module."""
    inputs = inputs.astype(jnp.float32)
    if normalize_feature:
        nrm = jnp.sqrt(jnp.sum(inputs * inputs, axis=-1, keepdims=True))
        inputs = inputs / (nrm + 1e-12)
    sq = jnp.sum(inputs * inputs, axis=1, keepdims=True)
    gram = jnp.matmul(inputs, inputs.T, precision=lax.Precision.HIGHEST)
    dist = jnp.sqrt(jnp.maximum(sq + sq.T - 2.0 * gram, 1e-12))
    is_pos = (targets[:, None] == targets[None, :]).astype(jnp.float32)
    is_neg = 1.0 - is_pos
    dist_ap = dist * is_pos
    dist_an = dist * is_neg

    def softmax_weights(dmat, mask):
        max_v = jnp.max(dmat * mask, axis=1, keepdims=True)
        diff = dmat - max_v
        z = jnp.sum(jnp.exp(diff) * mask, axis=1, keepdims=True) + 1e-6
        return jnp.exp(diff) * mask / z

    w_ap = softmax_weights(dist_ap, is_pos)
    w_an = softmax_weights(-dist_an, is_neg)
    fp = jnp.sum(dist_ap * w_ap, axis=1)
    cn = jnp.sum(dist_an * w_an, axis=1)
    loss = jnp.mean(jax.nn.softplus(fp - cn))
    correct = jnp.sum((cn >= fp).astype(jnp.int32))
    return loss, correct


if __name__ == "__main__":
    key = jax.random.PRNGKey(0)

    # --- Test 1: small shape (N=16, D=128), single padded tile -------------
    num_ids, per_id, feat_dim = 4, 4, 128
    n1 = num_ids * per_id
    k1, k2 = jax.random.split(key)
    x1 = jax.random.normal(k1, (n1, feat_dim), dtype=jnp.float32)
    t1 = jnp.repeat(jnp.arange(num_ids, dtype=jnp.int32), per_id)

    rl1, rc1 = jax.block_until_ready(triplet_loss_wrt_ref(x1, t1))

    # f32 Gram path: tight check (loss + correct count).
    loss1, corr1 = jax.block_until_ready(
        triplet_loss_wrt(x1, t1, gram_dtype=jnp.float32))
    np.testing.assert_allclose(np.asarray(loss1), np.asarray(rl1),
                               rtol=2e-3, atol=1e-5)
    assert int(corr1) == int(rc1)

    # normalize_feature=True path (f32 Gram).
    loss1n, corr1n = jax.block_until_ready(
        triplet_loss_wrt(x1, t1, normalize_feature=True, gram_dtype=jnp.float32))
    rl1n, rc1n = jax.block_until_ready(
        triplet_loss_wrt_ref(x1, t1, normalize_feature=True))
    np.testing.assert_allclose(np.asarray(loss1n), np.asarray(rl1n),
                               rtol=2e-3, atol=1e-5)
    assert int(corr1n) == int(rc1n)

    # Default (bf16 Gram operands, f32 accumulation): loose check.
    loss1b, _ = jax.block_until_ready(triplet_loss_wrt(x1, t1))
    np.testing.assert_allclose(np.asarray(loss1b), np.asarray(rl1),
                               rtol=1e-1, atol=5e-2)

    # --- Test 2: multi-tile grid with padding (N=160 -> 256, 128x128 tiles),
    #             exercises the online softmax across column tiles -----------
    num_ids2, per_id2 = 20, 8
    n2 = num_ids2 * per_id2                      # 160 -> padded to 256, grid (2, 2)
    x2 = jax.random.normal(k2, (n2, feat_dim), dtype=jnp.float32)
    t2 = jnp.repeat(jnp.arange(num_ids2, dtype=jnp.int32), per_id2)

    loss2, corr2 = jax.block_until_ready(
        triplet_loss_wrt(x2, t2, gram_dtype=jnp.float32,
                         block_rows=128, block_cols=128))
    rl2, rc2 = jax.block_until_ready(triplet_loss_wrt_ref(x2, t2))
    np.testing.assert_allclose(np.asarray(loss2), np.asarray(rl2),
                               rtol=2e-3, atol=1e-5)
    assert int(corr2) == int(rc2)

    # Default bf16 Gram on the multi-tile grid: loose check.
    loss2b, _ = jax.block_until_ready(
        triplet_loss_wrt(x2, t2, block_rows=128, block_cols=128))
    np.testing.assert_allclose(np.asarray(loss2b), np.asarray(rl2),
                               rtol=1e-1, atol=5e-2)

    print("KERNEL_OK")
</pallas_src>

<mosaic_0001>
module attributes {stable_mosaic.version = 11 : i64} {
  func.func @_triplet_wrt_kernel(%arg0: i32, %arg1: i32, %arg2: memref<128x128xf32, #tpu.memory_space<vmem>>, %arg3: memref<128x128xf32, #tpu.memory_space<vmem>>, %arg4: memref<128x1xf32, #tpu.memory_space<vmem>>, %arg5: memref<1x128xf32, #tpu.memory_space<vmem>>, %arg6: memref<128x1xi32, #tpu.memory_space<vmem>>, %arg7: memref<1x128xi32, #tpu.memory_space<vmem>>, %arg8: memref<128x1xf32, #tpu.memory_space<vmem>>, %arg9: memref<128x1xf32, #tpu.memory_space<vmem>>, %arg10: memref<128x1xf32, #tpu.memory_space<vmem>>, %arg11: memref<128x1xf32, #tpu.memory_space<vmem>>, %arg12: memref<128x1xf32, #tpu.memory_space<vmem>>, %arg13: memref<128x1xf32, #tpu.memory_space<vmem>>, %arg14: memref<128x1xf32, #tpu.memory_space<vmem>>, %arg15: memref<128x1xf32, #tpu.memory_space<vmem>>) attributes {dimension_semantics = [#tpu.dimension_semantics<parallel>, #tpu.dimension_semantics<arbitrary>], iteration_bounds = array<i64: 1, 1>, scalar_prefetch = 0 : i64, scratch_operands = 6 : i64, tpu.core_type = #tpu.core_type<tc>, window_params = [{transform_indices = @transform_0, window_bounds = array<i64: 128, 128>}, {transform_indices = @transform_1, window_bounds = array<i64: 128, 128>}, {transform_indices = @transform_2, window_bounds = array<i64: 128, 1>}, {transform_indices = @transform_3, window_bounds = array<i64: 1, 128>}, {transform_indices = @transform_4, window_bounds = array<i64: 128, 1>}, {transform_indices = @transform_5, window_bounds = array<i64: 1, 128>}, {transform_indices = @transform_6, window_bounds = array<i64: 128, 1>}, {transform_indices = @transform_7, window_bounds = array<i64: 128, 1>}]} {
    %c0_i32 = arith.constant 0 : i32
    %0 = arith.cmpi eq, %arg1, %c0_i32 : i32
    %1 = arith.extui %0 : i1 to i32
    %c0_i32_0 = arith.constant 0 : i32
    %2 = arith.cmpi ne, %1, %c0_i32_0 : i32
    scf.if %2 {
      %cst_58 = arith.constant 0.000000e+00 : f32
      %99 = vector.broadcast %cst_58 : f32 to vector<128x1xf32>
      %c0_59 = arith.constant 0 : index
      %c0_60 = arith.constant 0 : index
      %100 = vector.load %arg10[%c0_59, %c0_60] : memref<128x1xf32, #tpu.memory_space<vmem>>, vector<128x1xf32>
      tpu.vector_store %arg10[%c0_59, %c0_60], %99 {strides = array<i32>} : memref<128x1xf32, #tpu.memory_space<vmem>>, vector<128x1xf32>,
      %c0_61 = arith.constant 0 : index
      %c0_62 = arith.constant 0 : index
      %101 = vector.load %arg11[%c0_61, %c0_62] : memref<128x1xf32, #tpu.memory_space<vmem>>, vector<128x1xf32>
      tpu.vector_store %arg11[%c0_61, %c0_62], %99 {strides = array<i32>} : memref<128x1xf32, #tpu.memory_space<vmem>>, vector<128x1xf32>,
      %c0_63 = arith.constant 0 : index
      %c0_64 = arith.constant 0 : index
      %102 = vector.load %arg12[%c0_63, %c0_64] : memref<128x1xf32, #tpu.memory_space<vmem>>, vector<128x1xf32>
      tpu.vector_store %arg12[%c0_63, %c0_64], %99 {strides = array<i32>} : memref<128x1xf32, #tpu.memory_space<vmem>>, vector<128x1xf32>,
      %c0_65 = arith.constant 0 : index
      %c0_66 = arith.constant 0 : index
      %103 = vector.load %arg13[%c0_65, %c0_66] : memref<128x1xf32, #tpu.memory_space<vmem>>, vector<128x1xf32>
      tpu.vector_store %arg13[%c0_65, %c0_66], %99 {strides = array<i32>} : memref<128x1xf32, #tpu.memory_space<vmem>>, vector<128x1xf32>,
      %c0_67 = arith.constant 0 : index
      %c0_68 = arith.constant 0 : index
      %104 = vector.load %arg14[%c0_67, %c0_68] : memref<128x1xf32, #tpu.memory_space<vmem>>, vector<128x1xf32>
      tpu.vector_store %arg14[%c0_67, %c0_68], %99 {strides = array<i32>} : memref<128x1xf32, #tpu.memory_space<vmem>>, vector<128x1xf32>,
      %c0_69 = arith.constant 0 : index
      %c0_70 = arith.constant 0 : index
      %105 = vector.load %arg15[%c0_69, %c0_70] : memref<128x1xf32, #tpu.memory_space<vmem>>, vector<128x1xf32>
      tpu.vector_store %arg15[%c0_69, %c0_70], %99 {strides = array<i32>} : memref<128x1xf32, #tpu.memory_space<vmem>>, vector<128x1xf32>,
    } else {
    }
    %c0 = arith.constant 0 : index
    %c0_1 = arith.constant 0 : index
    %3 = vector.load %arg2[%c0, %c0_1] : memref<128x128xf32, #tpu.memory_space<vmem>>, vector<128x128xf32>
    %c0_2 = arith.constant 0 : index
    %c0_3 = arith.constant 0 : index
    %4 = vector.load %arg3[%c0_2, %c0_3] : memref<128x128xf32, #tpu.memory_space<vmem>>, vector<128x128xf32>
    %cst = arith.constant dense<0.000000e+00> : vector<128x128xf32>
    %5 = tpu.matmul %3, %4, %cst {dimension_numbers = #tpu.dot_dimension_numbers<[1], [0], [0], [1], [0, 0, 1, 1], [], []>} : vector<128x128xf32>, vector<128x128xf32>, vector<128x128xf32> -> vector<128x128xf32>
    %c0_4 = arith.constant 0 : index
    %c0_5 = arith.constant 0 : index
    %6 = vector.load %arg4[%c0_4, %c0_5] : memref<128x1xf32, #tpu.memory_space<vmem>>, vector<128x1xf32>
    %c0_6 = arith.constant 0 : index
    %c0_7 = arith.constant 0 : index
    %7 = vector.load %arg5[%c0_6, %c0_7] : memref<1x128xf32, #tpu.memory_space<vmem>>, vector<1x128xf32>
    %8 = vector.broadcast %6 : vector<128x1xf32> to vector<128x128xf32>
    %9 = vector.broadcast %7 : vector<1x128xf32> to vector<128x128xf32>
    %10 = arith.addf %8, %9 : vector<128x128xf32>
    %cst_8 = arith.constant 2.000000e+00 : f32
    %11 = vector.broadcast %cst_8 : f32 to vector<128x128xf32>
    %12 = arith.mulf %11, %5 : vector<128x128xf32>
    %13 = arith.subf %10, %12 : vector<128x128xf32>
    %c128_i32 = arith.constant 128 : i32
    %14 = arith.muli %arg0, %c128_i32 : i32
    %15 = tpu.iota {dimensions = array<i32: 0>} : vector<128x128xi32>
    %16 = vector.broadcast %14 : i32 to vector<128x128xi32>
    %17 = arith.addi %16, %15 : vector<128x128xi32>
    %c128_i32_9 = arith.constant 128 : i32
    %18 = arith.muli %arg1, %c128_i32_9 : i32
    %19 = tpu.iota {dimensions = array<i32: 1>} : vector<128x128xi32>
    %20 = vector.broadcast %18 : i32 to vector<128x128xi32>
    %21 = arith.addi %20, %19 : vector<128x128xi32>
    %22 = arith.cmpi eq, %17, %21 : vector<128x128xi32>
    %cst_10 = arith.constant 0.000000e+00 : f32
    %23 = vector.broadcast %cst_10 : f32 to vector<128x128xf32>
    %24 = arith.select %22, %23, %13 : vector<128x128xi1>, vector<128x128xf32>
    %cst_11 = arith.constant 9.99999996E-13 : f32
    %25 = vector.broadcast %cst_11 : f32 to vector<128x128xf32>
    %26 = arith.maximumf %24, %25 : vector<128x128xf32>
    %27 = math.sqrt %26 : vector<128x128xf32>
    %c0_12 = arith.constant 0 : index
    %c0_13 = arith.constant 0 : index
    %28 = vector.load %arg6[%c0_12, %c0_13] : memref<128x1xi32, #tpu.memory_space<vmem>>, vector<128x1xi32>
    %c0_14 = arith.constant 0 : index
    %c0_15 = arith.constant 0 : index
    %29 = vector.load %arg7[%c0_14, %c0_15] : memref<1x128xi32, #tpu.memory_space<vmem>>, vector<1x128xi32>
    %30 = vector.broadcast %28 : vector<128x1xi32> to vector<128x128xi32>
    %31 = vector.broadcast %29 : vector<1x128xi32> to vector<128x128xi32>
    %32 = arith.cmpi eq, %30, %31 : vector<128x128xi32>
    %c16_i32 = arith.constant 16 : i32
    %33 = vector.broadcast %c16_i32 : i32 to vector<128x128xi32>
    %34 = arith.cmpi slt, %21, %33 : vector<128x128xi32>
    %35 = arith.andi %32, %34 : vector<128x128xi1>
    %cst_16 = arith.constant dense<true> : vector<128x128xi1>
    %36 = arith.xori %32, %cst_16 : vector<128x128xi1>
    %37 = arith.andi %36, %34 : vector<128x128xi1>
    %cst_17 = arith.constant 0.000000e+00 : f32
    %38 = vector.broadcast %cst_17 : f32 to vector<128x128xf32>
    %39 = arith.select %35, %27, %38 : vector<128x128xi1>, vector<128x128xf32>
    %c0_18 = arith.constant 0 : index
    %c0_19 = arith.constant 0 : index
    %40 = vector.load %arg10[%c0_18, %c0_19] : memref<128x1xf32, #tpu.memory_space<vmem>>, vector<128x1xf32>
    %cst_20 = arith.constant dense<0xFF800000> : vector<128xf32>
    %41 = vector.multi_reduction <maximumf>, %39, %cst_20 [1] : vector<128x128xf32> to vector<128xf32>
    %42 = vector.shape_cast %41 : vector<128xf32> to vector<128x1xf32>
    %43 = arith.maximumf %40, %42 : vector<128x1xf32>
    %44 = vector.broadcast %43 : vector<128x1xf32> to vector<128x128xf32>
    %45 = arith.subf %39, %44 : vector<128x128xf32>
    %46 = math.exp %45 : vector<128x128xf32>
    %cst_21 = arith.constant 0.000000e+00 : f32
    %47 = vector.broadcast %cst_21 : f32 to vector<128x128xf32>
    %48 = arith.select %35, %46, %47 : vector<128x128xi1>, vector<128x128xf32>
    %c0_22 = arith.constant 0 : index
    %c0_23 = arith.constant 0 : index
    %49 = vector.load %arg10[%c0_22, %c0_23] : memref<128x1xf32, #tpu.memory_space<vmem>>, vector<128x1xf32>
    %50 = arith.subf %49, %43 : vector<128x1xf32>
    %51 = math.exp %50 : vector<128x1xf32>
    %c0_24 = arith.constant 0 : index
    %c0_25 = arith.constant 0 : index
    %52 = vector.load %arg11[%c0_24, %c0_25] : memref<128x1xf32, #tpu.memory_space<vmem>>, vector<128x1xf32>
    %53 = arith.mulf %52, %51 : vector<128x1xf32>
    %cst_26 = arith.constant dense<0.000000e+00> : vector<128xf32>
    %54 = vector.multi_reduction <add>, %48, %cst_26 [1] : vector<128x128xf32> to vector<128xf32>
    %55 = vector.shape_cast %54 : vector<128xf32> to vector<128x1xf32>
    %56 = arith.addf %53, %55 : vector<128x1xf32>
    %c0_27 = arith.constant 0 : index
    %c0_28 = arith.constant 0 : index
    %57 = vector.load %arg11[%c0_27, %c0_28] : memref<128x1xf32, #tpu.memory_space<vmem>>, vector<128x1xf32>
    tpu.vector_store %arg11[%c0_27, %c0_28], %56 {strides = array<i32>} : memref<128x1xf32, #tpu.memory_space<vmem>>, vector<128x1xf32>,
    %c0_29 = arith.constant 0 : index
    %c0_30 = arith.constant 0 : index
    %58 = vector.load %arg12[%c0_29, %c0_30] : memref<128x1xf32, #tpu.memory_space<vmem>>, vector<128x1xf32>
    %59 = arith.mulf %58, %51 : vector<128x1xf32>
    %60 = arith.mulf %39, %48 : vector<128x128xf32>
    %cst_31 = arith.constant dense<0.000000e+00> : vector<128xf32>
    %61 = vector.multi_reduction <add>, %60, %cst_31 [1] : vector<128x128xf32> to vector<128xf32>
    %62 = vector.shape_cast %61 : vector<128xf32> to vector<128x1xf32>
    %63 = arith.addf %59, %62 : vector<128x1xf32>
    %c0_32 = arith.constant 0 : index
    %c0_33 = arith.constant 0 : index
    %64 = vector.load %arg12[%c0_32, %c0_33] : memref<128x1xf32, #tpu.memory_space<vmem>>, vector<128x1xf32>
    tpu.vector_store %arg12[%c0_32, %c0_33], %63 {strides = array<i32>} : memref<128x1xf32, #tpu.memory_space<vmem>>, vector<128x1xf32>,
    %c0_34 = arith.constant 0 : index
    %c0_35 = arith.constant 0 : index
    %65 = vector.load %arg10[%c0_34, %c0_35] : memref<128x1xf32, #tpu.memory_space<vmem>>, vector<128x1xf32>
    tpu.vector_store %arg10[%c0_34, %c0_35], %43 {strides = array<i32>} : memref<128x1xf32, #tpu.memory_space<vmem>>, vector<128x1xf32>,
    %cst_36 = arith.constant 0.000000e+00 : f32
    %66 = vector.broadcast %cst_36 : f32 to vector<128x128xf32>
    %67 = arith.subf %66, %27 : vector<128x128xf32>
    %cst_37 = arith.constant 0.000000e+00 : f32
    %68 = vector.broadcast %cst_37 : f32 to vector<128x128xf32>
    %69 = arith.select %37, %67, %68 : vector<128x128xi1>, vector<128x128xf32>
    %c0_38 = arith.constant 0 : index
    %c0_39 = arith.constant 0 : index
    %70 = vector.load %arg13[%c0_38, %c0_39] : memref<128x1xf32, #tpu.memory_space<vmem>>, vector<128x1xf32>
    %cst_40 = arith.constant dense<0xFF800000> : vector<128xf32>
    %71 = vector.multi_reduction <maximumf>, %69, %cst_40 [1] : vector<128x128xf32> to vector<128xf32>
    %72 = vector.shape_cast %71 : vector<128xf32> to vector<128x1xf32>
    %73 = arith.maximumf %70, %72 : vector<128x1xf32>
    %74 = vector.broadcast %73 : vector<128x1xf32> to vector<128x128xf32>
    %75 = arith.subf %69, %74 : vector<128x128xf32>
    %76 = math.exp %75 : vector<128x128xf32>
    %cst_41 = arith.constant 0.000000e+00 : f32
    %77 = vector.broadcast %cst_41 : f32 to vector<128x128xf32>
    %78 = arith.select %37, %76, %77 : vector<128x128xi1>, vector<128x128xf32>
    %c0_42 = arith.constant 0 : index
    %c0_43 = arith.constant 0 : index
    %79 = vector.load %arg13[%c0_42, %c0_43] : memref<128x1xf32, #tpu.memory_space<vmem>>, vector<128x1xf32>
    %80 = arith.subf %79, %73 : vector<128x1xf32>
    %81 = math.exp %80 : vector<128x1xf32>
    %c0_44 = arith.constant 0 : index
    %c0_45 = arith.constant 0 : index
    %82 = vector.load %arg14[%c0_44, %c0_45] : memref<128x1xf32, #tpu.memory_space<vmem>>, vector<128x1xf32>
    %83 = arith.mulf %82, %81 : vector<128x1xf32>
    %cst_46 = arith.constant dense<0.000000e+00> : vector<128xf32>
    %84 = vector.multi_reduction <add>, %78, %cst_46 [1] : vector<128x128xf32> to vector<128xf32>
    %85 = vector.shape_cast %84 : vector<128xf32> to vector<128x1xf32>
    %86 = arith.addf %83, %85 : vector<128x1xf32>
    %c0_47 = arith.constant 0 : index
    %c0_48 = arith.constant 0 : index
    %87 = vector.load %arg14[%c0_47, %c0_48] : memref<128x1xf32, #tpu.memory_space<vmem>>, vector<128x1xf32>
    tpu.vector_store %arg14[%c0_47, %c0_48], %86 {strides = array<i32>} : memref<128x1xf32, #tpu.memory_space<vmem>>, vector<128x1xf32>,
    %c0_49 = arith.constant 0 : index
    %c0_50 = arith.constant 0 : index
    %88 = vector.load %arg15[%c0_49, %c0_50] : memref<128x1xf32, #tpu.memory_space<vmem>>, vector<128x1xf32>
    %89 = arith.mulf %88, %81 : vector<128x1xf32>
    %90 = arith.mulf %27, %78 : vector<128x128xf32>
    %cst_51 = arith.constant dense<0.000000e+00> : vector<128xf32>
    %91 = vector.multi_reduction <add>, %90, %cst_51 [1] : vector<128x128xf32> to vector<128xf32>
    %92 = vector.shape_cast %91 : vector<128xf32> to vector<128x1xf32>
    %93 = arith.addf %89, %92 : vector<128x1xf32>
    %c0_52 = arith.constant 0 : index
    %c0_53 = arith.constant 0 : index
    %94 = vector.load %arg15[%c0_52, %c0_53] : memref<128x1xf32, #tpu.memory_space<vmem>>, vector<128x1xf32>
    tpu.vector_store %arg15[%c0_52, %c0_53], %93 {strides = array<i32>} : memref<128x1xf32, #tpu.memory_space<vmem>>, vector<128x1xf32>,
    %c0_54 = arith.constant 0 : index
    %c0_55 = arith.constant 0 : index
    %95 = vector.load %arg13[%c0_54, %c0_55] : memref<128x1xf32, #tpu.memory_space<vmem>>, vector<128x1xf32>
    tpu.vector_store %arg13[%c0_54, %c0_55], %73 {strides = array<i32>} : memref<128x1xf32, #tpu.memory_space<vmem>>, vector<128x1xf32>,
    %c0_i32_56 = arith.constant 0 : i32
    %96 = arith.cmpi eq, %arg1, %c0_i32_56 : i32
    %97 = arith.extui %96 : i1 to i32
    %c0_i32_57 = arith.constant 0 : i32
    %98 = arith.cmpi ne, %97, %c0_i32_57 : i32
    scf.if %98 {
      %c0_58 = arith.constant 0 : index
      %c0_59 = arith.constant 0 : index
      %99 = vector.load %arg12[%c0_58, %c0_59] : memref<128x1xf32, #tpu.memory_space<vmem>>, vector<128x1xf32>
      %c0_60 = arith.constant 0 : index
      %c0_61 = arith.constant 0 : index
      %100 = vector.load %arg11[%c0_60, %c0_61] : memref<128x1xf32, #tpu.memory_space<vmem>>, vector<128x1xf32>
      %cst_62 = arith.constant 9.99999997E-7 : f32
      %101 = vector.broadcast %cst_62 : f32 to vector<128x1xf32>
      %102 = arith.addf %100, %101 : vector<128x1xf32>
      %103 = arith.divf %99, %102 : vector<128x1xf32>
      %c0_63 = arith.constant 0 : index
      %c0_64 = arith.constant 0 : index
      %104 = vector.load %arg8[%c0_63, %c0_64] : memref<128x1xf32, #tpu.memory_space<vmem>>, vector<128x1xf32>
      tpu.vector_store %arg8[%c0_63, %c0_64], %103 {strides = array<i32>} : memref<128x1xf32, #tpu.memory_space<vmem>>, vector<128x1xf32>,
      %c0_65 = arith.constant 0 : index
      %c0_66 = arith.constant 0 : index
      %105 = vector.load %arg15[%c0_65, %c0_66] : memref<128x1xf32, #tpu.memory_space<vmem>>, vector<128x1xf32>
      %c0_67 = arith.constant 0 : index
      %c0_68 = arith.constant 0 : index
      %106 = vector.load %arg14[%c0_67, %c0_68] : memref<128x1xf32, #tpu.memory_space<vmem>>, vector<128x1xf32>
      %cst_69 = arith.constant 9.99999997E-7 : f32
      %107 = vector.broadcast %cst_69 : f32 to vector<128x1xf32>
      %108 = arith.addf %106, %107 : vector<128x1xf32>
      %109 = arith.divf %105, %108 : vector<128x1xf32>
      %c0_70 = arith.constant 0 : index
      %c0_71 = arith.constant 0 : index
      %110 = vector.load %arg9[%c0_70, %c0_71] : memref<128x1xf32, #tpu.memory_space<vmem>>, vector<128x1xf32>
      tpu.vector_store %arg9[%c0_70, %c0_71], %109 {strides = array<i32>} : memref<128x1xf32, #tpu.memory_space<vmem>>, vector<128x1xf32>,
    } else {
    }
    return
  }
  func.func @transform_0(%arg0: i32, %arg1: i32) -> (i32, i32) {
    %c0_i32 = arith.constant 0 : i32
    %c0_i32_0 = arith.constant 0 : i32
    return %arg0, %c0_i32 : i32, i32
  }
  func.func @transform_1(%arg0: i32, %arg1: i32) -> (i32, i32) {
    %c0_i32 = arith.constant 0 : i32
    %c0_i32_0 = arith.constant 0 : i32
    return %c0_i32, %arg1 : i32, i32
  }
  func.func @transform_2(%arg0: i32, %arg1: i32) -> (i32, i32) {
    %c0_i32 = arith.constant 0 : i32
    %c0_i32_0 = arith.constant 0 : i32
    return %arg0, %c0_i32 : i32, i32
  }
  func.func @transform_3(%arg0: i32, %arg1: i32) -> (i32, i32) {
    %c0_i32 = arith.constant 0 : i32
    %c0_i32_0 = arith.constant 0 : i32
    return %c0_i32, %arg1 : i32, i32
  }
  func.func @transform_4(%arg0: i32, %arg1: i32) -> (i32, i32) {
    %c0_i32 = arith.constant 0 : i32
    %c0_i32_0 = arith.constant 0 : i32
    return %arg0, %c0_i32 : i32, i32
  }
  func.func @transform_5(%arg0: i32, %arg1: i32) -> (i32, i32) {
    %c0_i32 = arith.constant 0 : i32
    %c0_i32_0 = arith.constant 0 : i32
    return %c0_i32, %arg1 : i32, i32
  }
  func.func @transform_6(%arg0: i32, %arg1: i32) -> (i32, i32) {
    %c0_i32 = arith.constant 0 : i32
    %c0_i32_0 = arith.constant 0 : i32
    return %arg0, %c0_i32 : i32, i32
  }
  func.func @transform_7(%arg0: i32, %arg1: i32) -> (i32, i32) {
    %c0_i32 = arith.constant 0 : i32
    %c0_i32_0 = arith.constant 0 : i32
    return %arg0, %c0_i32 : i32, i32
  }
}

</mosaic_0001>

<bundles_post_ra>
// kernel: tpu_custom_call.1
= control target key start
LH: loop header
LB: loop body
LE: loop exit
PB: predicated region body
PF: predicated region fallthrough
CT: control target
= control target key end

     0   :  { %v2351_v2 = vmov 0   ;;  %vm4563_vm0 = vcmask 7168   ;;  %s4555_s1 = inlined_call_operand.vmem [shape: f32[128,128], index: 1, kind: input, shape index: {}]   ;;  %s4556_s2 = inlined_call_operand.vmem [shape: f32[128,1], index: 2, kind: input, shape index: {}]   ;;  %s4557_s0 = inlined_call_operand.vmem [shape: f32[128,128], index: 0, kind: input, shape index: {}]   ;;  %s4558_s4 = inlined_call_operand.vmem [shape: s32[128,1], index: 4, kind: input, shape index: {}]   ;;  %s4559_s3 = inlined_call_operand.vmem [shape: f32[1,128], index: 3, kind: input, shape index: {}]   ;;  %s4560_s5 = inlined_call_operand.vmem [shape: s32[1,128], index: 5, kind: input, shape index: {}]   ;;  %s4561_s6 = inlined_call_operand.vmem [shape: f32[128,1], index: 6, kind: output, shape index: {0}]   ;;  %s4562_s7 = inlined_call_operand.vmem [shape: f32[128,1], index: 7, kind: output, shape index: {1}]  }
   0x1   :  { %v157_v0 = vld [vmem:[%s4555_s1 + $0x78] sm:$0xff]  ;;  %v156_v1 = vld [vmem:[%s4555_s1 + $0x70] sm:$0xff]  ;;  %2126 = vset.pattern.permute.xlu1 %v2351_v2  ;;  %2125 = vset.pattern.permute.xlu0 %v2351_v2  ;;  %v155_v3 = vld [vmem:[%s4555_s1 + $0x68] sm:$0xff] }
   0x2   :  { %2034 = vmatprep.subr.mxu0 %v157_v0  ;;  %2090 = vmatprep.subr.mxu1 %v157_v0  ;;  %v154_v4 = vld [vmem:[%s4555_s1 + $0x60] sm:$0xff]  ;;  %v153_v5 = vld [vmem:[%s4555_s1 + $0x58] sm:$0xff]  ;;  %v152_v6 = vld [vmem:[%s4555_s1 + $0x50] sm:$0xff] }
   0x3   :  { %2035 = vmatpush3.msra.mxu0 %v157_v0  ;;  %2106 = vmatpush3.msra.mxu1 %v157_v0  ;;  %v151_v7 = vld [vmem:[%s4555_s1 + $0x48] sm:$0xff]  ;;  %v150_v8 = vld [vmem:[%s4555_s1 + $0x40] sm:$0xff]  ;;  %v305_v9 = vld [vmem:[%s4556_s2 + $0x10] sm:$0xff] }
   0x4   :  { %2036 = vmatprep.subr.mxu0 %v156_v1  ;;  %2091 = vmatprep.subr.mxu1 %v156_v1  ;;  %v149_v10 = vld [vmem:[%s4555_s1 + $0x38] sm:$0xff]  ;;  %v148_v11 = vld [vmem:[%s4555_s1 + $0x30] sm:$0xff]  ;;  %v147_v13 = vld [vmem:[%s4555_s1 + $0x28] sm:$0xff] }
   0x5   :  { %2037 = vmatpush3.msra.mxu0 %v156_v1  ;;  %2107 = vmatpush3.msra.mxu1 %v156_v1  ;;  %v306_v12 = vld [vmem:[%s4556_s2 + $0x18] sm:$0xff]  ;;  %v146_v14 = vld [vmem:[%s4555_s1 + $0x20] sm:$0xff]  ;;  %v308_v15 = vld [vmem:[%s4556_s2 + $0x28] sm:$0xff] }
   0x6   :  { %2038 = vmatprep.subr.mxu0 %v155_v3  ;;  %2092 = vmatprep.subr.mxu1 %v155_v3  ;;  %v145_v16 = vld [vmem:[%s4555_s1 + $0x18] sm:$0xff]  ;;  %v144_v17 = vld [vmem:[%s4555_s1 + $0x10] sm:$0xff]  ;;  %v303_v19 = vld [vmem:[%s4556_s2] sm:$0xff] }
   0x7   :  { %2039 = vmatpush3.msra.mxu0 %v155_v3  ;;  %2108 = vmatpush3.msra.mxu1 %v155_v3  ;;  %v310_v18 = vld [vmem:[%s4556_s2 + $0x38] sm:$0xff]  ;;  %v143_v20 = vld [vmem:[%s4555_s1 + $0x8] sm:$0xff]  ;;  %v142_v21 = vld [vmem:[%s4555_s1] sm:$0xff] }
   0x8   :  { %2040 = vmatprep.subr.mxu0 %v154_v4  ;;  %2093 = vmatprep.subr.mxu1 %v154_v4  ;;  %v126_v22 = vld [vmem:[%s4557_s0] sm:$0xff]  ;;  %v312_v24 = vld [vmem:[%s4556_s2 + $0x48] sm:$0xff]  ;;  %v128_v28 = vld [vmem:[%s4557_s0 + $0x10] sm:$0xff] }
   0x9   :  { %2041 = vmatpush3.msra.mxu0 %v154_v4  ;;  %2109 = vmatpush3.msra.mxu1 %v154_v4  ;;  %v134_v23 = vld [vmem:[%s4557_s0 + $0x40] sm:$0xff]  ;;  %v304_v25 = vld [vmem:[%s4556_s2 + $0x8] sm:$0xff]  ;;  %v136_v29 = vld [vmem:[%s4557_s0 + $0x50] sm:$0xff] }
   0xa   :  { %2042 = vmatprep.subr.mxu0 %v153_v5  ;;  %2094 = vmatprep.subr.mxu1 %v153_v5  ;;  %v127_v26 = vld [vmem:[%s4557_s0 + $0x8] sm:$0xff]  ;;  %v314_v30 = vld [vmem:[%s4556_s2 + $0x58] sm:$0xff]  ;;  %v307_v31 = vld [vmem:[%s4556_s2 + $0x20] sm:$0xff] }
   0xb   :  { %2043 = vmatpush3.msra.mxu0 %v153_v5  ;;  %2110 = vmatpush3.msra.mxu1 %v153_v5  ;;  %v135_v27 = vld [vmem:[%s4557_s0 + $0x48] sm:$0xff]  ;;  %v129_v32 = vld [vmem:[%s4557_s0 + $0x18] sm:$0xff]  ;;  %v130_v34 = vld [vmem:[%s4557_s0 + $0x20] sm:$0xff] }
   0xc   :  { %2044 = vmatprep.subr.mxu0 %v152_v6  ;;  %2095 = vmatprep.subr.mxu1 %v152_v6  ;;  %v137_v33 = vld [vmem:[%s4557_s0 + $0x58] sm:$0xff]  ;;  %v138_v35 = vld [vmem:[%s4557_s0 + $0x60] sm:$0xff]  ;;  %v316_v36 = vld [vmem:[%s4556_s2 + $0x68] sm:$0xff] }
   0xd   :  { %2045 = vmatpush3.msra.mxu0 %v152_v6  ;;  %2111 = vmatpush3.msra.mxu1 %v152_v6  ;;  %v309_v37 = vld [vmem:[%s4556_s2 + $0x30] sm:$0xff]  ;;  %v131_v38 = vld [vmem:[%s4557_s0 + $0x28] sm:$0xff]  ;;  %v318_v42 = vld [vmem:[%s4556_s2 + $0x78] sm:$0xff] }
   0xe   :  { %2046 = vmatprep.subr.mxu0 %v151_v7  ;;  %2096 = vmatprep.subr.mxu1 %v151_v7  ;;  %v139_v39 = vld [vmem:[%s4557_s0 + $0x68] sm:$0xff]  ;;  %v132_v40 = vld [vmem:[%s4557_s0 + $0x30] sm:$0xff]  ;;  %v311_v43 = vld [vmem:[%s4556_s2 + $0x40] sm:$0xff] }
   0xf   :  { %2047 = vmatpush3.msra.mxu0 %v151_v7  ;;  %2112 = vmatpush3.msra.mxu1 %v151_v7  ;;  %v140_v41 = vld [vmem:[%s4557_s0 + $0x70] sm:$0xff]  ;;  %v133_v44 = vld [vmem:[%s4557_s0 + $0x38] sm:$0xff]  ;;  %v655_v46 = vld [vmem:[%s4558_s4 + $0x8] sm:$0xff] }
  0x10   :  { %2048 = vmatprep.subr.mxu0 %v150_v8  ;;  %2097 = vmatprep.subr.mxu1 %v150_v8  ;;  %v141_v45 = vld [vmem:[%s4557_s0 + $0x78] sm:$0xff]  ;;  %v313_v47 = vld [vmem:[%s4556_s2 + $0x50] sm:$0xff]  ;;  %v315_v49 = vld [vmem:[%s4556_s2 + $0x60] sm:$0xff] }
  0x11   :  { %2049 = vmatpush3.msra.mxu0 %v150_v8  ;;  %2113 = vmatpush3.msra.mxu1 %v150_v8  ;;  %v657_v48 = vld [vmem:[%s4558_s4 + $0x18] sm:$0xff]  ;;  %v659_v50 = vld [vmem:[%s4558_s4 + $0x28] sm:$0xff]  ;;  %v317_v51 = vld [vmem:[%s4556_s2 + $0x70] sm:$0xff] }
  0x12   :  { %332 = vperm.xlu1 %2126, %v305_v9   ;;  %2050 = vmatprep.subr.mxu0 %v149_v10  ;;  %v661_v52 = vld [vmem:[%s4558_s4 + $0x38] sm:$0xff]  ;;  %v654_v53 = vld [vmem:[%s4558_s4] sm:$0xff]  ;;  %v663_v54 = vld [vmem:[%s4558_s4 + $0x48] sm:$0xff]  ;;  %v2352_v9 = vmov 0.0  }
  0x13   :  { %2098 = vmatprep.subr.mxu1 %v149_v10  ;;  %2051 = vmatpush3.msra.mxu0 %v149_v10  ;;  %v656_v55 = vld [vmem:[%s4558_s4 + $0x10] sm:$0xff]  ;;  %v665_v56 = vld [vmem:[%s4558_s4 + $0x58] sm:$0xff]  ;;  %v658_v57 = vld [vmem:[%s4558_s4 + $0x20] sm:$0xff]  ;;  %39 = vst.msk [vmem:[#allocation2 + $0x48] sm:$0xff] %vm4563_vm0, %v2352_v9 }
  0x14   :  { %2114 = vmatpush3.msra.mxu1 %v149_v10  ;;  %2052 = vmatprep.subr.mxu0 %v148_v11  ;;  %v667_v58 = vld [vmem:[%s4558_s4 + $0x68] sm:$0xff]  ;;  %v660_v59 = vld [vmem:[%s4558_s4 + $0x30] sm:$0xff]  ;;  %v669_v60 = vld [vmem:[%s4558_s4 + $0x78] sm:$0xff]  ;;  %30 = vst.msk [vmem:[#allocation2] sm:$0xff] %vm4563_vm0, %v2352_v9 }
  0x15   :  { %2099 = vmatprep.subr.mxu1 %v148_v11  ;;  %2053 = vmatpush3.msra.mxu0 %v148_v11  ;;  %v662_v61 = vld [vmem:[%s4558_s4 + $0x40] sm:$0xff]  ;;  %v664_v62 = vld [vmem:[%s4558_s4 + $0x50] sm:$0xff]  ;;  %31 = vst.msk [vmem:[#allocation2 + $0x8] sm:$0xff] %vm4563_vm0, %v2352_v9  ;;  %32 = vst.msk [vmem:[#allocation2 + $0x10] sm:$0xff] %vm4563_vm0, %v2352_v9 }
  0x16   :  { %2115 = vmatpush3.msra.mxu1 %v148_v11  ;;  %337 = vperm.xlu1 %2126, %v306_v12   ;;  %v666_v63 = vld [vmem:[%s4558_s4 + $0x60] sm:$0xff]  ;;  %v668_v0 = vld [vmem:[%s4558_s4 + $0x70] sm:$0xff]  ;;  %33 = vst.msk [vmem:[#allocation2 + $0x18] sm:$0xff] %vm4563_vm0, %v2352_v9  ;;  %34 = vst.msk [vmem:[#allocation2 + $0x20] sm:$0xff] %vm4563_vm0, %v2352_v9 }
  0x17   :  { %2054 = vmatprep.subr.mxu0 %v147_v13  ;;  %2100 = vmatprep.subr.mxu1 %v147_v13  ;;  %35 = vst.msk [vmem:[#allocation2 + $0x28] sm:$0xff] %vm4563_vm0, %v2352_v9  ;;  %36 = vst.msk [vmem:[#allocation2 + $0x30] sm:$0xff] %vm4563_vm0, %v2352_v9 }
  0x18   :  { %2055 = vmatpush3.msra.mxu0 %v147_v13  ;;  %2116 = vmatpush3.msra.mxu1 %v147_v13  ;;  %37 = vst.msk [vmem:[#allocation2 + $0x38] sm:$0xff] %vm4563_vm0, %v2352_v9  ;;  %38 = vst.msk [vmem:[#allocation2 + $0x40] sm:$0xff] %vm4563_vm0, %v2352_v9 }
  0x19   :  { %2056 = vmatprep.subr.mxu0 %v146_v14  ;;  %2101 = vmatprep.subr.mxu1 %v146_v14  ;;  %40 = vst.msk [vmem:[#allocation2 + $0x50] sm:$0xff] %vm4563_vm0, %v2352_v9  ;;  %41 = vst.msk [vmem:[#allocation2 + $0x58] sm:$0xff] %vm4563_vm0, %v2352_v9 }
  0x1a   :  { %2057 = vmatpush3.msra.mxu0 %v146_v14  ;;  %2117 = vmatpush3.msra.mxu1 %v146_v14  ;;  %42 = vst.msk [vmem:[#allocation2 + $0x60] sm:$0xff] %vm4563_vm0, %v2352_v9  ;;  %43 = vst.msk [vmem:[#allocation2 + $0x68] sm:$0xff] %vm4563_vm0, %v2352_v9 }
  0x1b   :  { %347 = vperm.xlu1 %2126, %v308_v15   ;;  %2058 = vmatprep.subr.mxu0 %v145_v16  ;;  %44 = vst.msk [vmem:[#allocation2 + $0x70] sm:$0xff] %vm4563_vm0, %v2352_v9  ;;  %45 = vst.msk [vmem:[#allocation2 + $0x78] sm:$0xff] %vm4563_vm0, %v2352_v9 }
  0x1c   :  { %2102 = vmatprep.subr.mxu1 %v145_v16  ;;  %2059 = vmatpush3.msra.mxu0 %v145_v16  ;;  %46 = vst.msk [vmem:[#allocation3] sm:$0xff] %vm4563_vm0, %v2352_v9  ;;  %47 = vst.msk [vmem:[#allocation3 + $0x8] sm:$0xff] %vm4563_vm0, %v2352_v9 }
  0x1d   :  { %2118 = vmatpush3.msra.mxu1 %v145_v16  ;;  %2060 = vmatprep.subr.mxu0 %v144_v17  ;;  %48 = vst.msk [vmem:[#allocation3 + $0x10] sm:$0xff] %vm4563_vm0, %v2352_v9  ;;  %49 = vst.msk [vmem:[#allocation3 + $0x18] sm:$0xff] %vm4563_vm0, %v2352_v9 }
  0x1e   :  { %2103 = vmatprep.subr.mxu1 %v144_v17  ;;  %2061 = vmatpush3.msra.mxu0 %v144_v17  ;;  %50 = vst.msk [vmem:[#allocation3 + $0x20] sm:$0xff] %vm4563_vm0, %v2352_v9  ;;  %51 = vst.msk [vmem:[#allocation3 + $0x28] sm:$0xff] %vm4563_vm0, %v2352_v9 }
  0x1f   :  { %2119 = vmatpush3.msra.mxu1 %v144_v17  ;;  %357 = vperm.xlu1 %2126, %v310_v18   ;;  %52 = vst.msk [vmem:[#allocation3 + $0x30] sm:$0xff] %vm4563_vm0, %v2352_v9  ;;  %53 = vst.msk [vmem:[#allocation3 + $0x38] sm:$0xff] %vm4563_vm0, %v2352_v9  ;;  %v455_v18 = vlaneseq }
  0x20   :  { %322 = vperm.xlu0 %2125, %v303_v19   ;;  %2062 = vmatprep.subr.mxu0 %v143_v20  ;;  %54 = vst.msk [vmem:[#allocation3 + $0x40] sm:$0xff] %vm4563_vm0, %v2352_v9  ;;  %55 = vst.msk [vmem:[#allocation3 + $0x48] sm:$0xff] %vm4563_vm0, %v2352_v9 }
  0x21   :  { %2104 = vmatprep.subr.mxu1 %v143_v20  ;;  %2063 = vmatpush3.msra.mxu0 %v143_v20  ;;  %56 = vst.msk [vmem:[#allocation3 + $0x50] sm:$0xff] %vm4563_vm0, %v2352_v9  ;;  %57 = vst.msk [vmem:[#allocation3 + $0x58] sm:$0xff] %vm4563_vm0, %v2352_v9  ;;  %v2804_v19 = vshrl.u32 %v455_v18, 7 }
  0x22   :  { %2120 = vmatpush3.msra.mxu1 %v143_v20  ;;  %2064 = vmatprep.subr.mxu0 %v142_v21  ;;  %58 = vst.msk [vmem:[#allocation3 + $0x60] sm:$0xff] %vm4563_vm0, %v2352_v9  ;;  %59 = vst.msk [vmem:[#allocation3 + $0x68] sm:$0xff] %vm4563_vm0, %v2352_v9 }
  0x23   :  { %2105 = vmatprep.subr.mxu1 %v142_v21  ;;  %2065 = vmatpush3.msra.mxu0 %v142_v21  ;;  %60 = vst.msk [vmem:[#allocation3 + $0x70] sm:$0xff] %vm4563_vm0, %v2352_v9  ;;  %61 = vst.msk [vmem:[#allocation3 + $0x78] sm:$0xff] %vm4563_vm0, %v2352_v9 }
  0x24   :  { %2121 = vmatpush3.msra.mxu1 %v142_v21  ;;  %2066 = vmatprep.mubr.f32.mxu0 %v126_v22  ;;  %62 = vst.msk [vmem:[#allocation4] sm:$0xff] %vm4563_vm0, %v2352_v9  ;;  %63 = vst.msk [vmem:[#allocation4 + $0x8] sm:$0xff] %vm4563_vm0, %v2352_v9  ;;  %v457_v22 = vadd.s32 8, %v2804_v19 }
  0x25   :  { %2078 = vmatprep.mubr.f32.mxu1 %v134_v23  ;;  %367 = vperm.xlu1 %2126, %v312_v24   ;;  %64 = vst.msk [vmem:[#allocation4 + $0x10] sm:$0xff] %vm4563_vm0, %v2352_v9  ;;  %65 = vst.msk [vmem:[#allocation4 + $0x18] sm:$0xff] %vm4563_vm0, %v2352_v9  ;;  %v465_v23 = vadd.s32 72, %v2804_v19  ;;  %v464_v24 = vadd.s32 64, %v2804_v19 }
  0x26   :  { %327 = vperm.xlu0 %2125, %v304_v25   ;;  %2067 = vmatmul.mubr.f32.vlgmr.msra.gmra.mxu0 %v127_v26  ;;  %66 = vst.msk [vmem:[#allocation4 + $0x20] sm:$0xff] %vm4563_vm0, %v2352_v9  ;;  %67 = vst.msk [vmem:[#allocation4 + $0x28] sm:$0xff] %vm4563_vm0, %v2352_v9  ;;  %v2813_v25 = vand.u32 127, %v455_v18  ;;  %v459_v26 = vadd.s32 24, %v2804_v19 }
  0x27   :  { %2079 = vmatmul.mubr.f32.vlgmr.msra.gmra.mxu1 %v135_v27  ;;  %2069 = vmatprep.mubr.f32.mxu0 %v128_v28  ;;  %68 = vst.msk [vmem:[#allocation4 + $0x30] sm:$0xff] %vm4563_vm0, %v2352_v9  ;;  %69 = vst.msk [vmem:[#allocation4 + $0x38] sm:$0xff] %vm4563_vm0, %v2352_v9  ;;  %v2817_v27 = vadd.s32 16, %v2804_v19  ;;  %v2822_v28 = vld [vmem:[%s4559_s3] ss:$0 sm:$0xff] }
  0x28   :  { %2081 = vmatprep.mubr.f32.mxu1 %v136_v29  ;;  %70 = vst.msk [vmem:[#allocation4 + $0x40] sm:$0xff] %vm4563_vm0, %v2352_v9  ;;  %71 = vst.msk [vmem:[#allocation4 + $0x48] sm:$0xff] %vm4563_vm0, %v2352_v9  ;;  %vm495_vm1 = vcmp.eq.s32.totalorder %v457_v22, %v2813_v25  ;;  %vm503_vm2 = vcmp.eq.s32.totalorder %v465_v23, %v2813_v25  ;;  %vm494_vm3 = vcmp.eq.s32.totalorder %v2804_v19, %v2813_v25 }
  0x29   :  { %377 = vperm.xlu1 %2126, %v314_v30   ;;  %72 = vst.msk [vmem:[#allocation4 + $0x50] sm:$0xff] %vm4563_vm0, %v2352_v9  ;;  %73 = vst.msk [vmem:[#allocation4 + $0x58] sm:$0xff] %vm4563_vm0, %v2352_v9  ;;  %vm502_vm4 = vcmp.eq.s32.totalorder %v464_v24, %v2813_v25  ;;  %vm497_vm5 = vcmp.eq.s32.totalorder %v459_v26, %v2813_v25  ;;  %vm496_vm6 = vcmp.eq.s32.totalorder %v2817_v27, %v2813_v25 }
  0x2a   :  { %342 = vperm.xlu0 %2125, %v307_v31   ;;  %2070 = vmatmul.mubr.f32.gmra.mxu0 %v129_v32  ;;  %74 = vst.msk [vmem:[#allocation4 + $0x60] sm:$0xff] %vm4563_vm0, %v2352_v9  ;;  %75 = vst.msk [vmem:[#allocation4 + $0x68] sm:$0xff] %vm4563_vm0, %v2352_v9  ;;  %vm4567_vm10 = vcmp.lt.s32.totalorder %v2813_v25, 16 }
  0x2b   :  { %2082 = vmatmul.mubr.f32.gmra.mxu1 %v137_v33  ;;  %2072 = vmatprep.mubr.f32.mxu0 %v130_v34  ;;  %76 = vst.msk [vmem:[#allocation4 + $0x70] sm:$0xff] %vm4563_vm0, %v2352_v9  ;;  %77 = vst.msk [vmem:[#allocation4 + $0x78] sm:$0xff] %vm4563_vm0, %v2352_v9  ;;  %v2834_v34 = vadd.s32 88, %v2804_v19 }
  0x2c   :  { %2084 = vmatprep.mubr.f32.mxu1 %v138_v35  ;;  %78 = vst.msk [vmem:[#allocation5] sm:$0xff] %vm4563_vm0, %v2352_v9  ;;  %79 = vst.msk [vmem:[#allocation5 + $0x8] sm:$0xff] %vm4563_vm0, %v2352_v9 }
  0x2d   :  { %387 = vperm.xlu1 %2126, %v316_v36   ;;  %80 = vst.msk [vmem:[#allocation5 + $0x10] sm:$0xff] %vm4563_vm0, %v2352_v9  ;;  %81 = vst.msk [vmem:[#allocation5 + $0x18] sm:$0xff] %vm4563_vm0, %v2352_v9  ;;  %vm505_vm7 = vcmp.eq.s32.totalorder %v2834_v34, %v2813_v25  ;;  %v2922_v34 = vadd.s32 104, %v2804_v19 }
  0x2e   :  { %352 = vperm.xlu0 %2125, %v309_v37   ;;  %2073 = vmatmul.mubr.f32.gmra.mxu0 %v131_v38  ;;  %82 = vst.msk [vmem:[#allocation5 + $0x20] sm:$0xff] %vm4563_vm0, %v2352_v9  ;;  %83 = vst.msk [vmem:[#allocation5 + $0x28] sm:$0xff] %vm4563_vm0, %v2352_v9 }
  0x2f   :  { %2085 = vmatmul.mubr.f32.gmra.mxu1 %v139_v39  ;;  %2075 = vmatprep.mubr.f32.mxu0 %v132_v40  ;;  %84 = vst.msk [vmem:[#allocation5 + $0x30] sm:$0xff] %vm4563_vm0, %v2352_v9  ;;  %85 = vst.msk [vmem:[#allocation5 + $0x38] sm:$0xff] %vm4563_vm0, %v2352_v9 }
  0x30   :  { %2087 = vmatprep.mubr.f32.mxu1 %v140_v41  ;;  %86 = vst.msk [vmem:[#allocation5 + $0x40] sm:$0xff] %vm4563_vm0, %v2352_v9  ;;  %87 = vst.msk [vmem:[#allocation5 + $0x48] sm:$0xff] %vm4563_vm0, %v2352_v9 }
  0x31   :  { %397 = vperm.xlu1 %2126, %v318_v42   ;;  %88 = vst.msk [vmem:[#allocation5 + $0x50] sm:$0xff] %vm4563_vm0, %v2352_v9  ;;  %89 = vst.msk [vmem:[#allocation5 + $0x58] sm:$0xff] %vm4563_vm0, %v2352_v9 }
  0x32   :  { %362 = vperm.xlu0 %2125, %v311_v43   ;;  %2076 = vmatmul.mubr.f32.gmra.mxu0 %v133_v44  ;;  %90 = vst.msk [vmem:[#allocation5 + $0x60] sm:$0xff] %vm4563_vm0, %v2352_v9  ;;  %91 = vst.msk [vmem:[#allocation5 + $0x68] sm:$0xff] %vm4563_vm0, %v2352_v9  ;;  %v466_v43 = vadd.s32 80, %v2804_v19 }
  0x33   :  { %2088 = vmatmul.mubr.f32.gmra.mxu1 %v141_v45  ;;  %92 = vst.msk [vmem:[#allocation5 + $0x70] sm:$0xff] %vm4563_vm0, %v2352_v9  ;;  %93 = vst.msk [vmem:[#allocation5 + $0x78] sm:$0xff] %vm4563_vm0, %v2352_v9 }
  0x34   :  { %94 = vst.msk [vmem:[#allocation6] sm:$0xff] %vm4563_vm0, %v2352_v9  ;;  %95 = vst.msk [vmem:[#allocation6 + $0x8] sm:$0xff] %vm4563_vm0, %v2352_v9  ;;  %vm504_vm8 = vcmp.eq.s32.totalorder %v466_v43, %v2813_v25 }
  0x35   :  { %675 = vperm.xlu1 %2126, %v655_v46   ;;  %96 = vst.msk [vmem:[#allocation6 + $0x10] sm:$0xff] %vm4563_vm0, %v2352_v9  ;;  %97 = vst.msk [vmem:[#allocation6 + $0x18] sm:$0xff] %vm4563_vm0, %v2352_v9 }
  0x36   :  { %372 = vperm.xlu0 %2125, %v313_v47   ;;  %98 = vst.msk [vmem:[#allocation6 + $0x20] sm:$0xff] %vm4563_vm0, %v2352_v9  ;;  %99 = vst.msk [vmem:[#allocation6 + $0x28] sm:$0xff] %vm4563_vm0, %v2352_v9 }
  0x37   :  { %100 = vst.msk [vmem:[#allocation6 + $0x30] sm:$0xff] %vm4563_vm0, %v2352_v9  ;;  %101 = vst.msk [vmem:[#allocation6 + $0x38] sm:$0xff] %vm4563_vm0, %v2352_v9 }
  0x38   :  { %102 = vst.msk [vmem:[#allocation6 + $0x40] sm:$0xff] %vm4563_vm0, %v2352_v9  ;;  %103 = vst.msk [vmem:[#allocation6 + $0x48] sm:$0xff] %vm4563_vm0, %v2352_v9 }
  0x39   :  { %681 = vperm.xlu1 %2126, %v657_v48   ;;  %104 = vst.msk [vmem:[#allocation6 + $0x50] sm:$0xff] %vm4563_vm0, %v2352_v9  ;;  %105 = vst.msk [vmem:[#allocation6 + $0x58] sm:$0xff] %vm4563_vm0, %v2352_v9 }
  0x3a   :  { %382 = vperm.xlu0 %2125, %v315_v49   ;;  %106 = vst.msk [vmem:[#allocation6 + $0x60] sm:$0xff] %vm4563_vm0, %v2352_v9  ;;  %107 = vst.msk [vmem:[#allocation6 + $0x68] sm:$0xff] %vm4563_vm0, %v2352_v9 }
  0x3b   :  { %108 = vst.msk [vmem:[#allocation6 + $0x70] sm:$0xff] %vm4563_vm0, %v2352_v9  ;;  %109 = vst.msk [vmem:[#allocation6 + $0x78] sm:$0xff] %vm4563_vm0, %v2352_v9 }
  0x3c   :  { %110 = vst.msk [vmem:[#allocation7] sm:$0xff] %vm4563_vm0, %v2352_v9  ;;  %111 = vst.msk [vmem:[#allocation7 + $0x8] sm:$0xff] %vm4563_vm0, %v2352_v9 }
  0x3d   :  { %687 = vperm.xlu1 %2126, %v659_v50   ;;  %112 = vst.msk [vmem:[#allocation7 + $0x10] sm:$0xff] %vm4563_vm0, %v2352_v9  ;;  %113 = vst.msk [vmem:[#allocation7 + $0x18] sm:$0xff] %vm4563_vm0, %v2352_v9 }
  0x3e   :  { %392 = vperm.xlu0 %2125, %v317_v51   ;;  %114 = vst.msk [vmem:[#allocation7 + $0x20] sm:$0xff] %vm4563_vm0, %v2352_v9  ;;  %115 = vst.msk [vmem:[#allocation7 + $0x28] sm:$0xff] %vm4563_vm0, %v2352_v9 }
  0x3f   :  { %116 = vst.msk [vmem:[#allocation7 + $0x30] sm:$0xff] %vm4563_vm0, %v2352_v9  ;;  %117 = vst.msk [vmem:[#allocation7 + $0x38] sm:$0xff] %vm4563_vm0, %v2352_v9 }
  0x40   :  { %118 = vst.msk [vmem:[#allocation7 + $0x40] sm:$0xff] %vm4563_vm0, %v2352_v9  ;;  %119 = vst.msk [vmem:[#allocation7 + $0x48] sm:$0xff] %vm4563_vm0, %v2352_v9 }
  0x41   :  { %693 = vperm.xlu1 %2126, %v661_v52   ;;  %120 = vst.msk [vmem:[#allocation7 + $0x50] sm:$0xff] %vm4563_vm0, %v2352_v9  ;;  %121 = vst.msk [vmem:[#allocation7 + $0x58] sm:$0xff] %vm4563_vm0, %v2352_v9 }
  0x42   :  { %672 = vperm.xlu0 %2125, %v654_v53   ;;  %122 = vst.msk [vmem:[#allocation7 + $0x60] sm:$0xff] %vm4563_vm0, %v2352_v9  ;;  %123 = vst.msk [vmem:[#allocation7 + $0x68] sm:$0xff] %vm4563_vm0, %v2352_v9 }
  0x43   :  { %124 = vst.msk [vmem:[#allocation7 + $0x70] sm:$0xff] %vm4563_vm0, %v2352_v9  ;;  %125 = vst.msk [vmem:[#allocation7 + $0x78] sm:$0xff] %vm4563_vm0, %v2352_v9 }
  0x45   :  { %699 = vperm.xlu1 %2126, %v663_v54  }
  0x46   :  { %678 = vperm.xlu0 %2125, %v656_v55  }
  0x49   :  { %705 = vperm.xlu1 %2126, %v665_v56  }
  0x4a   :  { %684 = vperm.xlu0 %2125, %v658_v57  }
  0x4d   :  { %711 = vperm.xlu1 %2126, %v667_v58  }
  0x4e   :  { %690 = vperm.xlu0 %2125, %v660_v59  }
  0x51   :  { %717 = vperm.xlu1 %2126, %v669_v60  }
  0x52   :  { %696 = vperm.xlu0 %2125, %v662_v61  }
  0x56   :  { %702 = vperm.xlu0 %2125, %v664_v62  }
  0x5a   :  { %708 = vperm.xlu0 %2125, %v666_v63  }
  0x5e   :  { %714 = vperm.xlu0 %2125, %v668_v0  }
  0x8d   :  { %v2586_v1 = vpop.permute.xlu1 %332 }
  0x8e   :  { %v408_v44 = vadd.f32 %v2822_v28, %v2586_v1 }
  0x91   :  { %v2590_v3 = vpop.permute.xlu1 %337 }
  0x92   :  { %v409_v49 = vadd.f32 %v2822_v28, %v2590_v3 }
  0x96   :  { %v2594_v5 = vpop.permute.xlu1 %347 }
  0x9a   :  { %v2598_v7 = vpop.permute.xlu1 %357 }
  0x9b   :  { %v2588_v2 = vpop.permute.xlu0 %322 }
  0x9c   :  { %v406_v39 = vadd.f32 %v2822_v28, %v2588_v2 }
  0xa0   :  { %v368_v10 = vpop.permute.xlu1 %367 }
  0xa1   :  { %v2592_v4 = vpop.permute.xlu0 %327  ;;  %v415_v35 = vadd.f32 %v2822_v28, %v368_v10 }
  0xa2   :  { %v407_v30 = vadd.f32 %v2822_v28, %v2592_v4 }
  0xa4   :  { %v378_v12 = vpop.permute.xlu1 %377 }
  0xa5   :  { %v2596_v6 = vpop.permute.xlu0 %342  ;;  %v417_v1 = vadd.f32 %v2822_v28, %v378_v12 }
  0xa8   :  { %v2796_v14 = vpop.permute.xlu1 %387 }
  0xa9   :  { %v2600_v8 = vpop.permute.xlu0 %352 }
  0xac   :  { %v2800_v16 = vpop.permute.xlu1 %397 }
  0xad   :  { %v363_v11 = vpop.permute.xlu0 %362 }
  0xae   :  { %v414_v45 = vadd.f32 %v2822_v28, %v363_v11 }
  0xb0   :  { %v2806_v20 = vpop.permute.xlu1 %675 }
  0xb1   :  { %v2794_v13 = vpop.permute.xlu0 %372 }
  0xb2   :  { %v416_v12 = vadd.f32 %v2822_v28, %v2794_v13 }
  0xb4   :  { %v2830_v31 = vpop.permute.xlu1 %681 }
  0xb5   :  { %v2798_v15 = vpop.permute.xlu0 %382 }
  0xb6   :  { %v418_v27 = vadd.f32 %v2822_v28, %v2798_v15 }
  0xb8   :  { %v2856_v59 = vpop.permute.xlu1 %687 }
  0xb9   :  { %v2802_v17 = vpop.permute.xlu0 %392 }
  0xbd   :  { %v2808_v21 = vpop.permute.xlu0 %672 }
  0xc1   :  { %v2837_v36 = vpop.permute.xlu0 %678 }
  0xc5   :  { %v2864_v2 = vpop.permute.xlu0 %684 }
  0xe6   :  { %v2068_v29 = vpop.f32.mrf.mxu0 }
  0xe7   :  { %v423_v32 = vmul.f32 2.0, %v2068_v29  ;;  %v2080_v33 = vpop.f32.mrf.mxu1 }
  0xe8   :  { %v431_v37 = vmul.f32 2.0, %v2080_v33  ;;  %v224_v38 = vpop.f32.mrf.mxu0 }
  0xe9   :  { %v439_v40 = vsub.f32 %v407_v30, %v423_v32  ;;  %v422_v41 = vmul.f32 2.0, %v224_v38  ;;  %v264_v42 = vpop.f32.mrf.mxu1  ;;  %v2886_v30 = vadd.s32 40, %v2804_v19 }
  0xea   :  { %v447_v46 = vsub.f32 %v415_v35, %v431_v37  ;;  %v430_v47 = vmul.f32 2.0, %v264_v42  ;;  %v2071_v48 = vpop.f32.mrf.mxu0  ;;  %v460_v35 = vadd.s32 32, %v2804_v19  ;;  %v410_v37 = vadd.f32 %v2822_v28, %v2596_v6  ;;  %v2899_v42 = vpop.permute.xlu0 %690 }
  0xeb   :  { %v511_v50 = vsel %vm495_vm1, 0.0, %v439_v40  ;;  %v438_v51 = vsub.f32 %v406_v39, %v422_v41  ;;  %v425_v52 = vmul.f32 2.0, %v2071_v48  ;;  %v2083_v53 = vpop.f32.mrf.mxu1  ;;  %v468_v40 = vadd.s32 96, %v2804_v19  ;;  %v2897_v41 = vpop.permute.xlu1 %693  ;;  %v2916_v48 = vld [vmem:[%s4560_s5] ss:$0 sm:$0xff] }
  0xec   :  { %v2852_v54 = vmax.f32 %v511_v50, 1e-12  ;;  %v519_v55 = vsel %vm503_vm2, 0.0, %v447_v46  ;;  %v446_v56 = vsub.f32 %v414_v45, %v430_v47  ;;  %v433_v57 = vmul.f32 2.0, %v2083_v53  ;;  %v234_v58 = vpop.f32.mrf.mxu0 }
  0xed   :  { %v2858_v60 = vmax.f32 %v519_v55, 1e-12  ;;  %v510_v61 = vsel %vm494_vm3, 0.0, %v438_v51  ;;  %v441_v62 = vsub.f32 %v409_v49, %v425_v52  ;;  %v424_v63 = vmul.f32 2.0, %v234_v58  ;;  %v274_v0 = vpop.f32.mrf.mxu1 }
  0xee   :  { %2127 = vrsqrt.f32 %v2852_v54  ;;  %v2867_v3 = vmax.f32 %v510_v61, 1e-12  ;;  %v518_v4 = vsel %vm502_vm4, 0.0, %v446_v56  ;;  %v2074_v9 = vpop.f32.mrf.mxu0  ;;  %v432_v23 = vmul.f32 2.0, %v274_v0 }
  0xef   :  { %2129 = vrsqrt.f32 %v2858_v60  ;;  %v2872_v10 = vmax.f32 %v518_v4, 1e-12  ;;  %v513_v11 = vsel %vm497_vm5, 0.0, %v441_v62  ;;  %v440_v18 = vsub.f32 %v408_v44, %v424_v63  ;;  %v2086_v22 = vpop.f32.mrf.mxu1  ;;  %v2951_v61 = vpop.permute.xlu1 %699 }
  0xf0   :  { %v244_v24 = vpop.f32.mrf.mxu0  ;;  %v449_v29 = vsub.f32 %v417_v1, %v433_v57  ;;  %v2889_v13 = vmax.f32 %v513_v11, 1e-12  ;;  %v448_v33 = vsub.f32 %v416_v12, %v432_v23  ;;  %vm498_vm9 = vcmp.eq.s32.totalorder %v460_v35, %v2813_v25  ;;  %v2953_v62 = vpop.permute.xlu0 %696 }
  0xf1   :  { %2131 = vrsqrt.f32 %v2872_v10  ;;  %v512_v26 = vsel %vm496_vm6, 0.0, %v440_v18  ;;  %v284_v32 = vpop.f32.mrf.mxu1  ;;  %v426_v38 = vmul.f32 2.0, %v244_v24  ;;  %vm499_vm11 = vcmp.eq.s32.totalorder %v2886_v30, %v2813_v25 }
  0xf2   :  { %2133 = vrsqrt.f32 %v2867_v3  ;;  %v434_v39 = vmul.f32 2.0, %v284_v32  ;;  %v2901_v44 = vmax.f32 %v512_v26, 1e-12  ;;  %v520_v45 = vsel %vm504_vm8, 0.0, %v448_v33  ;;  %v2925_v43 = vpop.f32.mrf.mxu0 }
  0xf3   :  { %v521_v6 = vsel %vm505_vm7, 0.0, %v449_v29  ;;  %v2908_v46 = vmax.f32 %v520_v45, 1e-12  ;;  %v442_v47 = vsub.f32 %v410_v37, %v426_v38  ;;  %2135 = vrsqrt.f32 %v2889_v13 }
  0xf4   :  { %v450_v15 = vsub.f32 %v418_v27, %v434_v39  ;;  %vm506_vm12 = vcmp.eq.s32.totalorder %v468_v40, %v2813_v25  ;;  %v2927_v49 = vmax.f32 %v521_v6, 1e-12  ;;  %v2931_v50 = vadd.s32 56, %v2804_v19 }
  0xf5   :  { %2137 = vrsqrt.f32 %v2908_v46  ;;  %v2934_v51 = vadd.s32 48, %v2804_v19  ;;  %v411_v52 = vadd.f32 %v2822_v28, %v2594_v5  ;;  %v427_v53 = vmul.f32 2.0, %v2074_v9 }
  0xf6   :  { %2139 = vrsqrt.f32 %v2901_v44  ;;  %v514_v55 = vsel %vm498_vm9, 0.0, %v442_v47  ;;  %v2939_v56 = vadd.s32 112, %v2804_v19  ;;  %v2943_v57 = vadd.f32 %v2822_v28, %v2796_v14  ;;  %v254_v14 = vpop.f32.mrf.mxu0 }
  0xf7   :  { %v2947_v58 = vadd.f32 %v2822_v28, %v2600_v8  ;;  %vm724_vm13 = vcmp.eq.s32.totalorder %v2806_v20, %v2916_v48  ;;  %v522_v5 = vsel %vm506_vm12, 0.0, %v450_v15  ;;  %v2957_v0 = vadd.f32 %v2822_v28, %v2802_v17  ;;  %v2965_v8 = vpop.f32.mrf.mxu1 }
  0xf8   :  { %vm4564_vm14 = vcmp.eq.s32.totalorder %v2808_v21, %v2916_v48  ;;  %vm732_vm15 = vcmp.eq.s32.totalorder %v2951_v61, %v2916_v48  ;;  %vm731_vm1 = vcmp.eq.s32.totalorder %v2953_v62, %v2916_v48  ;;  %2141 = vrsqrt.f32 %v2927_v49  ;;  %vm3017_vm12 = vmand %vm724_vm13, %vm4567_vm10 }
  0xf9   :  { %v2968_v4 = vmul.f32 2.0, %v2086_v22  ;;  %v2970_v9 = vmax.f32 %v514_v55, 1e-12  ;;  %v443_v11 = vsub.f32 %v411_v52, %v427_v53  ;;  %v2973_v18 = vmax.f32 %v522_v5, 1e-12  ;;  %v294_v32 = vpop.f32.mrf.mxu1  ;;  %vm2996_vm7 = vmand %vm732_vm15, %vm4567_vm10 }
  0xfa   :  { %vm500_vm2 = vcmp.eq.s32.totalorder %v2934_v51, %v2813_v25  ;;  %vm551_vm3 = vcmp.eq.f32.partialorder %v2852_v54, inf  ;;  %v428_v24 = vmul.f32 2.0, %v254_v14  ;;  %vm607_vm4 = vcmp.eq.f32.partialorder %v2858_v60, inf }
  0xfb   :  { %v2128_v63 = vpop.eup %2127  ;;  %v610_v22 = vand.u32 2147483648, %v2858_v60  ;;  %vm609_vm5 = vcmp.eq.f32.partialorder %v2858_v60, 0.0  ;;  %v554_v35 = vand.u32 2147483648, %v2852_v54  ;;  %vm507_vm6 = vcmp.eq.s32.totalorder %v2922_v34, %v2813_v25 }
  0xfc   :  { %v2130_v1 = vpop.eup %2129  ;;  %v550_v17 = vmul.f32 %v2128_v63, %v2852_v54  ;;  %2143 = vrsqrt.f32 %v2970_v9  ;;  %vm553_vm8 = vcmp.eq.f32.partialorder %v2852_v54, 0.0  ;;  %vm600_vm9 = vcmp.eq.f32.partialorder %v2872_v10, inf  ;;  %v3047_v63 = vpop.permute.xlu0 %702 }
  0xfd   :  { %v606_v12 = vmul.f32 %v2130_v1, %v2858_v60  ;;  %v3022_v30 = vmul.f32 2.0, %v294_v32  ;;  %v603_v47 = vand.u32 2147483648, %v2872_v10  ;;  %2145 = vrsqrt.f32 %v2973_v18 }
  0xfe   :  { %v2132_v23 = vpop.eup %2131  ;;  %v552_v29 = vsel %vm551_vm3, %v2852_v54, %v550_v17  ;;  %vm602_vm3 = vcmp.eq.f32.partialorder %v2872_v10, 0.0  ;;  %v547_v53 = vand.u32 2147483648, %v2867_v3  ;;  %v444_v14 = vsub.f32 %v2947_v58, %v428_v24 }
  0xff   :  { %v2134_v26 = vpop.eup %2133  ;;  %v608_v33 = vsel %vm607_vm4, %v2858_v60, %v606_v12  ;;  %v599_v37 = vmul.f32 %v2132_v23, %v2872_v10  ;;  %v515_v60 = vsel %vm499_vm11, 0.0, %v443_v11  ;;  %v3010_v27 = vsel %vm553_vm8, %v554_v35, %v552_v29 }
 0x100   :  { %v2989_v38 = vsel %vm609_vm5, %v610_v22, %v608_v33  ;;  %vm508_vm11 = vcmp.eq.s32.totalorder %v2939_v56, %v2813_v25  ;;  %v3030_v6 = vsel %vm3017_vm12, %v3010_v27, 0.0  ;;  %v543_v15 = vmul.f32 %v2134_v26, %v2867_v3  ;;  %v2136_v52 = vpop.eup %2135 }
 0x101   :  { %v3008_v40 = vsel %vm2996_vm7, %v2989_v38, 0.0  ;;  %v601_v45 = vsel %vm600_vm9, %v2872_v10, %v599_v37  ;;  %822 = vmax.xlane.f32.xlu1 %v3030_v6  ;;  %vm544_vm4 = vcmp.eq.f32.partialorder %v2867_v3, inf  ;;  %vm4570_vm5 = vmmov 1  }
 0x102   :  { %838 = vmax.xlane.f32.xlu0 %v3008_v40  ;;  %vm3043_vm8 = vmxor %vm724_vm13, %vm4570_vm5  ;;  %v2138_v5 = vpop.eup %2137  ;;  %v3050_v1 = vsel %vm602_vm3, %v603_v47, %v601_v45  ;;  %v545_v10 = vsel %vm544_vm4, %v2867_v3, %v543_v15  ;;  %vm546_vm9 = vcmp.eq.f32.partialorder %v2867_v3, 0.0  ;;  %vm4565_vm3 = vcmp.eq.s32.totalorder %v3047_v63, %v2916_v48 }
 0x103   :  { %vm3059_vm13 = vmand %vm4564_vm14, %vm4567_vm10  ;;  %v2140_v17 = vpop.eup %2139  ;;  %v3076_v58 = vsel %vm546_vm9, %v547_v53, %v545_v10  ;;  %v1286_v11 = vsub.f32 0.0, %v3010_v27  ;;  %v1293_v22 = vsub.f32 0.0, %v3050_v1  ;;  %v613_v29 = vmul.f32 %v2138_v5, %v2908_v46 }
 0x104   :  { %vm3072_vm4 = vmand %vm731_vm1, %vm4567_vm10  ;;  %v3087_v23 = vsel %vm3059_vm13, %v3076_v58, 0.0  ;;  %v3099_v26 = vmax.f32 %v515_v60, 1e-12  ;;  %v451_v32 = vsub.f32 %v2943_v57, %v2968_v4  ;;  %v452_v33 = vsub.f32 %v2957_v0, %v3022_v30 }
 0x105   :  { %v3082_v12 = vsel %vm3072_vm4, %v3050_v1, 0.0  ;;  %vm3093_vm14 = vmxor %vm731_vm1, %vm4570_vm5  ;;  %vm614_vm9 = vcmp.eq.f32.partialorder %v2908_v46, inf  ;;  %v516_v57 = vsel %vm500_vm2, 0.0, %v444_v14  ;;  %v564_v35 = vmul.f32 %v2136_v52, %v2889_v13  ;;  %v2142_v60 = vpop.eup %2141 }
 0x106   :  { %836 = vmax.xlane.f32.xlu1 %v3082_v12  ;;  %820 = vmax.xlane.f32.xlu0 %v3087_v23  ;;  %vm3111_vm1 = vmand %vm3043_vm8, %vm4567_vm10  ;;  %v615_v0 = vsel %vm614_vm9, %v2908_v46, %v613_v29  ;;  %v557_v37 = vmul.f32 %v2140_v17, %v2901_v44  ;;  %v4706_v51 = vmov 0  ;;  %v617_v45 = vand.u32 2147483648, %v2908_v46 }
 0x107   :  { %vm3124_vm0 = vmxor %vm732_vm15, %vm4570_vm5  ;;  %v3140_v61 = vsel %vm3111_vm1, %v1286_v11, 0.0  ;;  %vm616_vm15 = vcmp.eq.f32.partialorder %v2908_v46, 0.0  ;;  %vm558_vm8 = vcmp.eq.f32.partialorder %v2901_v44, inf  ;;  %v1294_v47 = vsub.f32 0.0, %v2989_v38 }
 0x108   :  { %vm3134_vm2 = vmand %vm3093_vm14, %vm4567_vm10  ;;  %v559_v15 = vsel %vm558_vm8, %v2901_v44, %v557_v37  ;;  %v561_v52 = vand.u32 2147483648, %v2901_v44  ;;  %v523_v53 = vsel %vm507_vm6, 0.0, %v451_v32  ;;  %v3157_v46 = vsel %vm616_vm15, %v617_v45, %v615_v0  ;;  %v3220_v0 = vpop.permute.xlu1 %705 }
 0x109   :  { %v4707_v51 = vsel %vm3134_vm2, 4294967295, %v4706_v51  ;;  %v3147_v30 = vsel %vm3134_vm2, %v1293_v22, 0.0  ;;  %4708 = vst [vmem:[#allocation8_spill] sm:$0xff] %v3157_v46  ;;  %vm565_vm14 = vcmp.eq.f32.partialorder %v2889_v13, inf  ;;  %vm560_vm9 = vcmp.eq.f32.partialorder %v2901_v44, 0.0  ;;  %vm3167_vm8 = vmand %vm3124_vm0, %vm4567_vm10  ;;  %v2144_v17 = vpop.eup %2143 }
 0x10a   :  { %1349 = vmax.xlane.f32.xlu1 %v3147_v30  ;;  %1335 = vmax.xlane.f32.xlu0 %v3140_v61  ;;  %v3161_v55 = vmax.f32 %v516_v57, 1e-12  ;;  %v4709_v5 = vmov 0  ;;  %v566_v34 = vsel %vm565_vm14, %v2889_v13, %v564_v35  ;;  %v3172_v14 = vsel %vm560_vm9, %v561_v52, %v559_v15  ;;  %vm3188_vm0 = vmand %vm4565_vm3, %vm4567_vm10 }
 0x10b   :  { %v4710_v5 = vsel %vm3167_vm8, 4294967295, %v4709_v5  ;;  %4711 = vst [vmem:[#allocation9_spill] sm:$0xff] %v3172_v14  ;;  %v620_v10 = vmul.f32 %v2142_v60, %v2927_v49  ;;  %vm4566_vm6 = vcmp.eq.s32.totalorder %v2830_v31, %v2916_v48  ;;  %v3178_v44 = vadd.s32 120, %v2804_v19 }
 0x10c   :  { %v524_v11 = vsel %vm508_vm11, 0.0, %v452_v33  ;;  %v4712_v24 = vmov 0  ;;  %v568_v22 = vand.u32 2147483648, %v2889_v13  ;;  %v3196_v19 = vsel %vm3188_vm0, %v3157_v46, 0.0 }
 0x10d   :  { %v4713_v24 = vsel %vm3188_vm0, 4294967295, %v4712_v24  ;;  %v3200_v56 = vsel %vm3167_vm8, %v1294_v47, 0.0  ;;  %vm567_vm11 = vcmp.eq.f32.partialorder %v2889_v13, 0.0  ;;  %vm4714_vm15 = vcmp.eq.s32.totalorder %v2837_v36, %v2916_v48  ;;  %v2146_v13 = vpop.eup %2145 }
 0x10e   :  { %vm3207_vm14 = vmxor %vm4714_vm15, %vm4570_vm5  ;;  %v1287_v32 = vsub.f32 0.0, %v3172_v14  ;;  %2147 = vrsqrt.f32 %v3099_v26  ;;  %v3213_v33 = vmax.f32 %v523_v53, 1e-12  ;;  %840 = vmax.xlane.f32.xlu1 %v3196_v19  ;;  %1351 = vmax.xlane.f32.xlu0 %v3200_v56  ;;  %v3217_v57 = vsel %vm567_vm11, %v568_v22, %v566_v34 }
 0x10f   :  { %4717 = vst [vmem:[#allocation10_spill] sm:$0xff] %v3217_v57  ;;  %vm621_vm9 = vcmp.eq.f32.partialorder %v2927_v49, inf  ;;  %2149 = vrsqrt.f32 %v3161_v55  ;;  %v3223_v4 = vmax.f32 %v524_v11, 1e-12  ;;  %vm3230_vm15 = vmand %vm4566_vm6, %vm4567_vm10  ;;  %v4718_v35 = vmov 0 }
 0x110   :  { %v4719_v35 = vsel %vm3230_vm15, 4294967295, %v4718_v35  ;;  %v622_v37 = vsel %vm621_vm9, %v2927_v49, %v620_v10  ;;  %v571_v60 = vmul.f32 %v2144_v17, %v2970_v9  ;;  %v429_v45 = vmul.f32 2.0, %v2925_v43  ;;  %vm3245_vm6 = vmand %vm3207_vm14, %vm4567_vm10 }
 0x111   :  { %v4720_v47 = vmov 0  ;;  %v624_v15 = vand.u32 2147483648, %v2927_v49  ;;  %v3253_v52 = vsel %vm3230_vm15, %v3217_v57, 0.0  ;;  %v3257_v43 = vsel %vm3245_vm6, %v1287_v32, 0.0 }
 0x112   :  { %v4721_v47 = vsel %vm3245_vm6, 4294967295, %v4720_v47  ;;  %vm623_vm9 = vcmp.eq.f32.partialorder %v2927_v49, 0.0  ;;  %vm4723_vm14 = vcmp.eq.s32.totalorder %v3047_v63, %v2916_v48  ;;  %v1295_v34 = vsub.f32 0.0, %v3157_v46  ;;  %826 = vmax.xlane.f32.xlu0 %v3253_v52  ;;  %1337 = vmax.xlane.f32.xlu1 %v3257_v43 }
 0x113   :  { %4722 = vst [vmem:[#allocation11_spill] sm:$0xff] %v4721_v47  ;;  %vm3264_vm3 = vmxor %vm4723_vm14, %vm4570_vm5  ;;  %v413_v10 = vadd.f32 %v2822_v28, %v2598_v7  ;;  %2151 = vrsqrt.f32 %v3213_v33  ;;  %v3274_v49 = vsel %vm623_vm9, %v624_v15, %v622_v37  ;;  %vm4727_vm14 = vcmp.eq.s32.totalorder %v2808_v21, %v2916_v48 }
 0x114   :  { %4726 = vst [vmem:[#allocation12_spill] sm:$0xff] %v3274_v49  ;;  %vm3280_vm11 = vmxor %vm4727_vm14, %vm4570_vm5  ;;  %vm572_vm10 = vcmp.eq.f32.partialorder %v2970_v9, inf  ;;  %v437_v7 = vmul.f32 2.0, %v2965_v8  ;;  %2153 = vrsqrt.f32 %v3223_v4  ;;  %vm4730_vm6 = vcmp.lt.s32.totalorder %v2813_v25, 16 }
 0x115   :  { %vm4731_vm9 = vcmp.eq.s32.totalorder %v3220_v0, %v2916_v48  ;;  %v4732_v17 = vmov 0  ;;  %v573_v21 = vsel %vm572_vm10, %v2970_v9, %v571_v60  ;;  %v627_v11 = vmul.f32 %v2146_v13, %v2973_v18  ;;  %vm4734_vm5 = vmmov %vm4730_vm6 }
 0x116   :  { %vm3292_vm0 = vmand %vm4731_vm9, %vm4730_vm6  ;;  %v421_v22 = vadd.f32 %v2822_v28, %v2800_v16  ;;  %v445_v8 = vsub.f32 %v413_v10, %v429_v45  ;;  %v4735_v29 = vmov 0  ;;  %v575_v32 = vand.u32 2147483648, %v2970_v9 }
 0x117   :  { %v4733_v17 = vsel %vm3292_vm0, 4294967295, %v4732_v17  ;;  %vm3306_vm15 = vmand %vm3264_vm3, %vm4734_vm5  ;;  %v3314_v13 = vsel %vm3292_vm0, %v3274_v49, 0.0  ;;  %v1285_v28 = vsub.f32 0.0, %v3076_v58  ;;  %vm574_vm10 = vcmp.eq.f32.partialorder %v2970_v9, 0.0  ;;  %v709_v9 = vpop.permute.xlu0 %708 }
 0x118   :  { %v4736_v29 = vsel %vm3306_vm15, 4294967295, %v4735_v29  ;;  %v3318_v16 = vsel %vm3306_vm15, %v1295_v34, 0.0  ;;  %842 = vmax.xlane.f32.xlu0 %v3314_v13  ;;  %v3324_v37 = vsel %vm574_vm10, %v575_v32, %v573_v21  ;;  %vm628_vm5 = vcmp.eq.f32.partialorder %v2973_v18, inf  ;;  %vm4738_vm3 = vmmov %vm4730_vm6 }
 0x119   :  { %1353 = vmax.xlane.f32.xlu1 %v3318_v16  ;;  %4737 = vst [vmem:[#allocation13_spill] sm:$0xff] %v3324_v37  ;;  %v453_v60 = vsub.f32 %v421_v22, %v437_v7  ;;  %vm3331_vm6 = vmand %vm3280_vm11, %vm4738_vm3  ;;  %v4739_v45 = vmov 0  ;;  %v629_v15 = vsel %vm628_vm5, %v2973_v18, %v627_v11  ;;  %vm4741_vm9 = vcmp.eq.s32.totalorder %v2931_v50, %v2813_v25 }
 0x11a   :  { %v4740_v45 = vsel %vm3331_vm6, 4294967295, %v4739_v45  ;;  %v517_v53 = vsel %vm4741_vm9, 0.0, %v445_v8  ;;  %vm509_vm10 = vcmp.eq.s32.totalorder %v3178_v44, %v2813_v25  ;;  %vm4742_vm14 = vmmov %vm4738_vm3  ;;  %vm4743_vm15 = vcmp.eq.s32.totalorder %v2864_v2, %v2916_v48 }
 0x11b   :  { %vm3346_vm0 = vmand %vm4743_vm15, %vm4742_vm14  ;;  %v4744_v34 = vmov 0  ;;  %v631_v10 = vand.u32 2147483648, %v2973_v18  ;;  %v3354_v50 = vsel %vm3331_vm6, %v1285_v28, 0.0  ;;  %vm630_vm5 = vcmp.eq.f32.partialorder %v2973_v18, 0.0 }
 0x11c   :  { %v4745_v34 = vsel %vm3346_vm0, 4294967295, %v4744_v34  ;;  %v3359_v44 = vsel %vm3346_vm0, %v3324_v37, 0.0  ;;  %vm4746_vm3 = vmmov 1   ;;  %vm4747_vm15 = vcmp.eq.s32.totalorder %v2830_v31, %v2916_v48  ;;  %1333 = vmax.xlane.f32.xlu0 %v3354_v50  ;;  %v2148_v31 = vpop.eup %2147 }
 0x11d   :  { %vm3366_vm14 = vmxor %vm4747_vm15, %vm4746_vm3  ;;  %828 = vmax.xlane.f32.xlu1 %v3359_v44  ;;  %vm4750_vm9 = vcmp.lt.s32.totalorder %v2813_v25, 16  ;;  %vm4751_vm11 = vcmp.eq.s32.totalorder %v2837_v36, %v2916_v48  ;;  %v4752_v7 = vmov 0  ;;  %v3381_v18 = vsel %vm630_vm5, %v631_v10, %v629_v15  ;;  %v2150_v22 = vpop.eup %2149 }
 0x11e   :  { %vm3377_vm0 = vmand %vm4751_vm11, %vm4750_vm9  ;;  %4754 = vst [vmem:[#allocation14_spill] sm:$0xff] %v3381_v18  ;;  %v3383_v21 = vmax.f32 %v517_v53, 1e-12  ;;  %v525_v11 = vsel %vm509_vm10, 0.0, %v453_v60  ;;  %vm4755_vm15 = vcmp.eq.s32.totalorder %v2864_v2, %v2916_v48  ;;  %vm4757_vm8 = vcmp.eq.s32.totalorder %v709_v9, %v2916_v48 }
 0x11f   :  { %v4753_v7 = vsel %vm3377_vm0, 4294967295, %v4752_v7  ;;  %vm760_vm6 = vmxor %vm4755_vm15, %vm4746_vm3  ;;  %v4758_v36 = vmov 0  ;;  %v3400_v8 = vsel %vm3377_vm0, %v3172_v14, 0.0  ;;  %v1288_v2 = vsub.f32 0.0, %v3217_v57 }
 0x120   :  { %vm4756_vm2 = vmmov %vm4750_vm9  ;;  %v1289_v28 = vsub.f32 0.0, %v3324_v37  ;;  %v3409_v60 = vmax.f32 %v525_v11, 1e-12  ;;  %824 = vmax.xlane.f32.xlu0 %v3400_v8  ;;  %v4761_v15 = vmov 0  ;;  %v2152_v53 = vpop.eup %2151  ;;  %2155 = vrsqrt.f32 %v3383_v21 }
 0x121   :  { %vm3393_vm11 = vmand %vm4757_vm8, %vm4756_vm2  ;;  %v4764_v10 = vmov 0  ;;  %v578_v11 = vmul.f32 %v2148_v31, %v3099_v26  ;;  %v585_v37 = vmul.f32 %v2150_v22, %v3161_v55  ;;  %v2154_v46 = vpop.eup %2153  ;;  %v1296_v14 = vsub.f32 0.0, %v3274_v49  ;;  %v712_v49 = vpop.permute.xlu1 %711 }
 0x122   :  { %v4759_v36 = vsel %vm3393_vm11, 4294967295, %v4758_v36  ;;  %v3405_v32 = vsel %vm3393_vm11, %v3381_v18, 0.0  ;;  %vm3417_vm8 = vmand %vm3366_vm14, %vm4756_vm2  ;;  %vm4767_vm14 = vcmp.eq.s32.totalorder %v3220_v0, %v2916_v48  ;;  %v1297_v31 = vsub.f32 0.0, %v3381_v18 }
 0x123   :  { %4760 = vst [vmem:[#allocation15_spill] sm:$0xff] %v4759_v36  ;;  %844 = vmax.xlane.f32.xlu1 %v3405_v32  ;;  %v4762_v15 = vsel %vm3417_vm8, 4294967295, %v4761_v15  ;;  %vm4763_vm10 = vmmov %vm4756_vm2  ;;  %v3436_v63 = vsel %vm3417_vm8, %v1288_v2, 0.0  ;;  %2157 = vrsqrt.f32 %v3409_v60  ;;  %vm579_vm2 = vcmp.eq.f32.partialorder %v3099_v26, inf }
 0x124   :  { %vm3424_vm5 = vmand %vm760_vm6, %vm4763_vm10  ;;  %vm4768_vm6 = vcmp.eq.s32.totalorder %v709_v9, %v2916_v48  ;;  %1339 = vmax.xlane.f32.xlu0 %v3436_v63  ;;  %vm586_vm10 = vcmp.eq.f32.partialorder %v3161_v55, inf  ;;  %v4770_v0 = vmov 0  ;;  %v580_v9 = vsel %vm579_vm2, %v3099_v26, %v578_v11 }
 0x125   :  { %v4765_v10 = vsel %vm3424_vm5, 4294967295, %v4764_v10  ;;  %vm767_vm9 = vmxor %vm4767_vm14, %vm4746_vm3  ;;  %v3440_v57 = vsel %vm3424_vm5, %v1289_v28, 0.0  ;;  %vm4769_vm14 = vcmp.lt.s32.totalorder %v2813_v25, 16  ;;  %v587_v22 = vsel %vm586_vm10, %v3161_v55, %v585_v37 }
 0x126   :  { %4766 = vst [vmem:[#allocation16_spill] sm:$0xff] %v4765_v10  ;;  %vm768_vm15 = vmxor %vm4768_vm6, %vm4746_vm3  ;;  %v634_v2 = vmul.f32 %v2152_v53, %v3213_v33  ;;  %v641_v28 = vmul.f32 %v2154_v46, %v3223_v4  ;;  %vm728_vm6 = vcmp.eq.s32.totalorder %v2856_v59, %v2916_v48  ;;  %v4773_v18 = vmov 0  ;;  %v715_v10 = vpop.permute.xlu0 %714 }
 0x127   :  { %1341 = vmax.xlane.f32.xlu1 %v3440_v57  ;;  %vm3454_vm5 = vmand %vm767_vm9, %vm4769_vm14  ;;  %v582_v11 = vand.u32 2147483648, %v3099_v26  ;;  %v589_v37 = vand.u32 2147483648, %v3161_v55  ;;  %vm581_vm2 = vcmp.eq.f32.partialorder %v3099_v26, 0.0  ;;  %vm642_vm10 = vcmp.eq.f32.partialorder %v3223_v4, inf }
 0x128   :  { %v4771_v0 = vsel %vm3454_vm5, 4294967295, %v4770_v0  ;;  %vm4772_vm8 = vmmov %vm4769_vm14  ;;  %v3476_v46 = vsel %vm3454_vm5, %v1296_v14, 0.0  ;;  %v4779_v26 = vmov 0  ;;  %v643_v14 = vsel %vm642_vm10, %v3223_v4, %v641_v28 }
 0x129   :  { %vm3468_vm9 = vmand %vm768_vm15, %vm4772_vm8  ;;  %vm588_vm8 = vcmp.eq.f32.partialorder %v3161_v55, 0.0  ;;  %1355 = vmax.xlane.f32.xlu0 %v3476_v46  ;;  %v3486_v47 = vsel %vm581_vm2, %v582_v11, %v580_v9  ;;  %vm635_vm15 = vcmp.eq.f32.partialorder %v3213_v33, inf  ;;  %v638_v9 = vand.u32 2147483648, %v3213_v33 }
 0x12a   :  { %v4774_v18 = vsel %vm3468_vm9, 4294967295, %v4773_v18  ;;  %v3480_v53 = vsel %vm3468_vm9, %v1297_v31, 0.0  ;;  %4776 = vst [vmem:[#allocation18_spill] sm:$0xff] %v3486_v47  ;;  %v3488_v36 = vsel %vm588_vm8, %v589_v37, %v587_v22  ;;  %vm4778_vm11 = vmmov %vm4769_vm14  ;;  %v636_v55 = vsel %vm635_vm15, %v3213_v33, %v634_v2 }
 0x12b   :  { %4775 = vst [vmem:[#allocation17_spill] sm:$0xff] %v4774_v18  ;;  %1357 = vmax.xlane.f32.xlu1 %v3480_v53  ;;  %4777 = vst [vmem:[#allocation19_spill] sm:$0xff] %v3488_v36  ;;  %vm4782_vm14 = vcmp.eq.s32.totalorder %v2899_v42, %v2916_v48  ;;  %v4783_v31 = vmov 0  ;;  %v645_v22 = vand.u32 2147483648, %v3223_v4  ;;  %vm644_vm15 = vcmp.eq.f32.partialorder %v3223_v4, 0.0 }
 0x12c   :  { %vm3498_vm9 = vmand %vm728_vm6, %vm4778_vm11 }
 0x12d   :  { %v4780_v26 = vsel %vm3498_vm9, 4294967295, %v4779_v26  ;;  %vm4781_vm8 = vmmov %vm4778_vm11  ;;  %v3519_v2 = vsel %vm3498_vm9, %v3486_v47, 0.0  ;;  %vm637_vm11 = vcmp.eq.f32.partialorder %v3213_v33, 0.0  ;;  %v3548_v4 = vsel %vm644_vm15, %v645_v22, %v643_v14  ;;  %v2156_v59 = vpop.eup %2155  ;;  %v4950_v33 = vld [vmem:[#allocation10_spill] sm:$0xff] }
 0x12e   :  { %vm3510_vm5 = vmand %vm4782_vm14, %vm4781_vm8  ;;  %830 = vmax.xlane.f32.xlu0 %v3519_v2  ;;  %v3538_v37 = vsel %vm637_vm11, %v638_v9, %v636_v55  ;;  %4793 = vst [vmem:[#allocation22_spill] sm:$0xff] %v3548_v4  ;;  %vm4796_vm11 = vcmp.eq.s32.totalorder %v715_v10, %v2916_v48  ;;  %v4797_v55 = vmov 0  ;;  %v1291_v22 = vsub.f32 0.0, %v3488_v36 }
 0x12f   :  { %v4784_v31 = vsel %vm3510_vm5, 4294967295, %v4783_v31  ;;  %v3524_v28 = vsel %vm3510_vm5, %v3488_v36, 0.0  ;;  %vm3532_vm10 = vmxor %vm728_vm6, %vm4746_vm3  ;;  %4788 = vst [vmem:[#allocation21_spill] sm:$0xff] %v3538_v37  ;;  %vm4794_vm6 = vcmp.eq.s32.totalorder %v2899_v42, %v2916_v48  ;;  %v1290_v42 = vsub.f32 0.0, %v3486_v47 }
 0x130   :  { %4785 = vst [vmem:[#allocation20_spill] sm:$0xff] %v4784_v31  ;;  %832 = vmax.xlane.f32.xlu1 %v3524_v28  ;;  %vm4789_vm14 = vmmov %vm4781_vm8  ;;  %vm4790_vm8 = vcmp.eq.s32.totalorder %v712_v49, %v2916_v48  ;;  %v4801_v31 = vmov 0  ;;  %v2158_v18 = vpop.eup %2157  ;;  %v592_v36 = vmul.f32 %v2156_v59, %v3383_v21  ;;  %v1299_v59 = vsub.f32 0.0, %v3548_v4 }
 0x131   :  { %vm3544_vm2 = vmand %vm4790_vm8, %vm4789_vm14 }
 0x132   :  { %vm762_vm5 = vmxor %vm4794_vm6, %vm4746_vm3  ;;  %v3565_v9 = vsel %vm3544_vm2, %v3538_v37, 0.0  ;;  %vm4808_vm6 = vcmp.eq.s32.totalorder %v712_v49, %v2916_v48  ;;  %v4811_v49 = vmov 0 }
 0x133   :  { %vm4795_vm9 = vmmov %vm4789_vm14  ;;  %846 = vmax.xlane.f32.xlu0 %v3565_v9 }
 0x134   :  { %vm3558_vm0 = vmand %vm4796_vm11, %vm4795_vm9 }
 0x135   :  { %v4798_v55 = vsel %vm3558_vm0, 4294967295, %v4797_v55  ;;  %v3570_v14 = vsel %vm3558_vm0, %v3548_v4, 0.0  ;;  %vm3580_vm15 = vmand %vm3532_vm10, %vm4795_vm9  ;;  %v596_v4 = vand.u32 2147483648, %v3383_v21  ;;  %vm730_vm0 = vcmp.eq.s32.totalorder %v2897_v41, %v2916_v48 }
 0x136   :  { %4799 = vst [vmem:[#allocation23_spill] sm:$0xff] %v4798_v55  ;;  %4800 = vst [vmem:[#allocation24_spill] sm:$0xff] %v3570_v14  ;;  %848 = vmax.xlane.f32.xlu1 %v3570_v14  ;;  %v4802_v31 = vsel %vm3580_vm15, 4294967295, %v4801_v31  ;;  %v4805_v55 = vmov 0  ;;  %v3596_v11 = vsel %vm3580_vm15, %v1290_v42, 0.0  ;;  %v1298_v14 = vsub.f32 0.0, %v3538_v37 }
 0x137   :  { %4803 = vst [vmem:[#allocation25_spill] sm:$0xff] %v4802_v31  ;;  %vm4804_vm14 = vmmov %vm4795_vm9  ;;  %1343 = vmax.xlane.f32.xlu0 %v3596_v11  ;;  %vm593_vm9 = vcmp.eq.f32.partialorder %v3383_v21, inf  ;;  %v4836_v41 = vmov 0 }
 0x138   :  { %vm3586_vm8 = vmand %vm762_vm5, %vm4804_vm14  ;;  %vm4810_vm5 = vcmp.eq.s32.totalorder %v715_v10, %v2916_v48  ;;  %v594_v42 = vsel %vm593_vm9, %v3383_v21, %v592_v36  ;;  %v4815_v10 = vmov 0 }
 0x139   :  { %v4806_v55 = vsel %vm3586_vm8, 4294967295, %v4805_v55  ;;  %vm769_vm11 = vmxor %vm4808_vm6, %vm4746_vm3  ;;  %v3600_v47 = vsel %vm3586_vm8, %v1291_v22, 0.0  ;;  %v648_v22 = vmul.f32 %v2158_v18, %v3409_v60  ;;  %v718_v18 = vpop.permute.xlu1 %717 }
 0x13a   :  { %4807 = vst [vmem:[#allocation26_spill] sm:$0xff] %v4806_v55  ;;  %4809 = vst [vmem:[#allocation27_spill] sm:$0xff] %v3600_v47  ;;  %1345 = vmax.xlane.f32.xlu1 %v3600_v47 }
 0x13b   :  { %vm770_vm10 = vmxor %vm4810_vm5, %vm4746_vm3 }
 0x13c   :  { %vm3612_vm6 = vmand %vm769_vm11, %vm4804_vm14  ;;  %vm595_vm11 = vcmp.eq.f32.partialorder %v3383_v21, 0.0  ;;  %v652_v21 = vand.u32 2147483648, %v3409_v60 }
 0x13d   :  { %v4812_v49 = vsel %vm3612_vm6, 4294967295, %v4811_v49  ;;  %vm4814_vm5 = vmmov %vm4804_vm14  ;;  %v3629_v55 = vsel %vm3612_vm6, %v1298_v14, 0.0  ;;  %v3638_v37 = vsel %vm595_vm11, %v596_v4, %v594_v42  ;;  %v4821_v14 = vmov 0 }
 0x13e   :  { %4813 = vst [vmem:[#allocation28_spill] sm:$0xff] %v4812_v49  ;;  %vm3620_vm8 = vmand %vm770_vm10, %vm4814_vm5  ;;  %1359 = vmax.xlane.f32.xlu0 %v3629_v55  ;;  %vm649_vm10 = vcmp.eq.f32.partialorder %v3409_v60, inf  ;;  %vm651_vm11 = vcmp.eq.f32.partialorder %v3409_v60, 0.0  ;;  %v4826_v42 = vmov 0  ;;  %v3755_v49 = vld [vmem:[#allocation5 + $0x48] sm:$0xff] }
 0x13f   :  { %v4816_v10 = vsel %vm3620_vm8, 4294967295, %v4815_v10  ;;  %v3633_v36 = vsel %vm3620_vm8, %v1299_v59, 0.0  ;;  %4819 = vst [vmem:[#allocation31_spill] sm:$0xff] %v3638_v37  ;;  %v650_v31 = vsel %vm649_vm10, %v3409_v60, %v648_v22  ;;  %vm4820_vm9 = vmmov %vm4814_vm5  ;;  %vm738_vm5 = vcmp.eq.s32.totalorder %v718_v18, %v2916_v48 }
 0x140   :  { %4817 = vst [vmem:[#allocation29_spill] sm:$0xff] %v4816_v10  ;;  %4818 = vst [vmem:[#allocation30_spill] sm:$0xff] %v3633_v36  ;;  %1361 = vmax.xlane.f32.xlu1 %v3633_v36  ;;  %v3660_v59 = vsel %vm651_vm11, %v652_v21, %v650_v31  ;;  %v1292_v60 = vsub.f32 0.0, %v3638_v37  ;;  %v4831_v31 = vmov 0 }
 0x141   :  { %vm3647_vm14 = vmand %vm730_vm0, %vm4820_vm9  ;;  %4824 = vst [vmem:[#allocation33_spill] sm:$0xff] %v3660_v59  ;;  %v1300_v21 = vsub.f32 0.0, %v3660_v59 }
 0x142   :  { %v4822_v14 = vsel %vm3647_vm14, 4294967295, %v4821_v14  ;;  %v3656_v4 = vsel %vm3647_vm14, %v3638_v37, 0.0  ;;  %vm4825_vm10 = vmmov %vm4820_vm9  ;;  %v3705_v37 = vld [vmem:[#allocation2 + $0x8] sm:$0xff]  ;;  %4857 = vst [vmem:[#allocation53_spill] sm:$0xff] %v3755_v49 }
 0x143   :  { %4823 = vst [vmem:[#allocation32_spill] sm:$0xff] %v4822_v14  ;;  %834 = vmax.xlane.f32.xlu0 %v3656_v4  ;;  %vm3664_vm9 = vmand %vm738_vm5, %vm4825_vm10 }
 0x144   :  { %v4827_v42 = vsel %vm3664_vm9, 4294967295, %v4826_v42  ;;  %v3671_v22 = vsel %vm3664_vm9, %v3660_v59, 0.0  ;;  %vm763_vm8 = vmxor %vm730_vm0, %vm4746_vm3  ;;  %4841 = vst [vmem:[#allocation41_spill] sm:$0xff] %v3705_v37 }
 0x145   :  { %4828 = vst [vmem:[#allocation34_spill] sm:$0xff] %v4827_v42  ;;  %4829 = vst [vmem:[#allocation35_spill] sm:$0xff] %v3671_v22 }
 0x146   :  { %vm4830_vm11 = vmmov %vm4825_vm10 }
 0x147   :  { %850 = vmax.xlane.f32.xlu0 %v3671_v22  ;;  %vm3681_vm10 = vmand %vm763_vm8, %vm4830_vm11 }
 0x148   :  { %v4832_v31 = vsel %vm3681_vm10, 4294967295, %v4831_v31  ;;  %v3687_v18 = vsel %vm3681_vm10, %v1292_v60, 0.0  ;;  %vm771_vm9 = vmxor %vm738_vm5, %vm4746_vm3  ;;  %v3703_v60 = vld [vmem:[#allocation2 + $0x48] sm:$0xff]  ;;  %vm4844_vm3 = vcmask 7168  }
 0x149   :  { %4833 = vst [vmem:[#allocation36_spill] sm:$0xff] %v4832_v31  ;;  %4834 = vst [vmem:[#allocation37_spill] sm:$0xff] %v3687_v18 }
 0x14a   :  { %vm4835_vm0 = vmmov %vm4830_vm11  ;;  %4840 = vst [vmem:[#allocation40_spill] sm:$0xff] %v3703_v60 }
 0x14b   :  { %1347 = vmax.xlane.f32.xlu0 %v3687_v18  ;;  %vm3694_vm14 = vmand %vm771_vm9, %vm4835_vm0  ;;  %v3794_v18 = vld [vmem:[#allocation5 + $0x50] sm:$0xff] }
 0x14c   :  { %v4837_v41 = vsel %vm3694_vm14, 4294967295, %v4836_v41  ;;  %v3700_v48 = vsel %vm3694_vm14, %v1300_v21, 0.0  ;;  %v3718_v21 = vld [vmem:[#allocation2 + $0x40] sm:$0xff]  ;;  %vm4847_vm8 = vmmov %vm4844_vm3  ;;  %4869 = vst [vmem:[#allocation61_spill] sm:$0xff] %v3794_v18 }
 0x14d   :  { %4838 = vst [vmem:[#allocation38_spill] sm:$0xff] %v4837_v41  ;;  %4839 = vst [vmem:[#allocation39_spill] sm:$0xff] %v3700_v48  ;;  %v3720_v41 = vld [vmem:[#allocation2] sm:$0xff] }
 0x14e   :  { %4845 = vst [vmem:[#allocation44_spill] sm:$0xff] %v3718_v21  ;;  %4846 = vst [vmem:[#allocation45_spill] sm:$0xff] %v3720_v41 }
 0x14f   :  { %1363 = vmax.xlane.f32.xlu0 %v3700_v48  ;;  %v3735_v48 = vld [vmem:[#allocation5 + $0x8] sm:$0xff]  ;;  %vm4852_vm5 = vmmov %vm4844_vm3 }
 0x150   :  { %4851 = vst [vmem:[#allocation49_spill] sm:$0xff] %v3735_v48  ;;  %vm4853_vm9 = vmmov %vm4844_vm3 }
 0x151   :  { %vm4858_vm11 = vmmov %vm4844_vm3 }
 0x152   :  { %vm4859_vm0 = vmmov %vm4844_vm3 }
 0x18a   :  { %v823_v10 = vpop.xlane.xlu1 %822 }
 0x18b   :  { %v839_v31 = vpop.xlane.xlu0 %838  ;;  %v3711_v25 = vmax.f32 %v3705_v37, %v823_v10 }
 0x18c   :  { %v3708_v59 = vmax.f32 %v3703_v60, %v839_v31 }
 0x18d   :  { %4843 = vst [vmem:[#allocation43_spill] sm:$0xff] %v3711_v25  ;;  %1270 = vst.msk [vmem:[#allocation2 + $0x8] sm:$0xff] %vm4847_vm8, %v3711_v25  ;;  %875 = vperm.xlu0 %2125, %v3711_v25   ;;  %v3772_v25 = vld [vmem:[#allocation2 + $0x18] sm:$0xff] }
 0x18e   :  { %4842 = vst [vmem:[#allocation42_spill] sm:$0xff] %v3708_v59  ;;  %1278 = vst.msk [vmem:[#allocation2 + $0x48] sm:$0xff] %vm4844_vm3, %v3708_v59  ;;  %915 = vperm.xlu1 %2126, %v3708_v59   ;;  %v3733_v59 = vld [vmem:[#allocation5 + $0x40] sm:$0xff] }
 0x18f   :  { %v837_v10 = vpop.xlane.xlu1 %836  ;;  %v821_v14 = vpop.xlane.xlu0 %820  ;;  %4850 = vst [vmem:[#allocation48_spill] sm:$0xff] %v3733_v59  ;;  %4862 = vst [vmem:[#allocation56_spill] sm:$0xff] %v3772_v25 }
 0x190   :  { %v3728_v42 = vmax.f32 %v3718_v21, %v837_v10  ;;  %v3731_v60 = vmax.f32 %v3720_v41, %v821_v14  ;;  %v3753_v21 = vld [vmem:[#allocation2 + $0x50] sm:$0xff]  ;;  %vm4864_vm3 = vmmov %vm4859_vm0 }
 0x191   :  { %4856 = vst [vmem:[#allocation52_spill] sm:$0xff] %v3753_v21  ;;  %vm4865_vm8 = vmmov %vm4859_vm0 }
 0x192   :  { %4848 = vst [vmem:[#allocation46_spill] sm:$0xff] %v3728_v42  ;;  %4849 = vst [vmem:[#allocation47_spill] sm:$0xff] %v3731_v60  ;;  %910 = vperm.xlu0 %2125, %v3728_v42   ;;  %870 = vperm.xlu1 %2126, %v3731_v60  }
 0x193   :  { %1277 = vst.msk [vmem:[#allocation2 + $0x40] sm:$0xff] %vm4852_vm5, %v3728_v42  ;;  %v1350_v14 = vpop.xlane.xlu1 %1349  ;;  %v1336_v10 = vpop.xlane.xlu0 %1335  ;;  %vm4870_vm5 = vmmov %vm4859_vm0 }
 0x194   :  { %1269 = vst.msk [vmem:[#allocation2] sm:$0xff] %vm4853_vm9, %v3731_v60  ;;  %v3748_v37 = vmax.f32 %v3733_v59, %v1350_v14  ;;  %v3751_v31 = vmax.f32 %v3735_v48, %v1336_v10  ;;  %v3774_v59 = vld [vmem:[#allocation5 + $0x10] sm:$0xff]  ;;  %vm4871_vm9 = vmmov %vm4859_vm0 }
 0x195   :  { %4863 = vst [vmem:[#allocation57_spill] sm:$0xff] %v3774_v59 }
 0x196   :  { %4854 = vst [vmem:[#allocation50_spill] sm:$0xff] %v3748_v37  ;;  %4855 = vst [vmem:[#allocation51_spill] sm:$0xff] %v3751_v31  ;;  %1388 = vperm.xlu0 %2125, %v3751_v31  }
 0x197   :  { %1789 = vst.msk [vmem:[#allocation5 + $0x40] sm:$0xff] %vm4858_vm11, %v3748_v37  ;;  %v841_v14 = vpop.xlane.xlu1 %840  ;;  %v1352_v10 = vpop.xlane.xlu0 %1351  ;;  %vm4876_vm11 = vmmov %vm4859_vm0 }
 0x198   :  { %1782 = vst.msk [vmem:[#allocation5 + $0x8] sm:$0xff] %vm4859_vm0, %v3751_v31  ;;  %v3767_v41 = vmax.f32 %v3753_v21, %v841_v14  ;;  %v3770_v42 = vmax.f32 %v3755_v49, %v1352_v10  ;;  %v3792_v21 = vld [vmem:[#allocation2 + $0x58] sm:$0xff]  ;;  %v3814_v49 = vld [vmem:[#allocation2 + $0x20] sm:$0xff] }
 0x199   :  { %4868 = vst [vmem:[#allocation60_spill] sm:$0xff] %v3792_v21  ;;  %4875 = vst [vmem:[#allocation65_spill] sm:$0xff] %v3814_v49 }
 0x19a   :  { %4860 = vst [vmem:[#allocation54_spill] sm:$0xff] %v3767_v41  ;;  %4861 = vst [vmem:[#allocation55_spill] sm:$0xff] %v3770_v42  ;;  %1423 = vperm.xlu0 %2125, %v3748_v37   ;;  %1428 = vperm.xlu1 %2126, %v3770_v42  }
 0x19b   :  { %1279 = vst.msk [vmem:[#allocation2 + $0x50] sm:$0xff] %vm4864_vm3, %v3767_v41  ;;  %v827_v14 = vpop.xlane.xlu0 %826  ;;  %v1338_v10 = vpop.xlane.xlu1 %1337  ;;  %vm4881_vm3 = vmmov %vm4859_vm0 }
 0x19c   :  { %1790 = vst.msk [vmem:[#allocation5 + $0x48] sm:$0xff] %vm4865_vm8, %v3770_v42  ;;  %v3787_v48 = vmax.f32 %v3772_v25, %v827_v14  ;;  %v3790_v60 = vmax.f32 %v3774_v59, %v1338_v10  ;;  %v3812_v25 = vld [vmem:[#allocation5] sm:$0xff]  ;;  %vm4882_vm8 = vmmov %vm4859_vm0 }
 0x19d   :  { %4874 = vst [vmem:[#allocation64_spill] sm:$0xff] %v3812_v25 }
 0x19e   :  { %4866 = vst [vmem:[#allocation58_spill] sm:$0xff] %v3787_v48  ;;  %4867 = vst [vmem:[#allocation59_spill] sm:$0xff] %v3790_v60  ;;  %920 = vperm.xlu0 %2125, %v3767_v41   ;;  %885 = vperm.xlu1 %2126, %v3787_v48  }
 0x19f   :  { %1272 = vst.msk [vmem:[#allocation2 + $0x18] sm:$0xff] %vm4870_vm5, %v3787_v48  ;;  %v3834_v48 = vld [vmem:[#allocation2 + $0x60] sm:$0xff]  ;;  %vm4887_vm5 = vmmov %vm4859_vm0 }
 0x1a0   :  { %1783 = vst.msk [vmem:[#allocation5 + $0x10] sm:$0xff] %vm4871_vm9, %v3790_v60  ;;  %4880 = vst [vmem:[#allocation69_spill] sm:$0xff] %v3834_v48 }
 0x1a1   :  { %v843_v14 = vpop.xlane.xlu0 %842  ;;  %vm4888_vm9 = vmmov %vm4859_vm0 }
 0x1a2   :  { %v1354_v10 = vpop.xlane.xlu1 %1353  ;;  %v3807_v42 = vmax.f32 %v3792_v21, %v843_v14  ;;  %v3832_v21 = vld [vmem:[#allocation2 + $0x10] sm:$0xff] }
 0x1a3   :  { %v3810_v31 = vmax.f32 %v3794_v18, %v1354_v10  ;;  %4879 = vst [vmem:[#allocation68_spill] sm:$0xff] %v3832_v21 }
 0x1a4   :  { %4872 = vst [vmem:[#allocation62_spill] sm:$0xff] %v3807_v42  ;;  %1280 = vst.msk [vmem:[#allocation2 + $0x58] sm:$0xff] %vm4876_vm11, %v3807_v42  ;;  %925 = vperm.xlu1 %2126, %v3807_v42   ;;  %v3854_v42 = vld [vmem:[#allocation5 + $0x20] sm:$0xff] }
 0x1a5   :  { %4873 = vst [vmem:[#allocation63_spill] sm:$0xff] %v3810_v31  ;;  %1791 = vst.msk [vmem:[#allocation5 + $0x50] sm:$0xff] %vm4859_vm0, %v3810_v31  ;;  %1433 = vperm.xlu0 %2125, %v3810_v31   ;;  %v1334_v14 = vpop.xlane.xlu0 %1333 }
 0x1a6   :  { %v829_v10 = vpop.xlane.xlu1 %828  ;;  %v3827_v41 = vmax.f32 %v3812_v25, %v1334_v14  ;;  %v3852_v25 = vld [vmem:[#allocation5 + $0x18] sm:$0xff]  ;;  %4886 = vst [vmem:[#allocation73_spill] sm:$0xff] %v3854_v42  ;;  %vm4893_vm11 = vmmov %vm4859_vm0 }
 0x1a7   :  { %v3830_v37 = vmax.f32 %v3814_v49, %v829_v10  ;;  %4885 = vst [vmem:[#allocation72_spill] sm:$0xff] %v3852_v25 }
 0x1a8   :  { %4877 = vst [vmem:[#allocation66_spill] sm:$0xff] %v3827_v41  ;;  %1781 = vst.msk [vmem:[#allocation5] sm:$0xff] %vm4881_vm3, %v3827_v41  ;;  %1383 = vperm.xlu1 %2126, %v3827_v41   ;;  %v3874_v41 = vld [vmem:[#allocation5 + $0x60] sm:$0xff] }
 0x1a9   :  { %4878 = vst [vmem:[#allocation67_spill] sm:$0xff] %v3830_v37  ;;  %1273 = vst.msk [vmem:[#allocation2 + $0x20] sm:$0xff] %vm4882_vm8, %v3830_v37  ;;  %890 = vperm.xlu0 %2125, %v3830_v37   ;;  %v825_v14 = vpop.xlane.xlu0 %824 }
 0x1aa   :  { %v3847_v18 = vmax.f32 %v3832_v21, %v825_v14  ;;  %v3872_v21 = vld [vmem:[#allocation5 + $0x58] sm:$0xff]  ;;  %4892 = vst [vmem:[#allocation77_spill] sm:$0xff] %v3874_v41  ;;  %vm4898_vm3 = vmmov %vm4859_vm0 }
 0x1ab   :  { %4891 = vst [vmem:[#allocation76_spill] sm:$0xff] %v3872_v21  ;;  %vm4899_vm8 = vmmov %vm4859_vm0 }
 0x1ac   :  { %v845_v10 = vpop.xlane.xlu1 %844  ;;  %4883 = vst [vmem:[#allocation70_spill] sm:$0xff] %v3847_v18  ;;  %1271 = vst.msk [vmem:[#allocation2 + $0x10] sm:$0xff] %vm4887_vm5, %v3847_v18  ;;  %880 = vperm.xlu1 %2126, %v3847_v18   ;;  %v3894_v18 = vld [vmem:[#allocation2 + $0x30] sm:$0xff] }
 0x1ad   :  { %v3850_v59 = vmax.f32 %v3834_v48, %v845_v10  ;;  %v1340_v14 = vpop.xlane.xlu0 %1339  ;;  %4897 = vst [vmem:[#allocation81_spill] sm:$0xff] %v3894_v18  ;;  %vm4904_vm5 = vmmov %vm4859_vm0 }
 0x1ae   :  { %v3867_v49 = vmax.f32 %v3852_v25, %v1340_v14  ;;  %v3892_v25 = vld [vmem:[#allocation2 + $0x28] sm:$0xff] }
 0x1af   :  { %4884 = vst [vmem:[#allocation71_spill] sm:$0xff] %v3850_v59  ;;  %1281 = vst.msk [vmem:[#allocation2 + $0x60] sm:$0xff] %vm4888_vm9, %v3850_v59  ;;  %930 = vperm.xlu0 %2125, %v3850_v59  }
 0x1b0   :  { %v1342_v10 = vpop.xlane.xlu1 %1341  ;;  %4889 = vst [vmem:[#allocation74_spill] sm:$0xff] %v3867_v49  ;;  %1784 = vst.msk [vmem:[#allocation5 + $0x18] sm:$0xff] %vm4893_vm11, %v3867_v49  ;;  %1398 = vperm.xlu1 %2126, %v3867_v49   ;;  %v3914_v49 = vld [vmem:[#allocation2 + $0x70] sm:$0xff] }
 0x1b1   :  { %v3870_v31 = vmax.f32 %v3854_v42, %v1342_v10  ;;  %4896 = vst [vmem:[#allocation80_spill] sm:$0xff] %v3892_v25  ;;  %4903 = vst [vmem:[#allocation85_spill] sm:$0xff] %v3914_v49 }
 0x1b2   :  { %v1356_v14 = vpop.xlane.xlu0 %1355  ;;  %vm4905_vm9 = vmmov %vm4859_vm0 }
 0x1b3   :  { %4890 = vst [vmem:[#allocation75_spill] sm:$0xff] %v3870_v31  ;;  %1785 = vst.msk [vmem:[#allocation5 + $0x20] sm:$0xff] %vm4859_vm0, %v3870_v31  ;;  %1403 = vperm.xlu0 %2125, %v3870_v31   ;;  %v3887_v48 = vmax.f32 %v3872_v21, %v1356_v14  ;;  %v3912_v21 = vld [vmem:[#allocation2 + $0x68] sm:$0xff] }
 0x1b4   :  { %v1358_v10 = vpop.xlane.xlu1 %1357  ;;  %4902 = vst [vmem:[#allocation84_spill] sm:$0xff] %v3912_v21  ;;  %vm4910_vm11 = vmmov %vm4859_vm0 }
 0x1b5   :  { %4894 = vst [vmem:[#allocation78_spill] sm:$0xff] %v3887_v48  ;;  %v3890_v37 = vmax.f32 %v3874_v41, %v1358_v10  ;;  %1792 = vst.msk [vmem:[#allocation5 + $0x58] sm:$0xff] %vm4898_vm3, %v3887_v48  ;;  %1438 = vperm.xlu1 %2126, %v3887_v48   ;;  %v3934_v48 = vld [vmem:[#allocation5 + $0x30] sm:$0xff] }
 0x1b6   :  { %4909 = vst [vmem:[#allocation89_spill] sm:$0xff] %v3934_v48  ;;  %vm4915_vm3 = vmmov %vm4859_vm0 }
 0x1b7   :  { %4895 = vst [vmem:[#allocation79_spill] sm:$0xff] %v3890_v37  ;;  %1793 = vst.msk [vmem:[#allocation5 + $0x60] sm:$0xff] %vm4899_vm8, %v3890_v37  ;;  %1443 = vperm.xlu0 %2125, %v3890_v37   ;;  %v831_v14 = vpop.xlane.xlu0 %830 }
 0x1b8   :  { %v3907_v42 = vmax.f32 %v3892_v25, %v831_v14  ;;  %v3932_v25 = vld [vmem:[#allocation5 + $0x28] sm:$0xff]  ;;  %vm4916_vm8 = vmmov %vm4859_vm0 }
 0x1b9   :  { %v833_v10 = vpop.xlane.xlu1 %832  ;;  %4908 = vst [vmem:[#allocation88_spill] sm:$0xff] %v3932_v25 }
 0x1ba   :  { %4900 = vst [vmem:[#allocation82_spill] sm:$0xff] %v3907_v42  ;;  %v3910_v59 = vmax.f32 %v3894_v18, %v833_v10  ;;  %1274 = vst.msk [vmem:[#allocation2 + $0x28] sm:$0xff] %vm4904_vm5, %v3907_v42  ;;  %895 = vperm.xlu1 %2126, %v3907_v42   ;;  %v3954_v42 = vld [vmem:[#allocation5 + $0x70] sm:$0xff] }
 0x1bb   :  { %4914 = vst [vmem:[#allocation93_spill] sm:$0xff] %v3954_v42  ;;  %vm4920_vm5 = vmmov %vm4859_vm0 }
 0x1bc   :  { %4901 = vst [vmem:[#allocation83_spill] sm:$0xff] %v3910_v59  ;;  %1275 = vst.msk [vmem:[#allocation2 + $0x30] sm:$0xff] %vm4905_vm9, %v3910_v59  ;;  %900 = vperm.xlu0 %2125, %v3910_v59   ;;  %v847_v14 = vpop.xlane.xlu0 %846 }
 0x1bd   :  { %v3927_v41 = vmax.f32 %v3912_v21, %v847_v14  ;;  %v3952_v21 = vld [vmem:[#allocation5 + $0x68] sm:$0xff]  ;;  %vm4921_vm9 = vmmov %vm4859_vm0 }
 0x1be   :  { %4913 = vst [vmem:[#allocation92_spill] sm:$0xff] %v3952_v21 }
 0x1bf   :  { %v849_v10 = vpop.xlane.xlu1 %848  ;;  %4906 = vst [vmem:[#allocation86_spill] sm:$0xff] %v3927_v41  ;;  %1282 = vst.msk [vmem:[#allocation2 + $0x68] sm:$0xff] %vm4910_vm11, %v3927_v41  ;;  %935 = vperm.xlu1 %2126, %v3927_v41  }
 0x1c0   :  { %v3930_v31 = vmax.f32 %v3914_v49, %v849_v10  ;;  %v1344_v14 = vpop.xlane.xlu0 %1343  ;;  %vm4924_vm11 = vmmov %vm4859_vm0 }
 0x1c1   :  { %v3947_v18 = vmax.f32 %v3932_v25, %v1344_v14  ;;  %v3972_v25 = vld [vmem:[#allocation2 + $0x38] sm:$0xff] }
 0x1c2   :  { %4907 = vst [vmem:[#allocation87_spill] sm:$0xff] %v3930_v31  ;;  %1283 = vst.msk [vmem:[#allocation2 + $0x70] sm:$0xff] %vm4859_vm0, %v3930_v31  ;;  %940 = vperm.xlu0 %2125, %v3930_v31  }
 0x1c3   :  { %v1346_v10 = vpop.xlane.xlu1 %1345  ;;  %4911 = vst [vmem:[#allocation90_spill] sm:$0xff] %v3947_v18  ;;  %1786 = vst.msk [vmem:[#allocation5 + $0x28] sm:$0xff] %vm4915_vm3, %v3947_v18  ;;  %1393 = vperm.xlu1 %2126, %v3790_v60  }
 0x1c4   :  { %v3950_v37 = vmax.f32 %v3934_v48, %v1346_v10  ;;  %4919 = vst [vmem:[#allocation96_spill] sm:$0xff] %v3972_v25  ;;  %vm4929_vm3 = vmmov %vm4859_vm0 }
 0x1c6   :  { %4912 = vst [vmem:[#allocation91_spill] sm:$0xff] %v3950_v37  ;;  %1787 = vst.msk [vmem:[#allocation5 + $0x30] sm:$0xff] %vm4916_vm8, %v3950_v37  ;;  %1413 = vperm.xlu0 %2125, %v3950_v37   ;;  %v3987_v37 = vld [vmem:[#allocation2 + $0x78] sm:$0xff] }
 0x1c7   :  { %v1360_v14 = vpop.xlane.xlu0 %1359  ;;  %1408 = vperm.xlu1 %2126, %v3947_v18   ;;  %4923 = vst [vmem:[#allocation98_spill] sm:$0xff] %v3987_v37  ;;  %vm4931_vm8 = vmmov %vm4859_vm0 }
 0x1c8   :  { %v3967_v49 = vmax.f32 %v3952_v21, %v1360_v14  ;;  %v3997_v21 = vld [vmem:[#allocation5 + $0x38] sm:$0xff] }
 0x1c9   :  { %v1362_v10 = vpop.xlane.xlu1 %1361  ;;  %4926 = vst [vmem:[#allocation100_spill] sm:$0xff] %v3997_v21 }
 0x1ca   :  { %4917 = vst [vmem:[#allocation94_spill] sm:$0xff] %v3967_v49  ;;  %v3970_v59 = vmax.f32 %v3954_v42, %v1362_v10  ;;  %1794 = vst.msk [vmem:[#allocation5 + $0x68] sm:$0xff] %vm4920_vm5, %v3967_v49  ;;  %vm4937_vm5 = vnez %v4753_v7 }
 0x1cb   :  { %1448 = vperm.xlu1 %2126, %v3967_v49  }
 0x1cc   :  { %4918 = vst [vmem:[#allocation95_spill] sm:$0xff] %v3970_v59  ;;  %1795 = vst.msk [vmem:[#allocation5 + $0x70] sm:$0xff] %vm4921_vm9, %v3970_v59  ;;  %1453 = vperm.xlu0 %2125, %v3970_v59   ;;  %v835_v14 = vpop.xlane.xlu0 %834  ;;  %vm4938_vm9 = vnez %v4713_v24 }
 0x1cd   :  { %v3985_v10 = vmax.f32 %v3972_v25, %v835_v14  ;;  %v4007_v25 = vld [vmem:[#allocation5 + $0x78] sm:$0xff] }
 0x1ce   :  { %4928 = vst [vmem:[#allocation102_spill] sm:$0xff] %v4007_v25 }
 0x1cf   :  { %4922 = vst [vmem:[#allocation97_spill] sm:$0xff] %v3985_v10  ;;  %1276 = vst.msk [vmem:[#allocation2 + $0x38] sm:$0xff] %vm4924_vm11, %v3985_v10  ;;  %905 = vperm.xlu1 %2126, %v3985_v10   ;;  %vm4939_vm11 = vnez %v4762_v15 }
 0x1d0   :  { %v851_v48 = vpop.xlane.xlu0 %850 }
 0x1d1   :  { %v3995_v42 = vmax.f32 %v3987_v37, %v851_v48 }
 0x1d3   :  { %4925 = vst [vmem:[#allocation99_spill] sm:$0xff] %v3995_v42  ;;  %1284 = vst.msk [vmem:[#allocation2 + $0x78] sm:$0xff] %vm4859_vm0, %v3995_v42  ;;  %945 = vperm.xlu1 %2126, %v3995_v42   ;;  %vm4940_vm0 = vnez %v4736_v29 }
 0x1d4   :  { %v1348_v31 = vpop.xlane.xlu0 %1347 }
 0x1d5   :  { %v4005_v59 = vmax.f32 %v3997_v21, %v1348_v31 }
 0x1d7   :  { %4927 = vst [vmem:[#allocation101_spill] sm:$0xff] %v4005_v59  ;;  %1788 = vst.msk [vmem:[#allocation5 + $0x38] sm:$0xff] %vm4929_vm3, %v4005_v59  ;;  %1418 = vperm.xlu1 %2126, %v4005_v59   ;;  %vm4941_vm3 = vnez %v4771_v0 }
 0x1d8   :  { %v1364_v14 = vpop.xlane.xlu0 %1363 }
 0x1d9   :  { %v4015_v37 = vmax.f32 %v4007_v25, %v1364_v14 }
 0x1db   :  { %4930 = vst [vmem:[#allocation103_spill] sm:$0xff] %v4015_v37  ;;  %1796 = vst.msk [vmem:[#allocation5 + $0x78] sm:$0xff] %vm4931_vm8, %v4015_v37  ;;  %1458 = vperm.xlu1 %2126, %v4015_v37   ;;  %vm4942_vm8 = vnez %v4745_v34 }
 0x208   :  { %v876_v48 = vpop.permute.xlu0 %875 }
 0x209   :  { %v916_v31 = vpop.permute.xlu1 %915  ;;  %v949_v42 = vsub.f32 %v3030_v6, %v876_v48 }
 0x20a   :  { %v957_v21 = vsub.f32 %v3008_v40, %v916_v31 }
 0x20b   :  { %v966_v18 = vmul.f32 1.442695, %v949_v42 }
 0x20c   :  { %v982_v49 = vmul.f32 1.442695, %v957_v21 }
 0x20d   :  { %v911_v14 = vpop.permute.xlu0 %910  ;;  %v871_v60 = vpop.permute.xlu1 %870 }
 0x20e   :  { %2159 = vpow2.f32 %v982_v49  ;;  %v956_v10 = vsub.f32 %v3082_v12, %v911_v14  ;;  %v948_v25 = vsub.f32 %v3087_v23, %v871_v60 }
 0x20f   :  { %2161 = vpow2.f32 %v966_v18 }
 0x210   :  { %v980_v41 = vmul.f32 1.442695, %v956_v10  ;;  %v964_v59 = vmul.f32 1.442695, %v948_v25 }
 0x211   :  { %v1389_v36 = vpop.permute.xlu0 %1388 }
 0x212   :  { %2163 = vpow2.f32 %v980_v41  ;;  %v1462_v37 = vsub.f32 %v3140_v61, %v1389_v36 }
 0x213   :  { %2165 = vpow2.f32 %v964_v59 }
 0x214   :  { %v1479_v31 = vmul.f32 1.442695, %v1462_v37 }
 0x215   :  { %v1424_v47 = vpop.permute.xlu0 %1423  ;;  %v1429_v48 = vpop.permute.xlu1 %1428 }
 0x216   :  { %2167 = vpow2.f32 %v1479_v31  ;;  %v1469_v49 = vsub.f32 %v3147_v30, %v1424_v47  ;;  %v1470_v42 = vsub.f32 %v3200_v56, %v1429_v48 }
 0x218   :  { %v1493_v18 = vmul.f32 1.442695, %v1469_v49  ;;  %v1495_v21 = vmul.f32 1.442695, %v1470_v42 }
 0x219   :  { %v886_v14 = vpop.permute.xlu1 %885  ;;  %v921_v54 = vpop.permute.xlu0 %920 }
 0x21a   :  { %v951_v60 = vsub.f32 %v3253_v52, %v886_v14  ;;  %2169 = vpow2.f32 %v1495_v21  ;;  %v958_v3 = vsub.f32 %v3196_v19, %v921_v54 }
 0x21b   :  { %v2160_v22 = vpop.eup %2159  ;;  %2171 = vpow2.f32 %v1493_v18 }
 0x21c   :  { %v2162_v25 = vpop.eup %2161  ;;  %v1005_v61 = vsel %vm2996_vm7, %v2160_v22, 0.0  ;;  %v970_v36 = vmul.f32 1.442695, %v951_v60  ;;  %vm4932_vm7 = vnez %v4710_v5 }
 0x21d   :  { %v997_v37 = vsel %vm3017_vm12, %v2162_v25, 0.0  ;;  %1110 = vadd.xlane.f32.xlu0 %v1005_v61  ;;  %vm4933_vm12 = vnez %v4707_v51 }
 0x21e   :  { %1094 = vadd.xlane.f32.xlu1 %v997_v37  ;;  %2173 = vpow2.f32 %v970_v36  ;;  %v1190_v49 = vmul.f32 %v997_v37, %v3030_v6  ;;  %v984_v36 = vmul.f32 1.442695, %v958_v3  ;;  %v1198_v37 = vmul.f32 %v1005_v61, %v3008_v40 }
 0x21f   :  { %v926_v30 = vpop.permute.xlu1 %925  ;;  %v2164_v47 = vpop.eup %2163 }
 0x220   :  { %v959_v56 = vsub.f32 %v3314_v13, %v926_v30  ;;  %v2166_v59 = vpop.eup %2165  ;;  %v1004_v41 = vsel %vm3072_vm4, %v2164_v47, 0.0  ;;  %vm4935_vm4 = vnez %v4733_v17 }
 0x221   :  { %v996_v39 = vsel %vm3059_vm13, %v2166_v59, 0.0  ;;  %v1197_v47 = vmul.f32 %v1004_v41, %v3082_v12  ;;  %v1434_v59 = vpop.permute.xlu0 %1433  ;;  %vm4934_vm13 = vnez %v4719_v35 }
 0x222   :  { %v986_v10 = vmul.f32 1.442695, %v959_v56  ;;  %1108 = vadd.xlane.f32.xlu1 %v1004_v41  ;;  %1092 = vadd.xlane.f32.xlu0 %v996_v39  ;;  %v1189_v14 = vmul.f32 %v996_v39, %v3087_v23  ;;  %v1471_v51 = vsub.f32 %v3318_v16, %v1434_v59 }
 0x223   :  { %v1384_v22 = vpop.permute.xlu1 %1383  ;;  %v2168_v48 = vpop.eup %2167 }
 0x224   :  { %v1461_v31 = vsub.f32 %v3354_v50, %v1384_v22  ;;  %v1510_v42 = vsel %vm3111_vm1, %v2168_v48, 0.0  ;;  %2175 = vpow2.f32 %v986_v10  ;;  %vm4936_vm1 = vnez %v4740_v45 }
 0x225   :  { %v891_v12 = vpop.permute.xlu0 %890 }
 0x226   :  { %v1477_v18 = vmul.f32 1.442695, %v1461_v31  ;;  %1607 = vadd.xlane.f32.xlu1 %v1510_v42  ;;  %1207 = vadd.xlane.f32.xlu0 %v1190_v49  ;;  %v952_v17 = vsub.f32 %v3359_v44, %v891_v12  ;;  %v4944_v12 = vld [vmem:[#allocation15_spill] sm:$0xff] }
 0x227   :  { %v881_v21 = vpop.permute.xlu1 %880  ;;  %v2170_v60 = vpop.eup %2169 }
 0x228   :  { %v950_v20 = vsub.f32 %v3400_v8, %v881_v21  ;;  %v2172_v50 = vpop.eup %2171  ;;  %2177 = vpow2.f32 %v1477_v18  ;;  %v1518_v6 = vsel %vm4932_vm7, %v2170_v60, 0.0  ;;  %v1702_v18 = vmul.f32 %v1510_v42, %v3010_v27 }
 0x229   :  { %v1517_v30 = vsel %vm4933_vm12, %v2172_v50, 0.0  ;;  %v1710_v60 = vmul.f32 %v1518_v6, %v2989_v38  ;;  %vm4943_vm7 = vnez %v4780_v26  ;;  %vm4945_vm12 = vnez %v4944_v12  ;;  %v4963_v12 = vld [vmem:[#allocation39_spill] sm:$0xff] }
 0x22a   :  { %v968_v25 = vmul.f32 1.442695, %v950_v20  ;;  %1205 = vadd.xlane.f32.xlu1 %v1189_v14  ;;  %1623 = vadd.xlane.f32.xlu0 %v1518_v6  ;;  %v972_v14 = vmul.f32 1.442695, %v952_v17  ;;  %v1709_v24 = vmul.f32 %v1517_v30, %v3050_v1 }
 0x22b   :  { %v1399_v62 = vpop.permute.xlu1 %1398  ;;  %v2174_v56 = vpop.eup %2173 }
 0x22c   :  { %2179 = vpow2.f32 %v968_v25  ;;  %v1464_v10 = vsub.f32 %v3436_v63, %v1399_v62  ;;  %v999_v5 = vsel %vm4934_vm13, %v2174_v56, 0.0  ;;  %v1497_v63 = vmul.f32 1.442695, %v1471_v51 }
 0x22d   :  { %2181 = vpow2.f32 %v984_v36  ;;  %v1192_v62 = vmul.f32 %v999_v5, %v3253_v52 }
 0x22e   :  { %1621 = vadd.xlane.f32.xlu1 %v1517_v30  ;;  %1223 = vadd.xlane.f32.xlu0 %v1198_v37  ;;  %v1483_v61 = vmul.f32 1.442695, %v1464_v10 }
 0x230   :  { %v1439_v23 = vpop.permute.xlu1 %1438  ;;  %2183 = vpow2.f32 %v1483_v61 }
 0x231   :  { %v2176_v39 = vpop.eup %2175  ;;  %v1472_v22 = vsub.f32 %v3476_v46, %v1439_v23  ;;  %2185 = vpow2.f32 %v1497_v63  ;;  %v931_v46 = vpop.permute.xlu0 %930 }
 0x232   :  { %1221 = vadd.xlane.f32.xlu1 %v1197_v47  ;;  %1098 = vadd.xlane.f32.xlu0 %v999_v5  ;;  %v1007_v54 = vsel %vm4935_vm4, %v2176_v39, 0.0  ;;  %v960_v7 = vsub.f32 %v3405_v32, %v931_v46 }
 0x233   :  { %v1499_v35 = vmul.f32 1.442695, %v1472_v22 }
 0x234   :  { %v988_v42 = vmul.f32 1.442695, %v960_v7 }
 0x235   :  { %v896_v40 = vpop.permute.xlu1 %895  ;;  %v2178_v31 = vpop.eup %2177  ;;  %2187 = vpow2.f32 %v1499_v35  ;;  %v4948_v35 = vld [vmem:[#allocation9_spill] sm:$0xff] }
 0x236   :  { %1114 = vadd.xlane.f32.xlu0 %v1007_v54  ;;  %v1509_v49 = vsel %vm4936_vm1, %v2178_v31, 0.0  ;;  %v953_v21 = vsub.f32 %v3519_v2, %v896_v40  ;;  %2189 = vpow2.f32 %v972_v14  ;;  %v1404_v1 = vpop.permute.xlu0 %1403 }
 0x237   :  { %v1701_v50 = vmul.f32 %v1509_v49, %v3076_v58  ;;  %v1465_v47 = vsub.f32 %v3440_v57, %v1404_v1  ;;  %v4956_v1 = vld [vmem:[#allocation27_spill] sm:$0xff] }
 0x238   :  { %v974_v36 = vmul.f32 1.442695, %v953_v21  ;;  %v4951_v21 = vld [vmem:[#allocation8_spill] sm:$0xff] }
 0x239   :  { %v2180_v41 = vpop.eup %2179  ;;  %v1485_v29 = vmul.f32 1.442695, %v1465_v47  ;;  %v4957_v47 = vld [vmem:[#allocation17_spill] sm:$0xff] }
 0x23a   :  { %v936_v48 = vpop.permute.xlu1 %935  ;;  %v998_v16 = vsel %vm4937_vm5, %v2180_v41, 0.0  ;;  %v2182_v3 = vpop.eup %2181  ;;  %1605 = vadd.xlane.f32.xlu0 %v1509_v49  ;;  %2191 = vpow2.f32 %v974_v36  ;;  %vm4958_vm4 = vnez %v4957_v47  ;;  %v4986_v47 = vld [vmem:[#allocation43_spill] sm:$0xff] }
 0x23b   :  { %1096 = vadd.xlane.f32.xlu1 %v998_v16  ;;  %v1006_v20 = vsel %vm4938_vm9, %v2182_v3, 0.0  ;;  %v961_v25 = vsub.f32 %v3565_v9, %v936_v48  ;;  %2193 = vpow2.f32 %v988_v42  ;;  %v1191_v38 = vmul.f32 %v998_v16, %v3400_v8  ;;  %v1444_v5 = vpop.permute.xlu0 %1443 }
 0x23c   :  { %v1200_v8 = vmul.f32 %v1007_v54, %v3314_v13  ;;  %v1199_v59 = vmul.f32 %v1006_v20, %v3196_v19  ;;  %v1473_v51 = vsub.f32 %v3480_v53, %v1444_v5 }
 0x23d   :  { %v990_v37 = vmul.f32 1.442695, %v961_v25  ;;  %v2184_v56 = vpop.eup %2183  ;;  %v4952_v25 = vld [vmem:[#allocation12_spill] sm:$0xff] }
 0x23e   :  { %v1394_v45 = vpop.permute.xlu1 %1393  ;;  %1719 = vadd.xlane.f32.xlu0 %v1702_v18  ;;  %v2186_v58 = vpop.eup %2185  ;;  %v1501_v31 = vmul.f32 1.442695, %v1473_v51 }
 0x23f   :  { %1112 = vadd.xlane.f32.xlu1 %v1006_v20  ;;  %v1463_v27 = vsub.f32 %v3257_v43, %v1394_v45  ;;  %2195 = vpow2.f32 %v990_v37  ;;  %v1512_v43 = vsel %vm4939_vm11, %v2184_v56, 0.0  ;;  %v1519_v52 = vsel %vm4940_vm0, %v2186_v58, 0.0  ;;  %v901_v54 = vpop.permute.xlu0 %900  ;;  %v4954_v58 = vld [vmem:[#allocation16_spill] sm:$0xff] }
 0x240   :  { %v954_v16 = vsub.f32 %v3524_v28, %v901_v54  ;;  %v1704_v18 = vmul.f32 %v1512_v43, %v4950_v33  ;;  %v1711_v20 = vmul.f32 %v1519_v52, %v4951_v21 }
 0x241   :  { %v1481_v23 = vmul.f32 1.442695, %v1463_v27 }
 0x242   :  { %1735 = vadd.xlane.f32.xlu0 %v1710_v60  ;;  %v2188_v6 = vpop.eup %2187  ;;  %v1409_v15 = vpop.permute.xlu1 %1408  ;;  %v976_v45 = vmul.f32 1.442695, %v954_v16 }
 0x243   :  { %1717 = vadd.xlane.f32.xlu1 %v1701_v50  ;;  %2197 = vpow2.f32 %v1481_v23  ;;  %v1520_v30 = vsel %vm4941_vm3, %v2188_v6, 0.0  ;;  %v2190_v10 = vpop.eup %2189  ;;  %v1466_v61 = vsub.f32 %v3596_v11, %v1409_v15  ;;  %v4946_v11 = vld [vmem:[#allocation11_spill] sm:$0xff]  ;;  %v941_v3 = vpop.permute.xlu0 %940 }
 0x244   :  { %v1000_v57 = vsel %vm4942_vm8, %v2190_v10, 0.0  ;;  %2199 = vpow2.f32 %v1485_v29  ;;  %vm4947_vm13 = vnez %v4946_v11  ;;  %v1712_v50 = vmul.f32 %v1520_v30, %v4952_v25  ;;  %v4960_v10 = vld [vmem:[#allocation30_spill] sm:$0xff]  ;;  %v4961_v29 = vld [vmem:[#allocation37_spill] sm:$0xff] }
 0x245   :  { %v1487_v53 = vmul.f32 1.442695, %v1466_v61  ;;  %2201 = vpow2.f32 %v1501_v31  ;;  %v1193_v36 = vmul.f32 %v1000_v57, %v3359_v44 }
 0x246   :  { %1211 = vadd.xlane.f32.xlu0 %v1192_v62  ;;  %v1449_v22 = vpop.permute.xlu1 %1448 }
 0x247   :  { %1733 = vadd.xlane.f32.xlu1 %v1709_v24  ;;  %v2192_v39 = vpop.eup %2191  ;;  %v1474_v63 = vsub.f32 %v3629_v55, %v1449_v22  ;;  %2203 = vpow2.f32 %v1487_v53  ;;  %v4949_v55 = vld [vmem:[#allocation24_spill] sm:$0xff]  ;;  %v4953_v24 = vld [vmem:[#allocation35_spill] sm:$0xff]  ;;  %v1414_v37 = vpop.permute.xlu0 %1413 }
 0x248   :  { %v2194_v40 = vpop.eup %2193  ;;  %v1001_v13 = vsel %vm4943_vm7, %v2192_v39, 0.0  ;;  %v962_v46 = vsub.f32 %v4949_v55, %v941_v3  ;;  %v4971_v3 = vld [vmem:[#allocation34_spill] sm:$0xff] }
 0x249   :  { %v1008_v41 = vsel %vm4945_vm12, %v2194_v40, 0.0  ;;  %v1503_v17 = vmul.f32 1.442695, %v1474_v63  ;;  %v1194_v23 = vmul.f32 %v1001_v13, %v3519_v2  ;;  %v4964_v63 = vld [vmem:[#allocation20_spill] sm:$0xff]  ;;  %vm4972_vm5 = vnez %v4971_v3 }
 0x24a   :  { %1611 = vadd.xlane.f32.xlu0 %v1512_v43  ;;  %v906_v48 = vpop.permute.xlu1 %905  ;;  %v992_v60 = vmul.f32 1.442695, %v962_v46  ;;  %v1201_v39 = vmul.f32 %v1008_v41, %v3405_v32  ;;  %v4973_v46 = vld [vmem:[#allocation14_spill] sm:$0xff] }
 0x24b   :  { %1209 = vadd.xlane.f32.xlu1 %v1191_v38  ;;  %2205 = vpow2.f32 %v1503_v17  ;;  %v955_v7 = vsub.f32 %v3656_v4, %v906_v48 }
 0x24c   :  { %v2196_v0 = vpop.eup %2195  ;;  %2207 = vpow2.f32 %v976_v45  ;;  %v4975_v45 = vld [vmem:[#allocation21_spill] sm:$0xff] }
 0x24d   :  { %v1009_v34 = vsel %vm3544_vm2, %v2196_v0, 0.0  ;;  %v978_v42 = vmul.f32 1.442695, %v955_v7  ;;  %2209 = vpow2.f32 %v992_v60  ;;  %vm4955_vm2 = vnez %v4954_v58  ;;  %v4976_v60 = vld [vmem:[#allocation26_spill] sm:$0xff]  ;;  %v4982_v58 = vld [vmem:[#allocation40_spill] sm:$0xff] }
 0x24e   :  { %1627 = vadd.xlane.f32.xlu0 %v1520_v30  ;;  %v946_v14 = vpop.permute.xlu1 %945  ;;  %v1454_v30 = vpop.permute.xlu0 %1453  ;;  %v1202_v22 = vmul.f32 %v1009_v34, %v3565_v9  ;;  %vm4977_vm9 = vnez %v4976_v60  ;;  %v4995_v0 = vld [vmem:[#allocation22_spill] sm:$0xff]  ;;  %v1068_v60 = vld [vmem:[#allocation3 + $0x40] sm:$0xff] }
 0x24f   :  { %1625 = vadd.xlane.f32.xlu1 %v1519_v52  ;;  %v963_v62 = vsub.f32 %v4953_v24, %v946_v14  ;;  %2211 = vpow2.f32 %v978_v42  ;;  %v1467_v52 = vsub.f32 %v4956_v1, %v1414_v37  ;;  %v1475_v5 = vsub.f32 %v4960_v10, %v1454_v30  ;;  %v4985_v30 = vld [vmem:[#allocation41_spill] sm:$0xff]  ;;  %v4989_v10 = vld [vmem:[#allocation44_spill] sm:$0xff] }
 0x250   :  { %v2198_v19 = vpop.eup %2197 }
 0x251   :  { %v1511_v26 = vsel %vm4947_vm13, %v2198_v19, 0.0  ;;  %v2200_v27 = vpop.eup %2199  ;;  %v994_v38 = vmul.f32 1.442695, %v963_v62  ;;  %v1489_v40 = vmul.f32 1.442695, %v1467_v52 }
 0x252   :  { %1227 = vadd.xlane.f32.xlu0 %v1200_v8  ;;  %v1703_v49 = vmul.f32 %v1511_v26, %v4948_v35  ;;  %v2202_v56 = vpop.eup %2201  ;;  %v1513_v43 = vsel %vm4955_vm2, %v2200_v27, 0.0  ;;  %v1419_v44 = vpop.permute.xlu1 %1418  ;;  %v1505_v19 = vmul.f32 1.442695, %v1475_v5  ;;  %v4968_v35 = vld [vmem:[#allocation32_spill] sm:$0xff]  ;;  %v4990_v5 = vld [vmem:[#allocation46_spill] sm:$0xff] }
 0x253   :  { %1225 = vadd.xlane.f32.xlu1 %v1199_v59  ;;  %2213 = vpow2.f32 %v994_v38  ;;  %v1521_v8 = vsel %vm4958_vm4, %v2202_v56, 0.0  ;;  %v1468_v51 = vsub.f32 %v4961_v29, %v1419_v44  ;;  %vm4969_vm1 = vnez %v4968_v35  ;;  %v4992_v29 = vld [vmem:[#allocation45_spill] sm:$0xff] }
 0x254   :  { %v2204_v6 = vpop.eup %2203  ;;  %2215 = vpow2.f32 %v1489_v40  ;;  %v1713_v33 = vmul.f32 %v1521_v8, %v4973_v46 }
 0x255   :  { %v1514_v2 = vsel %vm3580_vm15, %v2204_v6, 0.0  ;;  %v1491_v31 = vmul.f32 1.442695, %v1468_v51  ;;  %vm4965_vm15 = vnez %v4964_v63  ;;  %2217 = vpow2.f32 %v1505_v19  ;;  %v4997_v19 = vld [vmem:[#allocation49_spill] sm:$0xff]  ;;  %v5002_v63 = vld [vmem:[#allocation55_spill] sm:$0xff] }
 0x256   :  { %1102 = vadd.xlane.f32.xlu0 %v1001_v13  ;;  %v1459_v13 = vpop.permute.xlu1 %1458 }
 0x257   :  { %1100 = vadd.xlane.f32.xlu1 %v1000_v57  ;;  %v1476_v53 = vsub.f32 %v4963_v12, %v1459_v13  ;;  %2219 = vpow2.f32 %v1491_v31  ;;  %v5000_v31 = vld [vmem:[#allocation33_spill] sm:$0xff] }
 0x258   :  { %v2206_v15 = vpop.eup %2205 }
 0x259   :  { %v1522_v61 = vsel %vm3612_vm6, %v2206_v15, 0.0  ;;  %v2208_v57 = vpop.eup %2207  ;;  %v1507_v11 = vmul.f32 1.442695, %v1476_v53  ;;  %v5001_v53 = vld [vmem:[#allocation53_spill] sm:$0xff] }
 0x25a   :  { %1118 = vadd.xlane.f32.xlu0 %v1009_v34  ;;  %v2210_v54 = vpop.eup %2209  ;;  %v1002_v32 = vsel %vm4965_vm15, %v2208_v57, 0.0  ;;  %v1714_v7 = vmul.f32 %v1522_v61, %v4975_v45  ;;  %v4996_v57 = vld [vmem:[#allocation31_spill] sm:$0xff] }
 0x25b   :  { %1116 = vadd.xlane.f32.xlu1 %v1008_v41  ;;  %2221 = vpow2.f32 %v1507_v11 }
 0x25c   :  { %v2212_v41 = vpop.eup %2211 }
 0x25d   :  { %v1003_v9 = vsel %vm4969_vm1, %v2212_v41, 0.0 }
 0x25e   :  { %1609 = vadd.xlane.f32.xlu0 %v1511_v26  ;;  %v4966_v26 = vld [vmem:[#allocation23_spill] sm:$0xff]  ;;  %v1196_v52 = vmul.f32 %v1003_v9, %v3656_v4 }
 0x25f   :  { %1721 = vadd.xlane.f32.xlu1 %v1703_v49  ;;  %vm4967_vm6 = vnez %v4966_v26  ;;  %v4970_v49 = vld [vmem:[#allocation13_spill] sm:$0xff]  ;;  %v5004_v26 = vld [vmem:[#allocation48_spill] sm:$0xff] }
 0x260   :  { %v1010_v48 = vsel %vm4967_vm6, %v2210_v54, 0.0  ;;  %v2214_v34 = vpop.eup %2213  ;;  %v1705_v16 = vmul.f32 %v1513_v43, %v4970_v49 }
 0x261   :  { %v1011_v17 = vsel %vm4972_vm5, %v2214_v34, 0.0  ;;  %v1203_v1 = vmul.f32 %v1010_v48, %v4949_v55  ;;  %v4993_v55 = vld [vmem:[#allocation47_spill] sm:$0xff]  ;;  %v1069_v34 = vld [vmem:[#allocation3 + $0x48] sm:$0xff] }
 0x262   :  { %1723 = vadd.xlane.f32.xlu0 %v1704_v18  ;;  %v4974_v18 = vld [vmem:[#allocation18_spill] sm:$0xff]  ;;  %v4994_v51 = vsub.f32 %v4992_v29, %v4993_v55  ;;  %v1157_v29 = vld [vmem:[#allocation4] sm:$0xff] }
 0x263   :  { %1737 = vadd.xlane.f32.xlu1 %v1711_v20  ;;  %v1706_v21 = vmul.f32 %v1514_v2, %v4974_v18  ;;  %v2216_v20 = vpop.eup %2215  ;;  %v5007_v18 = vld [vmem:[#allocation56_spill] sm:$0xff] }
 0x264   :  { %v2218_v14 = vpop.eup %2217  ;;  %v1515_v25 = vsel %vm4977_vm9, %v2216_v20, 0.0  ;;  %v1028_v4 = vmul.f32 1.442695, %v4994_v51 }
 0x266   :  { %1739 = vadd.xlane.f32.xlu0 %v1712_v50  ;;  %v2220_v50 = vpop.eup %2219 }
 0x267   :  { %1213 = vadd.xlane.f32.xlu1 %v1193_v36  ;;  %v4978_v36 = vld [vmem:[#allocation29_spill] sm:$0xff]  ;;  %v1516_v62 = vsel %vm3681_vm10, %v2220_v50, 0.0 }
 0x268   :  { %vm4979_vm11 = vnez %v4978_v36  ;;  %v2222_v37 = vpop.eup %2221  ;;  %v1708_v13 = vmul.f32 %v1516_v62, %v4996_v57  ;;  %v1060_v36 = vld [vmem:[#allocation3] sm:$0xff] }
 0x269   :  { %v1523_v27 = vsel %vm4979_vm11, %v2218_v14, 0.0  ;;  %v1524_v38 = vsel %vm3694_vm14, %v2222_v37, 0.0  ;;  %vm5010_vm14 = vcmask 7168   ;;  %v5013_v37 = vld [vmem:[#allocation62_spill] sm:$0xff] }
 0x26a   :  { %1215 = vadd.xlane.f32.xlu0 %v1194_v23  ;;  %v1195_v23 = vmul.f32 %v1002_v32, %v3524_v28  ;;  %v1204_v28 = vmul.f32 %v1011_v17, %v4953_v24  ;;  %v4998_v24 = vld [vmem:[#allocation51_spill] sm:$0xff]  ;;  %v1716_v12 = vmul.f32 %v1524_v38, %v5000_v31  ;;  %vm5011_vm10 = vmmov %vm5010_vm14  ;;  %v5024_v31 = vld [vmem:[#allocation52_spill] sm:$0xff] }
 0x26b   :  { %1613 = vadd.xlane.f32.xlu1 %v1513_v43  ;;  %v4983_v43 = vld [vmem:[#allocation42_spill] sm:$0xff]  ;;  %vm5021_vm0 = vmmov %vm5011_vm10 }
 0x26c   :  { %v4984_v6 = vsub.f32 %v4982_v58, %v4983_v43  ;;  %v1574_v43 = vld [vmem:[#allocation6 + $0x8] sm:$0xff]  ;;  %vm5022_vm3 = vmmov %vm5021_vm0 }
 0x26d   :  { %vm5023_vm8 = vmmov %vm5021_vm0 }
 0x26e   :  { %1615 = vadd.xlane.f32.xlu0 %v1514_v2  ;;  %v1046_v44 = vmul.f32 1.442695, %v4984_v6  ;;  %v4988_v2 = vld [vmem:[#allocation19_spill] sm:$0xff]  ;;  %vm5027_vm7 = vmmov %vm5021_vm0 }
 0x26f   :  { %1629 = vadd.xlane.f32.xlu1 %v1521_v8  ;;  %v4987_v8 = vsub.f32 %v4985_v30, %v4986_v47  ;;  %v1707_v15 = vmul.f32 %v1515_v25, %v4988_v2  ;;  %v5016_v30 = vld [vmem:[#allocation66_spill] sm:$0xff]  ;;  %vm5028_vm12 = vmmov %vm5021_vm0 }
 0x270   :  { %2223 = vpow2.f32 %v1046_v44  ;;  %v5019_v2 = vld [vmem:[#allocation70_spill] sm:$0xff]  ;;  %vm5029_vm13 = vmmov %vm5021_vm0 }
 0x271   :  { %v1030_v59 = vmul.f32 1.442695, %v4987_v8  ;;  %vm5030_vm2 = vmmov %vm5021_vm0 }
 0x272   :  { %1631 = vadd.xlane.f32.xlu0 %v1522_v61  ;;  %v1715_v61 = vmul.f32 %v1523_v27, %v4995_v0  ;;  %vm5031_vm4 = vmmov %vm5021_vm0 }
 0x273   :  { %1229 = vadd.xlane.f32.xlu1 %v1201_v39  ;;  %2225 = vpow2.f32 %v1030_v59  ;;  %v4991_v39 = vsub.f32 %v4989_v10, %v4990_v5  ;;  %vm5035_vm15 = vmmov %vm5021_vm0 }
 0x274   :  { %vm5036_vm6 = vmmov %vm5021_vm0 }
 0x275   :  { %v1044_v40 = vmul.f32 1.442695, %v4991_v39  ;;  %vm5043_vm1 = vmmov %vm5021_vm0 }
 0x276   :  { %1231 = vadd.xlane.f32.xlu0 %v1202_v22  ;;  %v4999_v22 = vsub.f32 %v4997_v19, %v4998_v24  ;;  %vm5044_vm5 = vmmov %vm5021_vm0 }
 0x277   :  { %1104 = vadd.xlane.f32.xlu1 %v1002_v32  ;;  %2227 = vpow2.f32 %v1044_v40  ;;  %v5003_v32 = vsub.f32 %v5001_v53, %v5002_v63  ;;  %vm5045_vm9 = vmmov %vm5021_vm0 }
 0x278   :  { %v1543_v54 = vmul.f32 1.442695, %v4999_v22  ;;  %2229 = vpow2.f32 %v1028_v4  ;;  %vm5046_vm11 = vmmov %vm5021_vm0 }
 0x279   :  { %v1559_v41 = vmul.f32 1.442695, %v5003_v32 }
 0x27a   :  { %1106 = vadd.xlane.f32.xlu0 %v1003_v9  ;;  %2231 = vpow2.f32 %v1543_v54 }
 0x27b   :  { %1120 = vadd.xlane.f32.xlu1 %v1010_v48  ;;  %v5005_v48 = vld [vmem:[#allocation50_spill] sm:$0xff]  ;;  %2233 = vpow2.f32 %v1559_v41 }
 0x27c   :  { %v5006_v35 = vsub.f32 %v5004_v26, %v5005_v48  ;;  %v1581_v26 = vld [vmem:[#allocation6 + $0x40] sm:$0xff] }
 0x27d   :  { %v4169_v11 = vpop.eup %2223 }
 0x27e   :  { %1122 = vadd.xlane.f32.xlu0 %v1011_v17  ;;  %v1557_v9 = vmul.f32 1.442695, %v5006_v35  ;;  %v1085_v3 = vmul.f32 %v4169_v11, %v1069_v34 }
 0x27f   :  { %1725 = vadd.xlane.f32.xlu1 %v1705_v16  ;;  %v1061_v16 = vld [vmem:[#allocation3 + $0x8] sm:$0xff] }
 0x280   :  { %v2226_v49 = vpop.eup %2225  ;;  %2235 = vpow2.f32 %v1557_v9  ;;  %v1166_v9 = vld [vmem:[#allocation4 + $0x48] sm:$0xff] }
 0x281   :  { %v1077_v46 = vmul.f32 %v2226_v49, %v1061_v16 }
 0x282   :  { %1727 = vadd.xlane.f32.xlu0 %v1706_v21  ;;  %v5008_v21 = vld [vmem:[#allocation58_spill] sm:$0xff] }
 0x283   :  { %1741 = vadd.xlane.f32.xlu1 %v1713_v33  ;;  %v5009_v20 = vsub.f32 %v5007_v18, %v5008_v21  ;;  %v1182_v18 = vmul.f32 %v4169_v11, %v1166_v9 }
 0x284   :  { %v4175_v33 = vpop.eup %2227 }
 0x285   :  { %v1034_v45 = vmul.f32 1.442695, %v5009_v20  ;;  %v1165_v20 = vld [vmem:[#allocation4 + $0x40] sm:$0xff] }
 0x286   :  { %1743 = vadd.xlane.f32.xlu0 %v1714_v7 }
 0x287   :  { %1617 = vadd.xlane.f32.xlu1 %v1515_v25  ;;  %v2230_v25 = vpop.eup %2229  ;;  %2237 = vpow2.f32 %v1034_v45 }
 0x288   :  { %v4183_v42 = vpop.eup %2231  ;;  %v1173_v22 = vmul.f32 %v2230_v25, %v1157_v29 }
 0x289   :  { %v1590_v5 = vmul.f32 %v4183_v42, %v1574_v43  ;;  %v4197_v55 = vpop.eup %2233  ;;  %v5033_v43 = vld [vmem:[#allocation74_spill] sm:$0xff] }
 0x28a   :  { %1619 = vadd.xlane.f32.xlu0 %v1516_v62  ;;  %v5012_v62 = vld [vmem:[#allocation60_spill] sm:$0xff] }
 0x28b   :  { %1633 = vadd.xlane.f32.xlu1 %v1523_v27  ;;  %v1084_v27 = vmul.f32 %v4175_v33, %v1068_v60  ;;  %v1063_v60 = vld [vmem:[#allocation3 + $0x18] sm:$0xff] }
 0x28d   :  { %v4200_v54 = vpop.eup %2235 }
 0x28e   :  { %1635 = vadd.xlane.f32.xlu0 %v1524_v38  ;;  %v1076_v38 = vmul.f32 %v2230_v25, %v1060_v36 }
 0x28f   :  { %1217 = vadd.xlane.f32.xlu1 %v1195_v23  ;;  %v5014_v23 = vsub.f32 %v5012_v62, %v5013_v37 }
 0x291   :  { %v1050_v56 = vmul.f32 1.442695, %v5014_v23  ;;  %v1071_v23 = vld [vmem:[#allocation3 + $0x58] sm:$0xff] }
 0x292   :  { %1219 = vadd.xlane.f32.xlu0 %v1196_v52  ;;  %v5015_v52 = vld [vmem:[#allocation64_spill] sm:$0xff] }
 0x293   :  { %1233 = vadd.xlane.f32.xlu1 %v1203_v1  ;;  %v1158_v1 = vld [vmem:[#allocation4 + $0x8] sm:$0xff]  ;;  %v5017_v47 = vsub.f32 %v5015_v52, %v5016_v30  ;;  %2239 = vpow2.f32 %v1050_v56 }
 0x294   :  { %v1174_v39 = vmul.f32 %v2226_v49, %v1158_v1  ;;  %v4211_v45 = vpop.eup %2237 }
 0x295   :  { %v1541_v8 = vmul.f32 1.442695, %v5017_v47  ;;  %v1079_v36 = vmul.f32 %v4211_v45, %v1063_v60 }
 0x296   :  { %1235 = vadd.xlane.f32.xlu0 %v1204_v28  ;;  %v5018_v28 = vld [vmem:[#allocation68_spill] sm:$0xff] }
 0x297   :  { %1729 = vadd.xlane.f32.xlu1 %v1707_v15  ;;  %v5020_v15 = vsub.f32 %v5018_v28, %v5019_v2  ;;  %2241 = vpow2.f32 %v1541_v8  ;;  %v1573_v8 = vld [vmem:[#allocation6] sm:$0xff] }
 0x299   :  { %v1032_v10 = vmul.f32 1.442695, %v5020_v15 }
 0x29a   :  { %1731 = vadd.xlane.f32.xlu0 %v1708_v13 }
 0x29b   :  { %1745 = vadd.xlane.f32.xlu1 %v1715_v61  ;;  %v1582_v61 = vld [vmem:[#allocation6 + $0x48] sm:$0xff]  ;;  %2243 = vpow2.f32 %v1032_v10 }
 0x29c   :  { %v1598_v32 = vmul.f32 %v4197_v55, %v1582_v61  ;;  %v5040_v61 = vld [vmem:[#allocation76_spill] sm:$0xff] }
 0x29e   :  { %1747 = vadd.xlane.f32.xlu0 %v1716_v12  ;;  %v5025_v12 = vld [vmem:[#allocation54_spill] sm:$0xff] }
 0x29f   :  { %v5026_v53 = vsub.f32 %v5024_v31, %v5025_v12 }
 0x2a0   :  { %v4217_v11 = vpop.eup %2239 }
 0x2a1   :  { %v1048_v63 = vmul.f32 1.442695, %v5026_v53  ;;  %v1087_v52 = vmul.f32 %v4217_v11, %v1071_v23 }
 0x2a6   :  { %v1111_v17 = vpop.xlane.xlu0 %1110 }
 0x2a7   :  { %v1133_v7 = vadd.f32 %v1111_v17, %v1085_v3  ;;  %v1095_v14 = vpop.xlane.xlu1 %1094  ;;  %v1597_v17 = vmul.f32 %v4200_v54, %v1581_v26 }
 0x2a8   :  { %v1125_v50 = vadd.f32 %v1095_v14, %v1077_v46 }
 0x2a9   :  { %1150 = vst.msk [vmem:[#allocation3 + $0x48] sm:$0xff] %vm5010_vm14, %v1133_v7  ;;  %vm5047_vm14 = vmmov %vm5021_vm0 }
 0x2aa   :  { %1142 = vst.msk [vmem:[#allocation3 + $0x8] sm:$0xff] %vm5011_vm10, %v1125_v50  ;;  %v1181_v50 = vmul.f32 %v4175_v33, %v1165_v20  ;;  %vm5048_vm10 = vmmov %vm5021_vm0 }
 0x2ab   :  { %v1109_v58 = vpop.xlane.xlu1 %1108  ;;  %v1093_v6 = vpop.xlane.xlu0 %1092 }
 0x2ac   :  { %v1132_v44 = vadd.f32 %v1109_v58, %v1084_v27  ;;  %v1124_v59 = vadd.f32 %v1093_v6, %v1076_v38  ;;  %v4219_v38 = vpop.eup %2241  ;;  %v5032_v58 = vld [vmem:[#allocation72_spill] sm:$0xff] }
 0x2ad   :  { %v5034_v6 = vsub.f32 %v5032_v58, %v5033_v43  ;;  %v4225_v33 = vpop.eup %2243  ;;  %v5052_v58 = vld [vmem:[#allocation80_spill] sm:$0xff]  ;;  %v5053_v43 = vld [vmem:[#allocation82_spill] sm:$0xff] }
 0x2ae   :  { %1149 = vst.msk [vmem:[#allocation3 + $0x40] sm:$0xff] %vm5021_vm0, %v1132_v44 }
 0x2af   :  { %1141 = vst.msk [vmem:[#allocation3] sm:$0xff] %vm5022_vm3, %v1124_v59  ;;  %v1608_v40 = vpop.xlane.xlu1 %1607  ;;  %v1208_v4 = vpop.xlane.xlu0 %1207  ;;  %v1547_v44 = vmul.f32 1.442695, %v5034_v6  ;;  %v1062_v59 = vld [vmem:[#allocation3 + $0x10] sm:$0xff]  ;;  %v5054_v6 = vsub.f32 %v5052_v58, %v5053_v43  ;;  %vm5055_vm3 = vmmov %vm5021_vm0 }
 0x2b0   :  { %v1825_v51 = vld [vmem:[#allocation3 + $0x48] sm:$0xff]  ;;  %v1638_v0 = vadd.f32 %v1608_v40, %v1590_v5  ;;  %v1238_v19 = vadd.f32 %v1208_v4, %v1174_v39  ;;  %v5038_v39 = vld [vmem:[#allocation63_spill] sm:$0xff]  ;;  %v1078_v31 = vmul.f32 %v4225_v33, %v1062_v59  ;;  %v1167_v58 = vld [vmem:[#allocation4 + $0x50] sm:$0xff] }
 0x2b1   :  { %v1841_v57 = vadd.f32 1e-06, %v1825_v51  ;;  %v1817_v13 = vld [vmem:[#allocation3 + $0x8] sm:$0xff]  ;;  %v5058_v59 = vld [vmem:[#allocation71_spill] sm:$0xff] }
 0x2b2   :  { %v1833_v24 = vadd.f32 1e-06, %v1817_v13  ;;  %1654 = vst.msk [vmem:[#allocation6 + $0x8] sm:$0xff] %vm5023_vm8, %v1638_v0  ;;  %v5037_v5 = vld [vmem:[#allocation61_spill] sm:$0xff]  ;;  %vm5056_vm8 = vmmov %vm5021_vm0 }
 0x2b3   :  { %2245 = vrcp.f32 %v1841_v57  ;;  %1254 = vst.msk [vmem:[#allocation4 + $0x8] sm:$0xff] %vm5027_vm7, %v1238_v19  ;;  %v1206_v41 = vpop.xlane.xlu1 %1205  ;;  %v1624_v48 = vpop.xlane.xlu0 %1623  ;;  %v5039_v40 = vsub.f32 %v5037_v5, %v5038_v39  ;;  %v5041_v57 = vld [vmem:[#allocation78_spill] sm:$0xff]  ;;  %vm5063_vm7 = vmmov %vm5021_vm0 }
 0x2b4   :  { %2247 = vrcp.f32 %v1833_v24  ;;  %v1237_v35 = vadd.f32 %v1206_v41, %v1173_v22  ;;  %v1646_v49 = vadd.f32 %v1624_v48, %v1598_v32  ;;  %v5042_v13 = vsub.f32 %v5040_v61, %v5041_v57  ;;  %v1670_v32 = vld [vmem:[#allocation7 + $0x8] sm:$0xff]  ;;  %v1070_v41 = vld [vmem:[#allocation3 + $0x50] sm:$0xff] }
 0x2b5   :  { %v1824_v34 = vld [vmem:[#allocation3 + $0x40] sm:$0xff]  ;;  %2249 = vpow2.f32 %v1048_v63  ;;  %v1561_v29 = vmul.f32 1.442695, %v5039_v40  ;;  %v1589_v22 = vmul.f32 %v4219_v38, %v1573_v8  ;;  %v5057_v8 = vld [vmem:[#allocation69_spill] sm:$0xff] }
 0x2b6   :  { %v1816_v16 = vld [vmem:[#allocation3] sm:$0xff]  ;;  %v1840_v3 = vadd.f32 1e-06, %v1824_v34  ;;  %1253 = vst.msk [vmem:[#allocation4] sm:$0xff] %vm5028_vm12, %v1237_v35  ;;  %v1563_v19 = vmul.f32 1.442695, %v5042_v13  ;;  %vm5064_vm12 = vmmov %vm5021_vm0 }
 0x2b7   :  { %v1832_v46 = vadd.f32 1e-06, %v1816_v16  ;;  %1662 = vst.msk [vmem:[#allocation6 + $0x48] sm:$0xff] %vm5029_vm13, %v1646_v49  ;;  %v1622_v21 = vpop.xlane.xlu1 %1621  ;;  %v1224_v7 = vpop.xlane.xlu0 %1223  ;;  %vm5068_vm13 = vmmov %vm5021_vm0 }
 0x2b8   :  { %2251 = vrcp.f32 %v1840_v3  ;;  %v1645_v14 = vadd.f32 %v1622_v21, %v1597_v17  ;;  %v1246_v25 = vadd.f32 %v1224_v7, %v1182_v18  ;;  %v1686_v21 = vmul.f32 %v4183_v42, %v1670_v32 }
 0x2b9   :  { %2253 = vrcp.f32 %v1832_v46  ;;  %v1913_v1 = vld [vmem:[#allocation6 + $0x8] sm:$0xff] }
 0x2ba   :  { %1661 = vst.msk [vmem:[#allocation6 + $0x40] sm:$0xff] %vm5030_vm2, %v1645_v14  ;;  %v1801_v2 = vld [vmem:[#allocation4 + $0x8] sm:$0xff]  ;;  %v1929_v15 = vadd.f32 1e-06, %v1913_v1  ;;  %2255 = vpow2.f32 %v1547_v44  ;;  %v1038_v44 = vmul.f32 1.442695, %v5054_v6  ;;  %vm5069_vm2 = vmmov %vm5021_vm0 }
 0x2bb   :  { %1262 = vst.msk [vmem:[#allocation4 + $0x48] sm:$0xff] %vm5031_vm4, %v1246_v25  ;;  %v1222_v27 = vpop.xlane.xlu1 %1221  ;;  %v1099_v62 = vpop.xlane.xlu0 %1098  ;;  %v1678_v25 = vld [vmem:[#allocation7 + $0x48] sm:$0xff]  ;;  %vm5070_vm4 = vmmov %vm5021_vm0 }
 0x2bc   :  { %v1245_v37 = vadd.f32 %v1222_v27, %v1181_v50  ;;  %v1127_v56 = vadd.f32 %v1099_v62, %v1079_v36  ;;  %2257 = vrcp.f32 %v1929_v15  ;;  %v1669_v50 = vld [vmem:[#allocation7] sm:$0xff]  ;;  %v5049_v62 = vld [vmem:[#allocation65_spill] sm:$0xff]  ;;  %v1694_v1 = vmul.f32 %v4197_v55, %v1678_v25 }
 0x2bd   :  { %2259 = vpow2.f32 %v1561_v29  ;;  %v1800_v3 = vld [vmem:[#allocation4] sm:$0xff] }
 0x2be   :  { %1261 = vst.msk [vmem:[#allocation4 + $0x40] sm:$0xff] %vm5035_vm15, %v1245_v37  ;;  %v1921_v4 = vld [vmem:[#allocation6 + $0x48] sm:$0xff]  ;;  %2261 = vpow2.f32 %v1563_v19  ;;  %v5050_v37 = vld [vmem:[#allocation67_spill] sm:$0xff]  ;;  %vm5071_vm15 = vmmov %vm5021_vm0 }
 0x2bf   :  { %1144 = vst.msk [vmem:[#allocation3 + $0x18] sm:$0xff] %vm5036_vm6, %v1127_v56  ;;  %v1115_v47 = vpop.xlane.xlu0 %1114  ;;  %v1937_v48 = vadd.f32 1e-06, %v1921_v4  ;;  %v5051_v23 = vsub.f32 %v5049_v62, %v5050_v37  ;;  %v5060_v4 = vld [vmem:[#allocation84_spill] sm:$0xff]  ;;  %vm5072_vm6 = vmmov %vm5021_vm0 }
 0x2c0   :  { %v2246_v30 = vpop.eup %2245  ;;  %v1135_v10 = vadd.f32 %v1115_v47, %v1087_v52  ;;  %v1685_v52 = vmul.f32 %v4219_v38, %v1669_v50  ;;  %v1677_v47 = vld [vmem:[#allocation7 + $0x40] sm:$0xff] }
 0x2c1   :  { %v2248_v28 = vpop.eup %2247  ;;  %v1920_v35 = vld [vmem:[#allocation6 + $0x40] sm:$0xff]  ;;  %2263 = vrcp.f32 %v1937_v48  ;;  %v1036_v56 = vmul.f32 1.442695, %v5051_v23  ;;  %v1693_v55 = vmul.f32 %v4200_v54, %v1677_v47 }
 0x2c2   :  { %v1851_v51 = vmul.f32 %v2248_v28, %v1801_v2  ;;  %v1809_v0 = vld [vmem:[#allocation4 + $0x48] sm:$0xff]  ;;  %1152 = vst.msk [vmem:[#allocation3 + $0x58] sm:$0xff] %vm5043_vm1, %v1135_v10  ;;  %v4238_v12 = vpop.eup %2249  ;;  %v1936_v7 = vadd.f32 1e-06, %v1920_v35  ;;  %v5059_v28 = vsub.f32 %v5057_v8, %v5058_v59  ;;  %vm5073_vm1 = vmmov %vm5021_vm0 }
 0x2c3   :  { %v1867_v24 = vmul.f32 %v2246_v30, %v1809_v0  ;;  %v1606_v53 = vpop.xlane.xlu0 %1605  ;;  %v1086_v20 = vmul.f32 %v4238_v12, %v1070_v41  ;;  %v1160_v30 = vld [vmem:[#allocation4 + $0x18] sm:$0xff]  ;;  %v5061_v0 = vld [vmem:[#allocation86_spill] sm:$0xff]  ;;  %v5065_v41 = vld [vmem:[#allocation57_spill] sm:$0xff] }
 0x2c4   :  { %1881 = vst.msk [vmem:[%s4561_s6 + $0x8] sm:$0xff] %vm5044_vm5, %v1851_v51  ;;  %v1097_v63 = vpop.xlane.xlu1 %1096  ;;  %v1637_v34 = vadd.f32 %v1606_v53, %v1589_v22  ;;  %v1052_v2 = vmul.f32 1.442695, %v5059_v28  ;;  %2265 = vrcp.f32 %v1936_v7  ;;  %v1176_v51 = vmul.f32 %v4211_v45, %v1160_v30  ;;  %v1159_v45 = vld [vmem:[#allocation4 + $0x10] sm:$0xff]  ;;  %v1584_v7 = vld [vmem:[#allocation6 + $0x58] sm:$0xff]  ;;  %vm5074_vm5 = vmmov %vm5021_vm0 }
 0x2c5   :  { %v2252_v26 = vpop.eup %2251  ;;  %1889 = vst.msk [vmem:[%s4561_s6 + $0x48] sm:$0xff] %vm5045_vm9, %v1867_v24  ;;  %v1808_v9 = vld [vmem:[#allocation4 + $0x40] sm:$0xff]  ;;  %v1126_v49 = vadd.f32 %v1097_v63, %v1078_v31  ;;  %v5062_v61 = vsub.f32 %v5060_v4, %v5061_v0  ;;  %v1576_v31 = vld [vmem:[#allocation6 + $0x18] sm:$0xff]  ;;  %vm5075_vm9 = vmmov %vm5021_vm0 }
 0x2c6   :  { %v2254_v16 = vpop.eup %2253  ;;  %v1819_v17 = vld [vmem:[#allocation3 + $0x18] sm:$0xff]  ;;  %v1865_v46 = vmul.f32 %v2252_v26, %v1808_v9  ;;  %1653 = vst.msk [vmem:[#allocation6] sm:$0xff] %vm5046_vm11, %v1637_v34  ;;  %vm5076_vm11 = vmmov %vm5021_vm0 }
 0x2c7   :  { %v1849_v18 = vmul.f32 %v2254_v16, %v1800_v3  ;;  %1143 = vst.msk [vmem:[#allocation3 + $0x10] sm:$0xff] %vm5047_vm14, %v1126_v49  ;;  %v1720_v14 = vpop.xlane.xlu0 %1719  ;;  %v1835_v36 = vadd.f32 1e-06, %v1819_v17  ;;  %v4275_v38 = vpop.eup %2255  ;;  %v1054_v57 = vmul.f32 1.442695, %v5062_v61  ;;  %v5066_v26 = vld [vmem:[#allocation59_spill] sm:$0xff]  ;;  %v1175_v17 = vmul.f32 %v4225_v33, %v1159_v45  ;;  %vm5077_vm14 = vmmov %vm5021_vm0 }
 0x2c8   :  { %1888 = vst.msk [vmem:[%s4561_s6 + $0x40] sm:$0xff] %vm5048_vm10, %v1865_v46  ;;  %v1113_v60 = vpop.xlane.xlu1 %1112  ;;  %v1750_v42 = vadd.f32 %v1720_v14, %v1686_v21  ;;  %v5067_v48 = vsub.f32 %v5065_v41, %v5066_v26  ;;  %v1592_v3 = vmul.f32 %v4275_v38, %v1576_v31  ;;  %v1583_v14 = vld [vmem:[#allocation6 + $0x50] sm:$0xff]  ;;  %v5079_v4 = vld [vmem:[#allocation75_spill] sm:$0xff]  ;;  %vm5081_vm10 = vmmov %vm5021_vm0 }
 0x2c9   :  { %1880 = vst.msk [vmem:[%s4561_s6] sm:$0xff] %vm5021_vm0, %v1849_v18  ;;  %v1134_v27 = vadd.f32 %v1113_v60, %v1086_v20  ;;  %2267 = vrcp.f32 %v1835_v36  ;;  %v1827_v53 = vld [vmem:[#allocation3 + $0x58] sm:$0xff]  ;;  %v2258_v32 = vpop.eup %2257  ;;  %v1072_v41 = vld [vmem:[#allocation3 + $0x60] sm:$0xff] }
 0x2ca   :  { %1766 = vst.msk [vmem:[#allocation7 + $0x8] sm:$0xff] %vm5055_vm3, %v1750_v42  ;;  %2269 = vpow2.f32 %v1036_v56  ;;  %v1545_v35 = vmul.f32 1.442695, %v5067_v48  ;;  %v4285_v49 = vpop.eup %2259  ;;  %v1843_v18 = vadd.f32 1e-06, %v1827_v53  ;;  %v1168_v56 = vld [vmem:[#allocation4 + $0x58] sm:$0xff]  ;;  %vm5082_vm3 = vmmov %vm5021_vm0 }
 0x2cb   :  { %1151 = vst.msk [vmem:[#allocation3 + $0x50] sm:$0xff] %vm5056_vm8, %v1134_v27  ;;  %v1736_v15 = vpop.xlane.xlu0 %1735  ;;  %2271 = vpow2.f32 %v1038_v44  ;;  %v4291_v46 = vpop.eup %2261  ;;  %v1599_v62 = vmul.f32 %v4285_v49, %v1583_v14  ;;  %v1184_v28 = vmul.f32 %v4217_v11, %v1168_v56  ;;  %vm5086_vm8 = vmmov %vm5021_vm0 }
 0x2cc   :  { %v1718_v10 = vpop.xlane.xlu1 %1717  ;;  %v1758_v5 = vadd.f32 %v1736_v15, %v1694_v1  ;;  %2273 = vpow2.f32 %v1052_v2  ;;  %v1600_v33 = vmul.f32 %v4291_v46, %v1584_v7  ;;  %v1183_v2 = vmul.f32 %v4238_v12, %v1167_v58 }
 0x2cd   :  { %v1749_v39 = vadd.f32 %v1718_v10, %v1685_v52  ;;  %v1912_v40 = vld [vmem:[#allocation6] sm:$0xff] }
 0x2ce   :  { %v1818_v29 = vld [vmem:[#allocation3 + $0x10] sm:$0xff]  ;;  %v1928_v13 = vadd.f32 1e-06, %v1912_v40  ;;  %1774 = vst.msk [vmem:[#allocation7 + $0x48] sm:$0xff] %vm5063_vm7, %v1758_v5  ;;  %v2264_v36 = vpop.eup %2263  ;;  %v1064_v40 = vld [vmem:[#allocation3 + $0x20] sm:$0xff]  ;;  %vm5090_vm7 = vmmov %vm5021_vm0 }
 0x2cf   :  { %v1834_v19 = vadd.f32 1e-06, %v1818_v29  ;;  %1765 = vst.msk [vmem:[#allocation7] sm:$0xff] %vm5064_vm12, %v1749_v39  ;;  %v1212_v24 = vpop.xlane.xlu0 %1211  ;;  %v1065_v39 = vld [vmem:[#allocation3 + $0x28] sm:$0xff]  ;;  %vm5091_vm12 = vmmov %vm5021_vm0 }
 0x2d0   :  { %v1734_v22 = vpop.xlane.xlu1 %1733  ;;  %2275 = vrcp.f32 %v1928_v13  ;;  %v1240_v54 = vadd.f32 %v1212_v24, %v1176_v51 }
 0x2d1   :  { %v1757_v63 = vadd.f32 %v1734_v22, %v1693_v55  ;;  %2277 = vrcp.f32 %v1834_v19  ;;  %v1897_v9 = vld [vmem:[#allocation7 + $0x8] sm:$0xff]  ;;  %v2266_v43 = vpop.eup %2265 }
 0x2d2   :  { %v1826_v34 = vld [vmem:[#allocation3 + $0x50] sm:$0xff]  ;;  %2279 = vpow2.f32 %v1054_v57  ;;  %v1947_v16 = vmul.f32 %v2258_v32, %v1897_v9  ;;  %1256 = vst.msk [vmem:[#allocation4 + $0x18] sm:$0xff] %vm5068_vm13, %v1240_v54  ;;  %v5078_v55 = vld [vmem:[#allocation73_spill] sm:$0xff]  ;;  %vm5095_vm13 = vmmov %vm5021_vm0 }
 0x2d3   :  { %1773 = vst.msk [vmem:[#allocation7 + $0x40] sm:$0xff] %vm5069_vm2, %v1757_v63  ;;  %v1612_v21 = vpop.xlane.xlu0 %1611  ;;  %v1842_v60 = vadd.f32 1e-06, %v1826_v34  ;;  %2281 = vpow2.f32 %v1545_v35  ;;  %v5080_v0 = vsub.f32 %v5078_v55, %v5079_v4  ;;  %v1073_v32 = vld [vmem:[#allocation3 + $0x68] sm:$0xff]  ;;  %v5084_v34 = vld [vmem:[#allocation79_spill] sm:$0xff]  ;;  %vm5096_vm2 = vmmov %vm5021_vm0 }
 0x2d4   :  { %v1210_v20 = vpop.xlane.xlu1 %1209  ;;  %1977 = vst.msk [vmem:[%s4562_s7 + $0x8] sm:$0xff] %vm5070_vm4, %v1947_v16  ;;  %v1640_v25 = vadd.f32 %v1612_v21, %v1592_v3  ;;  %2283 = vrcp.f32 %v1843_v18  ;;  %v5083_v9 = vld [vmem:[#allocation77_spill] sm:$0xff]  ;;  %v5087_v21 = vld [vmem:[#allocation88_spill] sm:$0xff]  ;;  %vm5097_vm4 = vmmov %vm5021_vm0 }
 0x2d5   :  { %v1239_v50 = vadd.f32 %v1210_v20, %v1175_v17  ;;  %v1905_v42 = vld [vmem:[#allocation7 + $0x48] sm:$0xff]  ;;  %2285 = vrcp.f32 %v1842_v60  ;;  %v1549_v61 = vmul.f32 1.442695, %v5080_v0  ;;  %v5085_v16 = vsub.f32 %v5083_v9, %v5084_v34  ;;  %v5088_v20 = vld [vmem:[#allocation90_spill] sm:$0xff] }
 0x2d6   :  { %v1963_v27 = vmul.f32 %v2264_v36, %v1905_v42  ;;  %1656 = vst.msk [vmem:[#allocation6 + $0x18] sm:$0xff] %vm5071_vm15, %v1640_v25  ;;  %v2268_v1 = vpop.eup %2267  ;;  %v1896_v57 = vld [vmem:[#allocation7] sm:$0xff]  ;;  %v5089_v7 = vsub.f32 %v5087_v21, %v5088_v20  ;;  %v1671_v36 = vld [vmem:[#allocation7 + $0x10] sm:$0xff]  ;;  %vm5098_vm15 = vmmov %vm5021_vm0 }
 0x2d7   :  { %1255 = vst.msk [vmem:[#allocation4 + $0x10] sm:$0xff] %vm5072_vm6, %v1239_v50  ;;  %v1628_v37 = vpop.xlane.xlu0 %1627  ;;  %v4305_v47 = vpop.eup %2269  ;;  %2287 = vpow2.f32 %v1549_v61  ;;  %v1565_v3 = vmul.f32 1.442695, %v5085_v16  ;;  %v1575_v50 = vld [vmem:[#allocation6 + $0x10] sm:$0xff]  ;;  %vm5102_vm6 = vmmov %vm5021_vm0 }
 0x2d8   :  { %v1626_v23 = vpop.xlane.xlu1 %1625  ;;  %1985 = vst.msk [vmem:[%s4562_s7 + $0x48] sm:$0xff] %vm5073_vm1, %v1963_v27  ;;  %v1648_v6 = vadd.f32 %v1628_v37, %v1600_v33  ;;  %v4311_v15 = vpop.eup %2271  ;;  %v1080_v31 = vmul.f32 %v4305_v47, %v1064_v40  ;;  %v1551_v14 = vmul.f32 1.442695, %v5089_v7  ;;  %vm5103_vm1 = vmmov %vm5021_vm0  ;;  %v1577_v7 = vld [vmem:[#allocation6 + $0x20] sm:$0xff] }
 0x2d9   :  { %v1647_v44 = vadd.f32 %v1626_v23, %v1599_v62  ;;  %v1803_v52 = vld [vmem:[#allocation4 + $0x18] sm:$0xff]  ;;  %v4313_v29 = vpop.eup %2273  ;;  %v1081_v22 = vmul.f32 %v4311_v15, %v1065_v39  ;;  %2289 = vpow2.f32 %v1565_v3  ;;  %v5107_v3 = vld [vmem:[#allocation96_spill] sm:$0xff] }
 0x2da   :  { %v1904_v30 = vld [vmem:[#allocation7 + $0x40] sm:$0xff]  ;;  %v1855_v8 = vmul.f32 %v2268_v1, %v1803_v52  ;;  %1664 = vst.msk [vmem:[#allocation6 + $0x58] sm:$0xff] %vm5074_vm5, %v1648_v6  ;;  %v1088_v25 = vmul.f32 %v4313_v29, %v1072_v41  ;;  %2291 = vpow2.f32 %v1551_v14  ;;  %vm5110_vm5 = vmmov %vm5021_vm0 }
 0x2db   :  { %v1961_v59 = vmul.f32 %v2266_v43, %v1904_v30  ;;  %1663 = vst.msk [vmem:[#allocation6 + $0x50] sm:$0xff] %vm5075_vm9, %v1647_v44  ;;  %v1228_v10 = vpop.xlane.xlu0 %1227  ;;  %v5092_v30 = vld [vmem:[#allocation92_spill] sm:$0xff]  ;;  %vm5111_vm9 = vmmov %vm5021_vm0 }
 0x2dc   :  { %v1226_v5 = vpop.xlane.xlu1 %1225  ;;  %1883 = vst.msk [vmem:[%s4561_s6 + $0x18] sm:$0xff] %vm5076_vm11, %v1855_v8  ;;  %v1248_v11 = vadd.f32 %v1228_v10, %v1184_v28  ;;  %v5093_v8 = vld [vmem:[#allocation94_spill] sm:$0xff]  ;;  %vm5115_vm11 = vmmov %vm5021_vm0 }
 0x2dd   :  { %1984 = vst.msk [vmem:[%s4562_s7 + $0x40] sm:$0xff] %vm5077_vm14, %v1961_v59  ;;  %v1247_v12 = vadd.f32 %v1226_v5, %v1183_v2  ;;  %v2276_v51 = vpop.eup %2275  ;;  %v1915_v26 = vld [vmem:[#allocation6 + $0x18] sm:$0xff]  ;;  %v5094_v59 = vsub.f32 %v5092_v30, %v5093_v8  ;;  %v1679_v5 = vld [vmem:[#allocation7 + $0x50] sm:$0xff]  ;;  %vm5116_vm14 = vmmov %vm5021_vm0 }
 0x2de   :  { %v1802_v13 = vld [vmem:[#allocation4 + $0x10] sm:$0xff]  ;;  %v2278_v19 = vpop.eup %2277  ;;  %v1945_v24 = vmul.f32 %v2276_v51, %v1896_v57  ;;  %1264 = vst.msk [vmem:[#allocation4 + $0x58] sm:$0xff] %vm5081_vm10, %v1248_v11  ;;  %v1931_v42 = vadd.f32 1e-06, %v1915_v26  ;;  %v1672_v11 = vld [vmem:[#allocation7 + $0x18] sm:$0xff]  ;;  %v1695_v61 = vmul.f32 %v4285_v49, %v1679_v5  ;;  %v5099_v57 = vld [vmem:[#allocation81_spill] sm:$0xff] }
 0x2df   :  { %1263 = vst.msk [vmem:[#allocation4 + $0x50] sm:$0xff] %vm5021_vm0, %v1247_v12  ;;  %v4330_v45 = vpop.eup %2279  ;;  %v1853_v53 = vmul.f32 %v2278_v19, %v1802_v13  ;;  %v1103_v54 = vpop.xlane.xlu0 %1102  ;;  %v1567_v28 = vmul.f32 1.442695, %v5094_v59  ;;  %v5100_v13 = vld [vmem:[#allocation83_spill] sm:$0xff]  ;;  %vm5117_vm10 = vmmov %vm5021_vm0 }
 0x2e0   :  { %v1101_v63 = vpop.xlane.xlu1 %1100  ;;  %1976 = vst.msk [vmem:[%s4562_s7] sm:$0xff] %vm5082_vm3, %v1945_v24  ;;  %v1129_v48 = vadd.f32 %v1103_v54, %v1081_v22  ;;  %v2282_v18 = vpop.eup %2281  ;;  %v1089_v60 = vmul.f32 %v4330_v45, %v1073_v32  ;;  %2293 = vrcp.f32 %v1931_v42  ;;  %v5101_v19 = vsub.f32 %v5099_v57, %v5100_v13  ;;  %v1161_v32 = vld [vmem:[#allocation4 + $0x20] sm:$0xff]  ;;  %vm5118_vm3 = vmmov %vm5021_vm0 }
 0x2e1   :  { %v1128_v35 = vadd.f32 %v1101_v63, %v1080_v31  ;;  %1882 = vst.msk [vmem:[%s4561_s6 + $0x10] sm:$0xff] %vm5086_vm8, %v1853_v53  ;;  %v2284_v62 = vpop.eup %2283  ;;  %v1923_v43 = vld [vmem:[#allocation6 + $0x58] sm:$0xff]  ;;  %v1591_v1 = vmul.f32 %v2282_v18, %v1575_v50  ;;  %v1687_v52 = vmul.f32 %v2282_v18, %v1671_v36  ;;  %v1688_v31 = vmul.f32 %v4275_v38, %v1672_v11  ;;  %vm5119_vm8 = vmmov %vm5021_vm0 }
 0x2e2   :  { %v1922_v17 = vld [vmem:[#allocation6 + $0x50] sm:$0xff]  ;;  %1146 = vst.msk [vmem:[#allocation3 + $0x28] sm:$0xff] %vm5090_vm7, %v1129_v48  ;;  %v2286_v58 = vpop.eup %2285  ;;  %v1939_v12 = vadd.f32 1e-06, %v1923_v43  ;;  %v1040_v24 = vmul.f32 1.442695, %v5101_v19  ;;  %v1177_v20 = vmul.f32 %v4305_v47, %v1161_v32  ;;  %vm5123_vm7 = vmmov %vm5021_vm0 }
 0x2e3   :  { %1145 = vst.msk [vmem:[#allocation3 + $0x20] sm:$0xff] %vm5091_vm12, %v1128_v35  ;;  %v1119_v27 = vpop.xlane.xlu0 %1118  ;;  %v1938_v37 = vadd.f32 1e-06, %v1922_v17  ;;  %v1680_v63 = vld [vmem:[#allocation7 + $0x58] sm:$0xff]  ;;  %v5104_v48 = vld [vmem:[#allocation85_spill] sm:$0xff]  ;;  %v1585_v43 = vld [vmem:[#allocation6 + $0x60] sm:$0xff] }
 0x2e4   :  { %v1117_v33 = vpop.xlane.xlu1 %1116  ;;  %v1137_v23 = vadd.f32 %v1119_v27, %v1089_v60  ;;  %v5105_v35 = vld [vmem:[#allocation87_spill] sm:$0xff]  ;;  %v4373_v16 = vpop.eup %2287  ;;  %v5108_v17 = vld [vmem:[#allocation97_spill] sm:$0xff]  ;;  %v1696_v21 = vmul.f32 %v4291_v46, %v1680_v63  ;;  %vm5124_vm12 = vmmov %vm5021_vm0 }
 0x2e5   :  { %v1136_v56 = vadd.f32 %v1117_v33, %v1088_v25  ;;  %v1811_v6 = vld [vmem:[#allocation4 + $0x58] sm:$0xff]  ;;  %2295 = vrcp.f32 %v1938_v37  ;;  %v5106_v9 = vsub.f32 %v5104_v48, %v5105_v35  ;;  %v5109_v18 = vsub.f32 %v5107_v3, %v5108_v17  ;;  %v1162_v25 = vld [vmem:[#allocation4 + $0x28] sm:$0xff]  ;;  %v5112_v37 = vld [vmem:[#allocation98_spill] sm:$0xff] }
 0x2e6   :  { %v1810_v44 = vld [vmem:[#allocation4 + $0x50] sm:$0xff]  ;;  %v1871_v2 = vmul.f32 %v2284_v62, %v1811_v6  ;;  %1154 = vst.msk [vmem:[#allocation3 + $0x68] sm:$0xff] %vm5095_vm13, %v1137_v23  ;;  %2297 = vpow2.f32 %v1567_v28  ;;  %v1593_v33 = vmul.f32 %v4373_v16, %v1577_v7  ;;  %v4383_v62 = vpop.eup %2289  ;;  %v5113_v23 = vld [vmem:[#allocation99_spill] sm:$0xff]  ;;  %v1170_v17 = vld [vmem:[#allocation4 + $0x68] sm:$0xff] }
 0x2e7   :  { %v1869_v10 = vmul.f32 %v2286_v58, %v1810_v44  ;;  %1153 = vst.msk [vmem:[#allocation3 + $0x60] sm:$0xff] %vm5096_vm2, %v1136_v56  ;;  %v1610_v39 = vpop.xlane.xlu0 %1609  ;;  %2299 = vrcp.f32 %v1939_v12  ;;  %v1056_v34 = vmul.f32 1.442695, %v5106_v9  ;;  %v1042_v38 = vmul.f32 1.442695, %v5109_v18  ;;  %v4391_v6 = vpop.eup %2291  ;;  %v1066_v18 = vld [vmem:[#allocation3 + $0x30] sm:$0xff]  ;;  %vm5125_vm13 = vmmov %vm5021_vm0 }
 0x2e8   :  { %v1722_v40 = vpop.xlane.xlu1 %1721  ;;  %1891 = vst.msk [vmem:[%s4561_s6 + $0x58] sm:$0xff] %vm5097_vm4, %v1871_v2  ;;  %v1639_v51 = vadd.f32 %v1610_v39, %v1591_v1  ;;  %v5114_v46 = vsub.f32 %v5112_v37, %v5113_v23  ;;  %v1178_v58 = vmul.f32 %v4311_v15, %v1162_v25  ;;  %v5126_v7 = vld [vmem:[#allocation93_spill] sm:$0xff]  ;;  %vm5129_vm2 = vmmov %vm5021_vm0 }
 0x2e9   :  { %1890 = vst.msk [vmem:[%s4561_s6 + $0x50] sm:$0xff] %vm5098_vm15, %v1869_v10  ;;  %v1751_v55 = vadd.f32 %v1722_v40, %v1687_v52  ;;  %v1821_v4 = vld [vmem:[#allocation3 + $0x28] sm:$0xff]  ;;  %v1601_v40 = vmul.f32 %v4383_v62, %v1585_v43  ;;  %vm5133_vm4 = vmmov %vm5021_vm0 }
 0x2ea   :  { %v1820_v0 = vld [vmem:[#allocation3 + $0x20] sm:$0xff]  ;;  %1655 = vst.msk [vmem:[#allocation6 + $0x10] sm:$0xff] %vm5102_vm6, %v1639_v51  ;;  %v1837_v41 = vadd.f32 1e-06, %v1821_v4  ;;  %v1058_v56 = vmul.f32 1.442695, %v5114_v46  ;;  %vm5134_vm15 = vmmov %vm5021_vm0  ;;  %v1186_v46 = vmul.f32 %v4330_v45, %v1170_v17 }
 0x2eb   :  { %v1836_v22 = vadd.f32 1e-06, %v1820_v0  ;;  %1767 = vst.msk [vmem:[#allocation7 + $0x10] sm:$0xff] %vm5103_vm1, %v1751_v55  ;;  %v1724_v53 = vpop.xlane.xlu0 %1723  ;;  %v1578_v52 = vld [vmem:[#allocation6 + $0x28] sm:$0xff]  ;;  %vm5135_vm6 = vmmov %vm5021_vm0 }
 0x2ec   :  { %v1738_v54 = vpop.xlane.xlu1 %1737  ;;  %v1752_v26 = vadd.f32 %v1724_v53, %v1688_v31  ;;  %v1594_v12 = vmul.f32 %v4391_v6, %v1578_v52  ;;  %v1586_v0 = vld [vmem:[#allocation6 + $0x68] sm:$0xff]  ;;  %v5121_v31 = vld [vmem:[#allocation91_spill] sm:$0xff]  ;;  %vm5139_vm1 = vmmov %vm5021_vm0 }
 0x2ed   :  { %v1759_v49 = vadd.f32 %v1738_v54, %v1695_v61  ;;  %2301 = vrcp.f32 %v1836_v22  ;;  %v2294_v30 = vpop.eup %2293  ;;  %v1829_v10 = vld [vmem:[#allocation3 + $0x68] sm:$0xff]  ;;  %v1169_v61 = vld [vmem:[#allocation4 + $0x60] sm:$0xff] }
 0x2ee   :  { %2303 = vpow2.f32 %v1040_v24  ;;  %1768 = vst.msk [vmem:[#allocation7 + $0x18] sm:$0xff] %vm5110_vm5, %v1752_v26  ;;  %v1828_v42 = vld [vmem:[#allocation3 + $0x60] sm:$0xff]  ;;  %v1845_v57 = vadd.f32 1e-06, %v1829_v10  ;;  %v5120_v22 = vld [vmem:[#allocation89_spill] sm:$0xff]  ;;  %v1185_v48 = vmul.f32 %v4313_v29, %v1169_v61  ;;  %vm5140_vm5 = vmmov %vm5021_vm0 }
 0x2ef   :  { %1775 = vst.msk [vmem:[#allocation7 + $0x50] sm:$0xff] %vm5111_vm9, %v1759_v49  ;;  %v1740_v14 = vpop.xlane.xlu0 %1739  ;;  %2305 = vrcp.f32 %v1837_v41  ;;  %v1844_v8 = vadd.f32 1e-06, %v1828_v42  ;;  %v5122_v53 = vsub.f32 %v5120_v22, %v5121_v31  ;;  %v5130_v42 = vld [vmem:[#allocation100_spill] sm:$0xff]  ;;  %vm5141_vm9 = vmmov %vm5021_vm0 }
 0x2f0   :  { %v1214_v60 = vpop.xlane.xlu1 %1213  ;;  %v1760_v50 = vadd.f32 %v1740_v14, %v1696_v21  ;;  %2307 = vpow2.f32 %v1056_v34  ;;  %v5127_v14 = vld [vmem:[#allocation95_spill] sm:$0xff] }
 0x2f1   :  { %v1241_v36 = vadd.f32 %v1214_v60, %v1177_v20  ;;  %v1914_v27 = vld [vmem:[#allocation6 + $0x10] sm:$0xff]  ;;  %2309 = vpow2.f32 %v1042_v38  ;;  %v1553_v54 = vmul.f32 1.442695, %v5122_v53  ;;  %v5128_v29 = vsub.f32 %v5126_v7, %v5127_v14 }
 0x2f2   :  { %v1930_v47 = vadd.f32 1e-06, %v1914_v27  ;;  %1776 = vst.msk [vmem:[#allocation7 + $0x58] sm:$0xff] %vm5115_vm11, %v1760_v50  ;;  %v2296_v2 = vpop.eup %2295  ;;  %v5131_v27 = vld [vmem:[#allocation101_spill] sm:$0xff]  ;;  %vm5142_vm11 = vmmov %vm5021_vm0 }
 0x2f3   :  { %1257 = vst.msk [vmem:[#allocation4 + $0x20] sm:$0xff] %vm5116_vm14, %v1241_v36  ;;  %v1216_v44 = vpop.xlane.xlu0 %1215  ;;  %v4397_v51 = vpop.eup %2297  ;;  %v1569_v60 = vmul.f32 1.442695, %v5128_v29  ;;  %vm5143_vm14 = vmmov %vm5021_vm0 }
 0x2f4   :  { %v1614_v1 = vpop.xlane.xlu1 %1613  ;;  %2311 = vrcp.f32 %v1930_v47  ;;  %v1242_v59 = vadd.f32 %v1216_v44, %v1178_v58  ;;  %v2300_v24 = vpop.eup %2299  ;;  %v1602_v49 = vmul.f32 %v4397_v51, %v1586_v0  ;;  %v1074_v47 = vld [vmem:[#allocation3 + $0x70] sm:$0xff] }
 0x2f5   :  { %v1641_v28 = vadd.f32 %v1614_v1, %v1593_v33  ;;  %v1899_v5 = vld [vmem:[#allocation7 + $0x18] sm:$0xff]  ;;  %2313 = vpow2.f32 %v1058_v56  ;;  %v5132_v33 = vsub.f32 %v5130_v42, %v5131_v27 }
 0x2f6   :  { %v1906_v39 = vld [vmem:[#allocation7 + $0x50] sm:$0xff]  ;;  %v1951_v11 = vmul.f32 %v2294_v30, %v1899_v5  ;;  %1258 = vst.msk [vmem:[#allocation4 + $0x28] sm:$0xff] %vm5117_vm10, %v1242_v59  ;;  %2315 = vrcp.f32 %v1844_v8  ;;  %v1067_v1 = vld [vmem:[#allocation3 + $0x38] sm:$0xff]  ;;  %vm5144_vm10 = vmmov %vm5021_vm0 }
 0x2f7   :  { %v1965_v15 = vmul.f32 %v2296_v2, %v1906_v39  ;;  %1657 = vst.msk [vmem:[#allocation6 + $0x20] sm:$0xff] %vm5021_vm0, %v1641_v28  ;;  %v1616_v55 = vpop.xlane.xlu0 %1615  ;;  %2317 = vrcp.f32 %v1845_v57  ;;  %v1555_v37 = vmul.f32 1.442695, %v5132_v33  ;;  %v1898_v28 = vld [vmem:[#allocation7 + $0x10] sm:$0xff]  ;;  %v5137_v39 = vld [vmem:[#allocation103_spill] sm:$0xff] }
 0x2f8   :  { %v1630_v4 = vpop.xlane.xlu1 %1629  ;;  %1979 = vst.msk [vmem:[%s4562_s7 + $0x18] sm:$0xff] %vm5118_vm3, %v1951_v11  ;;  %v1642_v13 = vadd.f32 %v1616_v55, %v1594_v12  ;;  %2319 = vpow2.f32 %v1553_v54  ;;  %v5136_v5 = vld [vmem:[#allocation102_spill] sm:$0xff]  ;;  %v1075_v57 = vld [vmem:[#allocation3 + $0x78] sm:$0xff]  ;;  %vm5145_vm3 = vmmov %vm5021_vm0 }
 0x2f9   :  { %1986 = vst.msk [vmem:[%s4562_s7 + $0x50] sm:$0xff] %vm5119_vm8, %v1965_v15  ;;  %v1649_v19 = vadd.f32 %v1630_v4, %v1601_v40  ;;  %v1907_v63 = vld [vmem:[#allocation7 + $0x58] sm:$0xff]  ;;  %2321 = vpow2.f32 %v1569_v60  ;;  %v5138_v40 = vsub.f32 %v5136_v5, %v5137_v39  ;;  %v1682_v60 = vld [vmem:[#allocation7 + $0x68] sm:$0xff]  ;;  %vm5146_vm8 = vmmov %vm5021_vm0 }
 0x2fa   :  { %v1804_v32 = vld [vmem:[#allocation4 + $0x20] sm:$0xff]  ;;  %v2302_v41 = vpop.eup %2301  ;;  %v1967_v26 = vmul.f32 %v2300_v24, %v1907_v63  ;;  %1658 = vst.msk [vmem:[#allocation6 + $0x28] sm:$0xff] %vm5123_vm7, %v1642_v13  ;;  %2323 = vpow2.f32 %v1555_v37  ;;  %vm5147_vm7 = vmmov %vm5021_vm0 }
 0x2fb   :  { %1665 = vst.msk [vmem:[#allocation6 + $0x60] sm:$0xff] %vm5124_vm12, %v1649_v19  ;;  %v4414_v35 = vpop.eup %2303  ;;  %v1857_v9 = vmul.f32 %v2302_v41, %v1804_v32  ;;  %v1632_v34 = vpop.xlane.xlu0 %1631  ;;  %v1571_v11 = vmul.f32 1.442695, %v5138_v40  ;;  %v1673_v13 = vld [vmem:[#allocation7 + $0x20] sm:$0xff]  ;;  %vm5148_vm12 = vmmov %vm5021_vm0  ;;  %v1588_v40 = vld [vmem:[#allocation6 + $0x78] sm:$0xff] }
 0x2fc   :  { %v1230_v3 = vpop.xlane.xlu1 %1229  ;;  %1987 = vst.msk [vmem:[%s4562_s7 + $0x58] sm:$0xff] %vm5125_vm13, %v1967_v26  ;;  %v1650_v38 = vadd.f32 %v1632_v34, %v1602_v49  ;;  %v2306_v20 = vpop.eup %2305  ;;  %v1082_v56 = vmul.f32 %v4414_v35, %v1066_v18  ;;  %v1689_v41 = vmul.f32 %v4373_v16, %v1673_v13  ;;  %vm5149_vm13 = vmmov %vm5021_vm0 }
 0x2fd   :  { %v1249_v21 = vadd.f32 %v1230_v3, %v1185_v48  ;;  %1884 = vst.msk [vmem:[%s4561_s6 + $0x20] sm:$0xff] %vm5129_vm2, %v1857_v9  ;;  %v1805_v25 = vld [vmem:[#allocation4 + $0x28] sm:$0xff]  ;;  %v4427_v36 = vpop.eup %2307  ;;  %v1681_v9 = vld [vmem:[#allocation7 + $0x60] sm:$0xff]  ;;  %vm5150_vm2 = vmmov %vm5021_vm0 }
 0x2fe   :  { %v1916_v50 = vld [vmem:[#allocation6 + $0x20] sm:$0xff]  ;;  %v1859_v23 = vmul.f32 %v2306_v20, %v1805_v25  ;;  %1666 = vst.msk [vmem:[#allocation6 + $0x68] sm:$0xff] %vm5133_vm4, %v1650_v38  ;;  %v4436_v58 = vpop.eup %2309  ;;  %v1090_v10 = vmul.f32 %v4427_v36, %v1074_v47  ;;  %v1674_v48 = vld [vmem:[#allocation7 + $0x28] sm:$0xff]  ;;  %v1697_v7 = vmul.f32 %v4383_v62, %v1681_v9  ;;  %v1579_v25 = vld [vmem:[#allocation6 + $0x30] sm:$0xff]  ;;  %v1698_v62 = vmul.f32 %v4397_v51, %v1682_v60 }
 0x2ff   :  { %1265 = vst.msk [vmem:[#allocation4 + $0x60] sm:$0xff] %vm5134_vm15, %v1249_v21  ;;  %v1232_v43 = vpop.xlane.xlu0 %1231  ;;  %v1932_v52 = vadd.f32 1e-06, %v1916_v50  ;;  %v1083_v12 = vmul.f32 %v4436_v58, %v1067_v1  ;;  %v1690_v16 = vmul.f32 %v4391_v6, %v1674_v48  ;;  %v1587_v47 = vld [vmem:[#allocation6 + $0x70] sm:$0xff]  ;;  %vm5151_vm4 = vmmov %vm5021_vm0 }
 0x300   :  { %v1105_v44 = vpop.xlane.xlu1 %1104  ;;  %1885 = vst.msk [vmem:[%s4561_s6 + $0x28] sm:$0xff] %vm5135_vm6, %v1859_v23  ;;  %v1250_v30 = vadd.f32 %v1232_v43, %v1186_v46  ;;  %vm5152_vm15 = vmmov %vm5021_vm0 }
 0x301   :  { %v1130_v8 = vadd.f32 %v1105_v44, %v1082_v56  ;;  %v2312_v59 = vpop.eup %2311  ;;  %v1917_v45 = vld [vmem:[#allocation6 + $0x28] sm:$0xff]  ;;  %2325 = vrcp.f32 %v1932_v52  ;;  %v1580_v56 = vld [vmem:[#allocation6 + $0x38] sm:$0xff]  ;;  %vm5153_vm6 = vmmov %vm5021_vm0 }
 0x302   :  { %v1924_v2 = vld [vmem:[#allocation6 + $0x60] sm:$0xff]  ;;  %v1949_v15 = vmul.f32 %v2312_v59, %v1898_v28  ;;  %1266 = vst.msk [vmem:[#allocation4 + $0x68] sm:$0xff] %vm5139_vm1, %v1250_v30  ;;  %v4449_v55 = vpop.eup %2313  ;;  %v1933_v4 = vadd.f32 1e-06, %v1917_v45  ;;  %2327 = vpow2.f32 %v1571_v11  ;;  %v1163_v11 = vld [vmem:[#allocation4 + $0x30] sm:$0xff]  ;;  %vm5154_vm1 = vmmov %vm5021_vm0 }
 0x303   :  { %1147 = vst.msk [vmem:[#allocation3 + $0x30] sm:$0xff] %vm5140_vm5, %v1130_v8  ;;  %v1107_v0 = vpop.xlane.xlu0 %1106  ;;  %v1940_v19 = vadd.f32 1e-06, %v1924_v2  ;;  %v2316_v31 = vpop.eup %2315  ;;  %v1091_v32 = vmul.f32 %v4449_v55, %v1075_v57  ;;  %vm5155_vm5 = vmmov %vm5021_vm0 }
 0x304   :  { %v1121_v61 = vpop.xlane.xlu1 %1120  ;;  %1978 = vst.msk [vmem:[%s4562_s7 + $0x10] sm:$0xff] %vm5141_vm9, %v1949_v15  ;;  %v1131_v24 = vadd.f32 %v1107_v0, %v1083_v12  ;;  %2329 = vrcp.f32 %v1933_v4  ;;  %v2318_v18 = vpop.eup %2317  ;;  %vm5156_vm9 = vmmov %vm5021_vm0 }
 0x305   :  { %v1138_v22 = vadd.f32 %v1121_v61, %v1090_v10  ;;  %v1925_v53 = vld [vmem:[#allocation6 + $0x68] sm:$0xff]  ;;  %2331 = vrcp.f32 %v1940_v19  ;;  %v4463_v21 = vpop.eup %2319 }
 0x306   :  { %v1812_v54 = vld [vmem:[#allocation4 + $0x60] sm:$0xff]  ;;  %1148 = vst.msk [vmem:[#allocation3 + $0x38] sm:$0xff] %vm5142_vm11, %v1131_v24  ;;  %v1941_v34 = vadd.f32 1e-06, %v1925_v53  ;;  %v4473_v33 = vpop.eup %2321  ;;  %v1595_v6 = vmul.f32 %v4463_v21, %v1579_v25  ;;  %v1179_v53 = vmul.f32 %v4414_v35, %v1163_v11  ;;  %vm5157_vm11 = vmmov %vm5021_vm0 }
 0x307   :  { %v1873_v63 = vmul.f32 %v2316_v31, %v1812_v54  ;;  %1155 = vst.msk [vmem:[#allocation3 + $0x70] sm:$0xff] %vm5143_vm14, %v1138_v22  ;;  %v1123_v26 = vpop.xlane.xlu0 %1122  ;;  %v4479_v37 = vpop.eup %2323  ;;  %v1603_v45 = vmul.f32 %v4473_v33, %v1587_v47  ;;  %vm5158_vm14 = vmmov %vm5021_vm0 }
 0x308   :  { %v1726_v49 = vpop.xlane.xlu1 %1725  ;;  %v1139_v3 = vadd.f32 %v1123_v26, %v1091_v32  ;;  %2333 = vrcp.f32 %v1941_v34  ;;  %v1596_v51 = vmul.f32 %v4479_v37, %v1580_v56  ;;  %v1171_v26 = vld [vmem:[#allocation4 + $0x70] sm:$0xff] }
 0x309   :  { %1892 = vst.msk [vmem:[%s4561_s6 + $0x60] sm:$0xff] %vm5144_vm10, %v1873_v63  ;;  %v1753_v17 = vadd.f32 %v1726_v49, %v1689_v41  ;;  %v1813_v38 = vld [vmem:[#allocation4 + $0x68] sm:$0xff]  ;;  %v1164_v41 = vld [vmem:[#allocation4 + $0x38] sm:$0xff]  ;;  %vm5159_vm10 = vmmov %vm5021_vm0 }
 0x30a   :  { %v1875_v20 = vmul.f32 %v2318_v18, %v1813_v38  ;;  %1156 = vst.msk [vmem:[#allocation3 + $0x78] sm:$0xff] %vm5021_vm0, %v1139_v3  ;;  %v1822_v27 = vld [vmem:[#allocation3 + $0x30] sm:$0xff]  ;;  %v1180_v18 = vmul.f32 %v4436_v58, %v1164_v41  ;;  %v1187_v38 = vmul.f32 %v4427_v36, %v1171_v26 }
 0x30b   :  { %1769 = vst.msk [vmem:[#allocation7 + $0x20] sm:$0xff] %vm5145_vm3, %v1753_v17  ;;  %v1728_v14 = vpop.xlane.xlu0 %1727  ;;  %v1838_v43 = vadd.f32 1e-06, %v1822_v27  ;;  %vm5160_vm3 = vmmov %vm5021_vm0 }
 0x30c   :  { %v1742_v29 = vpop.xlane.xlu1 %1741  ;;  %1893 = vst.msk [vmem:[%s4561_s6 + $0x68] sm:$0xff] %vm5146_vm8, %v1875_v20  ;;  %v1754_v50 = vadd.f32 %v1728_v14, %v1690_v16  ;;  %v1675_v14 = vld [vmem:[#allocation7 + $0x30] sm:$0xff]  ;;  %vm5161_vm8 = vmmov %vm5021_vm0 }
 0x30d   :  { %v1761_v42 = vadd.f32 %v1742_v29, %v1697_v7  ;;  %v1823_v44 = vld [vmem:[#allocation3 + $0x38] sm:$0xff]  ;;  %2335 = vrcp.f32 %v1838_v43  ;;  %v1691_v58 = vmul.f32 %v4463_v21, %v1675_v14 }
 0x30e   :  { %1770 = vst.msk [vmem:[#allocation7 + $0x28] sm:$0xff] %vm5147_vm7, %v1754_v50  ;;  %v2326_v30 = vpop.eup %2325  ;;  %v1830_v8 = vld [vmem:[#allocation3 + $0x70] sm:$0xff]  ;;  %v1839_v10 = vadd.f32 1e-06, %v1823_v44  ;;  %v1172_v7 = vld [vmem:[#allocation4 + $0x78] sm:$0xff]  ;;  %vm5162_vm7 = vmmov %vm5021_vm0 }
 0x30f   :  { %1777 = vst.msk [vmem:[#allocation7 + $0x60] sm:$0xff] %vm5148_vm12, %v1761_v42  ;;  %v1744_v23 = vpop.xlane.xlu0 %1743  ;;  %v4485_v2 = vpop.eup %2327  ;;  %v1846_v12 = vadd.f32 1e-06, %v1830_v8  ;;  %v1188_v36 = vmul.f32 %v4449_v55, %v1172_v7  ;;  %vm5163_vm12 = vmmov %vm5021_vm0 }
 0x310   :  { %v1618_v46 = vpop.xlane.xlu1 %1617  ;;  %v1762_v1 = vadd.f32 %v1744_v23, %v1698_v62  ;;  %v1604_v31 = vmul.f32 %v4485_v2, %v1588_v40  ;;  %2337 = vrcp.f32 %v1839_v10  ;;  %v1676_v23 = vld [vmem:[#allocation7 + $0x38] sm:$0xff] }
 0x311   :  { %v1643_v52 = vadd.f32 %v1618_v46, %v1595_v6  ;;  %v2330_v15 = vpop.eup %2329  ;;  %v1831_v4 = vld [vmem:[#allocation3 + $0x78] sm:$0xff]  ;;  %2339 = vrcp.f32 %v1846_v12  ;;  %v1683_v46 = vld [vmem:[#allocation7 + $0x70] sm:$0xff]  ;;  %v1692_v55 = vmul.f32 %v4479_v37, %v1676_v23 }
 0x312   :  { %v1900_v59 = vld [vmem:[#allocation7 + $0x20] sm:$0xff]  ;;  %1778 = vst.msk [vmem:[#allocation7 + $0x68] sm:$0xff] %vm5149_vm13, %v1762_v1  ;;  %v2332_v57 = vpop.eup %2331  ;;  %v1847_v54 = vadd.f32 1e-06, %v1831_v4  ;;  %v1699_v21 = vmul.f32 %v4473_v33, %v1683_v46  ;;  %vm5164_vm13 = vmmov %vm5021_vm0 }
 0x313   :  { %v1953_v28 = vmul.f32 %v2326_v30, %v1900_v59  ;;  %1659 = vst.msk [vmem:[#allocation6 + $0x30] sm:$0xff] %vm5150_vm2, %v1643_v52  ;;  %v1620_v5 = vpop.xlane.xlu0 %1619  ;;  %vm5165_vm2 = vmmov %vm5021_vm0 }
 0x314   :  { %v1634_v39 = vpop.xlane.xlu1 %1633  ;;  %v1644_v0 = vadd.f32 %v1620_v5, %v1596_v51  ;;  %2341 = vrcp.f32 %v1847_v54 }
 0x315   :  { %1980 = vst.msk [vmem:[%s4562_s7 + $0x20] sm:$0xff] %vm5151_vm4, %v1953_v28  ;;  %v1651_v61 = vadd.f32 %v1634_v39, %v1603_v45  ;;  %v1901_v13 = vld [vmem:[#allocation7 + $0x28] sm:$0xff]  ;;  %v2334_v35 = vpop.eup %2333  ;;  %v1684_v28 = vld [vmem:[#allocation7 + $0x78] sm:$0xff]  ;;  %vm5166_vm4 = vmmov %vm5021_vm0 }
 0x316   :  { %v1908_v19 = vld [vmem:[#allocation7 + $0x60] sm:$0xff]  ;;  %v1955_v24 = vmul.f32 %v2330_v15, %v1901_v13  ;;  %1660 = vst.msk [vmem:[#allocation6 + $0x38] sm:$0xff] %vm5152_vm15, %v1644_v0  ;;  %v1700_v33 = vmul.f32 %v4485_v2, %v1684_v28  ;;  %vm5167_vm15 = vmmov %vm5021_vm0 }
 0x317   :  { %v1969_v22 = vmul.f32 %v2332_v57, %v1908_v19  ;;  %1667 = vst.msk [vmem:[#allocation6 + $0x70] sm:$0xff] %vm5153_vm6, %v1651_v61  ;;  %v1636_v63 = vpop.xlane.xlu0 %1635  ;;  %vm5168_vm6 = vmmov %vm5021_vm0 }
 0x318   :  { %v1218_v32 = vpop.xlane.xlu1 %1217  ;;  %1981 = vst.msk [vmem:[%s4562_s7 + $0x28] sm:$0xff] %vm5154_vm1, %v1955_v24  ;;  %v1652_v49 = vadd.f32 %v1636_v63, %v1604_v31  ;;  %vm5169_vm1 = vmmov %vm5021_vm0 }
 0x319   :  { %1988 = vst.msk [vmem:[%s4562_s7 + $0x60] sm:$0xff] %vm5155_vm5, %v1969_v22  ;;  %v1243_v48 = vadd.f32 %v1218_v32, %v1179_v53  ;;  %v1909_v9 = vld [vmem:[#allocation7 + $0x68] sm:$0xff]  ;;  %vm5170_vm5 = vmmov %vm5021_vm0 }
 0x31a   :  { %v1918_v34 = vld [vmem:[#allocation6 + $0x30] sm:$0xff]  ;;  %v1971_v3 = vmul.f32 %v2334_v35, %v1909_v9  ;;  %1668 = vst.msk [vmem:[#allocation6 + $0x78] sm:$0xff] %vm5156_vm9, %v1652_v49  ;;  %v2336_v43 = vpop.eup %2335  ;;  %vm5171_vm9 = vmmov %vm5021_vm0 }
 0x31b   :  { %v1934_v17 = vadd.f32 1e-06, %v1918_v34  ;;  %1259 = vst.msk [vmem:[#allocation4 + $0x30] sm:$0xff] %vm5157_vm11, %v1243_v48  ;;  %v1220_v20 = vpop.xlane.xlu0 %1219  ;;  %vm5172_vm11 = vmmov %vm5021_vm0 }
 0x31c   :  { %v1234_v16 = vpop.xlane.xlu1 %1233  ;;  %1989 = vst.msk [vmem:[%s4562_s7 + $0x68] sm:$0xff] %vm5158_vm14, %v1971_v3  ;;  %v1244_v29 = vadd.f32 %v1220_v20, %v1180_v18 }
 0x31d   :  { %2343 = vrcp.f32 %v1934_v17  ;;  %v1251_v60 = vadd.f32 %v1234_v16, %v1187_v38  ;;  %v1919_v25 = vld [vmem:[#allocation6 + $0x38] sm:$0xff]  ;;  %v2338_v51 = vpop.eup %2337 }
 0x31e   :  { %v1926_v50 = vld [vmem:[#allocation6 + $0x70] sm:$0xff]  ;;  %v1935_v42 = vadd.f32 1e-06, %v1919_v25  ;;  %1260 = vst.msk [vmem:[#allocation4 + $0x38] sm:$0xff] %vm5159_vm10, %v1244_v29  ;;  %v2340_v5 = vpop.eup %2339 }
 0x31f   :  { %v1942_v27 = vadd.f32 1e-06, %v1926_v50  ;;  %1267 = vst.msk [vmem:[#allocation4 + $0x70] sm:$0xff] %vm5021_vm0, %v1251_v60  ;;  %v1236_v62 = vpop.xlane.xlu0 %1235 }
 0x320   :  { %v1730_v6 = vpop.xlane.xlu1 %1729  ;;  %2345 = vrcp.f32 %v1935_v42  ;;  %v1252_v56 = vadd.f32 %v1236_v62, %v1188_v36 }
 0x321   :  { %v1755_v47 = vadd.f32 %v1730_v6, %v1691_v58  ;;  %2347 = vrcp.f32 %v1942_v27  ;;  %v1927_v44 = vld [vmem:[#allocation6 + $0x78] sm:$0xff]  ;;  %v2342_v12 = vpop.eup %2341 }
 0x322   :  { %v1806_v1 = vld [vmem:[#allocation4 + $0x30] sm:$0xff]  ;;  %v1943_v52 = vadd.f32 1e-06, %v1927_v44  ;;  %1268 = vst.msk [vmem:[#allocation4 + $0x78] sm:$0xff] %vm5160_vm3, %v1252_v56 }
 0x323   :  { %v1861_v30 = vmul.f32 %v2336_v43, %v1806_v1  ;;  %1771 = vst.msk [vmem:[#allocation7 + $0x30] sm:$0xff] %vm5161_vm8, %v1755_v47  ;;  %v1732_v8 = vpop.xlane.xlu0 %1731 }
 0x324   :  { %v1746_v59 = vpop.xlane.xlu1 %1745  ;;  %2349 = vrcp.f32 %v1943_v52  ;;  %v1756_v45 = vadd.f32 %v1732_v8, %v1692_v55 }
 0x325   :  { %1886 = vst.msk [vmem:[%s4561_s6 + $0x30] sm:$0xff] %vm5162_vm7, %v1861_v30  ;;  %v1763_v10 = vadd.f32 %v1746_v59, %v1699_v21  ;;  %v1807_v39 = vld [vmem:[#allocation4 + $0x38] sm:$0xff] }
 0x326   :  { %v1814_v40 = vld [vmem:[#allocation4 + $0x70] sm:$0xff]  ;;  %v1863_v11 = vmul.f32 %v2338_v51, %v1807_v39  ;;  %1772 = vst.msk [vmem:[#allocation7 + $0x38] sm:$0xff] %vm5163_vm12, %v1756_v45 }
 0x327   :  { %v1877_v15 = vmul.f32 %v2340_v5, %v1814_v40  ;;  %1779 = vst.msk [vmem:[#allocation7 + $0x70] sm:$0xff] %vm5164_vm13, %v1763_v10  ;;  %v1748_v37 = vpop.xlane.xlu0 %1747 }
 0x328   :  { %1887 = vst.msk [vmem:[%s4561_s6 + $0x38] sm:$0xff] %vm5165_vm2, %v1863_v11  ;;  %v1764_v4 = vadd.f32 %v1748_v37, %v1700_v33 }
 0x329   :  { %1894 = vst.msk [vmem:[%s4561_s6 + $0x70] sm:$0xff] %vm5166_vm4, %v1877_v15  ;;  %v1815_v61 = vld [vmem:[#allocation4 + $0x78] sm:$0xff] }
 0x32a   :  { %v2344_v0 = vpop.eup %2343  ;;  %v1902_v57 = vld [vmem:[#allocation7 + $0x30] sm:$0xff]  ;;  %v1879_v13 = vmul.f32 %v2342_v12, %v1815_v61  ;;  %1780 = vst.msk [vmem:[#allocation7 + $0x78] sm:$0xff] %vm5167_vm15, %v1764_v4 }
 0x32b   :  { %v1957_v19 = vmul.f32 %v2344_v0, %v1902_v57 }
 0x32c   :  { %1895 = vst.msk [vmem:[%s4561_s6 + $0x78] sm:$0xff] %vm5168_vm6, %v1879_v13 }
 0x32d   :  { %1982 = vst.msk [vmem:[%s4562_s7 + $0x30] sm:$0xff] %vm5169_vm1, %v1957_v19  ;;  %v2346_v2 = vpop.eup %2345  ;;  %v1903_v24 = vld [vmem:[#allocation7 + $0x38] sm:$0xff] }
 0x32e   :  { %v1910_v22 = vld [vmem:[#allocation7 + $0x70] sm:$0xff]  ;;  %v2348_v31 = vpop.eup %2347  ;;  %v1959_v53 = vmul.f32 %v2346_v2, %v1903_v24 }
 0x32f   :  { %v1973_v54 = vmul.f32 %v2348_v31, %v1910_v22 }
 0x330   :  { %1983 = vst.msk [vmem:[%s4562_s7 + $0x38] sm:$0xff] %vm5170_vm5, %v1959_v53 }
 0x331   :  { %v2350_v63 = vpop.eup %2349  ;;  %1990 = vst.msk [vmem:[%s4562_s7 + $0x70] sm:$0xff] %vm5171_vm9, %v1973_v54  ;;  %v1911_v32 = vld [vmem:[#allocation7 + $0x78] sm:$0xff] }
 0x332   :  { %v1975_v41 = vmul.f32 %v2350_v63, %v1911_v32 }
 0x334   :  { %1991 = vst.msk [vmem:[%s4562_s7 + $0x78] sm:$0xff] %vm5172_vm11, %v1975_v41 }

</bundles_post_ra>
